<compile_context>
chip_gen: v7x
topology: tpu7x:2x2x1
jax: 0.10.0
libtpu: 0.0.40
codegen_flags: <defaults>
</compile_context>

<pallas_src>
import functools

import jax
import jax.numpy as jnp
import numpy as np
from jax.experimental import pallas as pl
from jax.experimental.pallas import tpu as pltpu


# ---------------------------------------------------------------------------
# Pallas kernels
# ---------------------------------------------------------------------------
def _conv_gemm_kernel(w_ref, p_ref, o_ref, *, relu, scale):
    """(Cout, K)bf16 @ (K, TM)bf16 -> f32 acc -> (*scale) -> ReLU -> bf16."""
    acc = jnp.dot(w_ref[...], p_ref[...], preferred_element_type=jnp.float32)
    if scale != 1.0:
        acc = acc * jnp.float32(scale)
    if relu:
        acc = jnp.maximum(acc, 0.0)
    o_ref[...] = acc.astype(o_ref.dtype)


def _fc_fused_kernel(x_ref, w1_ref, b1_ref, w2_ref, b2_ref, q_ref, h_ref):
    """fc1 (N-tiled over the grid) + ReLU, fc2 fused on the last grid step.

    h_ref (B, 512) is the VMEM-resident output used as the accumulator; each
    step fills one 128-wide lane slab of it.  q_ref is written once at the
    last step from the fully assembled h.
    """
    tn = w1_ref.shape[1]
    j = pl.program_id(0)

    h_j = jnp.dot(x_ref[...], w1_ref[...], preferred_element_type=jnp.float32)
    h_j = jnp.maximum(h_j + b1_ref[...], 0.0)
    col = pl.multiple_of(j * tn, tn)
    h_ref[:, pl.ds(col, tn)] = h_j

    @pl.when(j == pl.num_programs(0) - 1)
    def _():
        q = jnp.dot(h_ref[...], w2_ref[...], preferred_element_type=jnp.float32)
        q_ref[...] = q + b2_ref[...]


# ---------------------------------------------------------------------------
# pallas_call wrappers
# ---------------------------------------------------------------------------
def conv_gemm(w_mat, patches, *, relu=True, scale=1.0, tm=512):
    """y^T = relu(scale * w_mat @ patches) with M (=B*OH*OW) on lanes."""
    Cout, K = w_mat.shape
    K2, M = patches.shape
    assert K == K2
    if M <= tm:
        tm = M                       # single full-extent block (always legal)
    else:
        tm = (tm // 128) * 128       # lane tiles must be multiples of 128
    grid = (pl.cdiv(M, tm),)
    kernel = functools.partial(_conv_gemm_kernel, relu=relu, scale=scale)
    return pl.pallas_call(
        kernel,
        out_shape=jax.ShapeDtypeStruct((Cout, M), jnp.bfloat16),
        grid=grid,
        in_specs=[pl.BlockSpec((Cout, K), lambda i: (0, 0)),   # weight resident
                  pl.BlockSpec((K, tm), lambda i: (0, i))],    # patch stream
        out_specs=pl.BlockSpec((Cout, tm), lambda i: (0, i)),
        compiler_params=pltpu.CompilerParams(
            dimension_semantics=("parallel",)),
    )(w_mat, patches)


def fc_fused(x, w1t, b1, w2t, b2, *, tn=128):
    """q, h = fc2(relu(fc1(x))), single pallas_call, fc1 tiled over N."""
    B, K = x.shape
    K2, N = w1t.shape
    N2, A = w2t.shape
    assert K == K2 and N == N2 and N % tn == 0
    q, h = pl.pallas_call(
        _fc_fused_kernel,
        out_shape=(jax.ShapeDtypeStruct((B, A), jnp.float32),
                   jax.ShapeDtypeStruct((B, N), jnp.float32)),
        grid=(N // tn,),
        in_specs=[pl.BlockSpec((B, K), lambda j: (0, 0)),   # x resident
                  pl.BlockSpec((K, tn), lambda j: (0, j)),  # fc1 weight stream
                  pl.BlockSpec((1, tn), lambda j: (0, j)),
                  pl.BlockSpec((N, A), lambda j: (0, 0)),   # fc2 weight resident
                  pl.BlockSpec((1, A), lambda j: (0, 0))],
        out_specs=(pl.BlockSpec((B, A), lambda j: (0, 0)),
                   pl.BlockSpec((B, N), lambda j: (0, 0))),
        compiler_params=pltpu.CompilerParams(
            dimension_semantics=("arbitrary",)),
    )(x, w1t, b1, w2t, b2)
    return q, h


# ---------------------------------------------------------------------------
# JAX glue: im2col patch extraction in (C, B, H, W) layout (data movement)
# ---------------------------------------------------------------------------
def _im2col_cbhw(a, k, stride):
    """a: (C, B, H, W) -> patches^T (k*k*C, B*OH*OW), rows = (kh, kw, c)."""
    C, B, H, W = a.shape
    OH = (H - k) // stride + 1
    OW = (W - k) // stride + 1
    taps = []
    for kh in range(k):
        for kw in range(k):
            taps.append(a[:, :, kh:kh + stride * OH:stride,
                             kw:kw + stride * OW:stride])      # (C,B,OH,OW)
    p = jnp.stack(taps, axis=0)                                # (k*k,C,B,OH,OW)
    return p.reshape(k * k * C, B * OH * OW), OH, OW


# ---------------------------------------------------------------------------
# Parameters: PyTorch-convention master weights + one-time kernel layout prep
# ---------------------------------------------------------------------------
def init_params(key, n_actions):
    ks = jax.random.split(key, 5)

    def kaiming(k, shape, fan_in):
        return jax.random.normal(k, shape, dtype=jnp.float32) * np.sqrt(2.0 / fan_in)

    return {
        "conv1_w": kaiming(ks[0], (32, 4, 8, 8), 4 * 8 * 8),     # OIHW
        "conv2_w": kaiming(ks[1], (64, 32, 4, 4), 32 * 4 * 4),
        "conv3_w": kaiming(ks[2], (64, 64, 3, 3), 64 * 3 * 3),
        "fc1_w": kaiming(ks[3], (512, 64 * 7 * 7), 64 * 7 * 7),  # (out, in)
        "fc1_b": jnp.zeros((512,), jnp.float32),
        "fc2_w": kaiming(ks[4], (n_actions, 512), 512),
        "fc2_b": jnp.zeros((n_actions,), jnp.float32),
    }


def prepare_params(params):
    """One-time layout transforms + bf16 casts for the kernels."""
    def conv_mat(w_oihw):           # OIHW -> (O, KH*KW*I), rows match patches
        o = w_oihw.shape[0]
        return jnp.transpose(w_oihw, (0, 2, 3, 1)).reshape(o, -1).astype(jnp.bfloat16)

    return {
        "c1w": conv_mat(params["conv1_w"]),                       # (32, 256)
        "c2w": conv_mat(params["conv2_w"]),                       # (64, 512)
        "c3w": conv_mat(params["conv3_w"]),                       # (64, 576)
        "w1t": params["fc1_w"].T.astype(jnp.bfloat16),            # (3136, 512)
        "b1": params["fc1_b"].reshape(1, -1).astype(jnp.float32),
        "w2t": params["fc2_w"].T.astype(jnp.float32),             # (512, A)
        "b2": params["fc2_b"].reshape(1, -1).astype(jnp.float32),
    }


# ---------------------------------------------------------------------------
# Forward pass (matches DQN.forward semantics)
# ---------------------------------------------------------------------------
def dqn_forward(kp, x_nchw, last_layer=False):
    B = x_nchw.shape[0]
    # (B,4,84,84) uint8 -> (Cin,B,H,W) bf16 (pixel values are exact in bf16;
    # the /255 scale is applied to the f32 accumulator inside the conv1 kernel)
    x = jnp.transpose(x_nchw, (1, 0, 2, 3)).astype(jnp.bfloat16)

    def conv(a_cbhw, w_mat, k, stride, scale=1.0):
        p, OH, OW = _im2col_cbhw(a_cbhw, k, stride)
        y = conv_gemm(w_mat, p, relu=True, scale=scale)        # (Cout, B*OH*OW)
        return y.reshape(w_mat.shape[0], a_cbhw.shape[1], OH, OW)

    a1 = conv(x, kp["c1w"], 8, 4, scale=1.0 / 255.0)   # (32, B, 20, 20)
    a2 = conv(a1, kp["c2w"], 4, 2)                     # (64, B,  9,  9)
    a3 = conv(a2, kp["c3w"], 3, 1)                     # (64, B,  7,  7)

    # PyTorch flattens NCHW -> per-batch (c, h, w) order for fc1.
    x_fc = jnp.transpose(a3, (1, 0, 2, 3)).reshape(B, -1)      # (B, 3136) bf16
    q, h = fc_fused(x_fc, kp["w1t"], kp["b1"], kp["w2t"], kp["b2"])

    if last_layer:
        return q, h
    return q


# ---------------------------------------------------------------------------
# Pure-JAX f32 reference (correctness check only)
# ---------------------------------------------------------------------------
def dqn_reference(params, x_nchw):
    x = x_nchw.astype(jnp.float32) / 255.0

    def conv(x, w, stride):
        return jax.lax.conv_general_dilated(
            x, w, (stride, stride), "VALID",
            dimension_numbers=("NCHW", "OIHW", "NCHW"),
            precision=jax.lax.Precision.HIGHEST)

    x = jax.nn.relu(conv(x, params["conv1_w"], 4))
    x = jax.nn.relu(conv(x, params["conv2_w"], 2))
    x = jax.nn.relu(conv(x, params["conv3_w"], 1))
    x = x.reshape(x.shape[0], -1)
    h = jax.nn.relu(x @ params["fc1_w"].T + params["fc1_b"])
    q = h @ params["fc2_w"].T + params["fc2_b"]
    return q, h


if __name__ == "__main__":
    key = jax.random.PRNGKey(0)
    pkey, xkey = jax.random.split(key)

    n_actions = 6
    batch = 2
    params = init_params(pkey, n_actions)
    kparams = prepare_params(params)

    # Atari-style frame stack (B, 4, 84, 84); 84x84 is implied by fc1's
    # 64*7*7 input size.
    x = jax.random.randint(xkey, (batch, 4, 84, 84), 0, 256,
                           dtype=jnp.int32).astype(jnp.uint8)

    fwd = jax.jit(dqn_forward, static_argnames=("last_layer",))
    q, h = fwd(kparams, x, last_layer=True)
    q = jax.block_until_ready(q)
    h = jax.block_until_ready(h)
    assert q.shape == (batch, n_actions)
    assert h.shape == (batch, 512)

    # bf16 weights/activations in the kernels vs a full-f32 reference:
    # expected deviation is well under 1%, so 2e-2 tolerances are comfortable.
    q_want, h_want = jax.jit(dqn_reference)(params, x)
    q_want = jax.block_until_ready(q_want)
    np.testing.assert_allclose(np.asarray(q), np.asarray(q_want),
                               rtol=2e-2, atol=2e-2)
    np.testing.assert_allclose(np.asarray(h), np.asarray(h_want),
                               rtol=2e-2, atol=2e-2)
    print("KERNEL_OK")
</pallas_src>

<mosaic_0001>
module attributes {stable_mosaic.version = 11 : i64} {
  func.func @_conv_gemm_kernel(%arg0: i32, %arg1: memref<32x256xbf16, #tpu.memory_space<vmem>>, %arg2: memref<256x512xbf16, #tpu.memory_space<vmem>>, %arg3: memref<32x512xbf16, #tpu.memory_space<vmem>>) attributes {dimension_semantics = [#tpu.dimension_semantics<parallel>], iteration_bounds = array<i64: 2>, scalar_prefetch = 0 : i64, scratch_operands = 0 : i64, tpu.core_type = #tpu.core_type<tc>, window_params = [{pipeline_mode = #tpu.pipeline_mode<synchronous>, transform_indices = @transform_0, window_bounds = array<i64: 32, 256>}, {transform_indices = @transform_1, window_bounds = array<i64: 256, 512>}, {transform_indices = @transform_2, window_bounds = array<i64: 32, 512>}]} {
    %c0 = arith.constant 0 : index
    %c0_0 = arith.constant 0 : index
    %0 = vector.load %arg1[%c0, %c0_0] : memref<32x256xbf16, #tpu.memory_space<vmem>>, vector<32x256xbf16>
    %c0_1 = arith.constant 0 : index
    %c0_2 = arith.constant 0 : index
    %1 = vector.load %arg2[%c0_1, %c0_2] : memref<256x512xbf16, #tpu.memory_space<vmem>>, vector<256x512xbf16>
    %cst = arith.constant dense<0.000000e+00> : vector<32x512xf32>
    %2 = tpu.matmul %0, %1, %cst {dimension_numbers = #tpu.dot_dimension_numbers<[1], [0], [0], [1], [0, 0, 1, 1], [], []>} : vector<32x256xbf16>, vector<256x512xbf16>, vector<32x512xf32> -> vector<32x512xf32>
    %cst_3 = arith.constant 0.00392156886 : f32
    %3 = vector.broadcast %cst_3 : f32 to vector<32x512xf32>
    %4 = arith.mulf %2, %3 : vector<32x512xf32>
    %cst_4 = arith.constant 0.000000e+00 : f32
    %5 = vector.broadcast %cst_4 : f32 to vector<32x512xf32>
    %6 = arith.maximumf %4, %5 : vector<32x512xf32>
    %7 = arith.truncf %6 : vector<32x512xf32> to vector<32x512xbf16>
    %c0_5 = arith.constant 0 : index
    %c0_6 = arith.constant 0 : index
    %8 = vector.load %arg3[%c0_5, %c0_6] : memref<32x512xbf16, #tpu.memory_space<vmem>>, vector<32x512xbf16>
    tpu.vector_store %arg3[%c0_5, %c0_6], %7 {strides = array<i32>} : memref<32x512xbf16, #tpu.memory_space<vmem>>, vector<32x512xbf16>,
    return
  }
  func.func @transform_0(%arg0: i32) -> (i32, i32) {
    %c0_i32 = arith.constant 0 : i32
    %c0_i32_0 = arith.constant 0 : i32
    %c0_i32_1 = arith.constant 0 : i32
    return %c0_i32, %c0_i32_0 : i32, i32
  }
  func.func @transform_1(%arg0: i32) -> (i32, i32) {
    %c0_i32 = arith.constant 0 : i32
    %c0_i32_0 = arith.constant 0 : i32
    return %c0_i32, %arg0 : i32, i32
  }
  func.func @transform_2(%arg0: i32) -> (i32, i32) {
    %c0_i32 = arith.constant 0 : i32
    %c0_i32_0 = arith.constant 0 : i32
    return %c0_i32, %arg0 : i32, i32
  }
}

module attributes {stable_mosaic.version = 11 : i64} {
  func.func @_conv_gemm_kernel(%arg0: i32, %arg1: memref<64x512xbf16, #tpu.memory_space<vmem>>, %arg2: memref<512x162xbf16, #tpu.memory_space<vmem>>, %arg3: memref<64x162xbf16, #tpu.memory_space<vmem>>) attributes {dimension_semantics = [#tpu.dimension_semantics<parallel>], iteration_bounds = array<i64: 1>, scalar_prefetch = 0 : i64, scratch_operands = 0 : i64, tpu.core_type = #tpu.core_type<tc>, window_params = [{pipeline_mode = #tpu.pipeline_mode<synchronous>, transform_indices = @transform_0, window_bounds = array<i64: 64, 512>}, {transform_indices = @transform_1, window_bounds = array<i64: 512, 162>}, {transform_indices = @transform_2, window_bounds = array<i64: 64, 162>}]} {
    %c0 = arith.constant 0 : index
    %c0_0 = arith.constant 0 : index
    %0 = vector.load %arg1[%c0, %c0_0] : memref<64x512xbf16, #tpu.memory_space<vmem>>, vector<64x512xbf16>
    %c0_1 = arith.constant 0 : index
    %c0_2 = arith.constant 0 : index
    %1 = vector.load %arg2[%c0_1, %c0_2] : memref<512x162xbf16, #tpu.memory_space<vmem>>, vector<512x162xbf16>
    %cst = arith.constant dense<0.000000e+00> : vector<64x162xf32>
    %2 = tpu.matmul %0, %1, %cst {dimension_numbers = #tpu.dot_dimension_numbers<[1], [0], [0], [1], [0, 0, 1, 1], [], []>} : vector<64x512xbf16>, vector<512x162xbf16>, vector<64x162xf32> -> vector<64x162xf32>
    %cst_3 = arith.constant 0.000000e+00 : f32
    %3 = vector.broadcast %cst_3 : f32 to vector<64x162xf32>
    %4 = arith.maximumf %2, %3 : vector<64x162xf32>
    %5 = arith.truncf %4 : vector<64x162xf32> to vector<64x162xbf16>
    %c0_4 = arith.constant 0 : index
    %c0_5 = arith.constant 0 : index
    %6 = vector.load %arg3[%c0_4, %c0_5] : memref<64x162xbf16, #tpu.memory_space<vmem>>, vector<64x162xbf16>
    tpu.vector_store %arg3[%c0_4, %c0_5], %5 {strides = array<i32>} : memref<64x162xbf16, #tpu.memory_space<vmem>>, vector<64x162xbf16>,
    return
  }
  func.func @transform_0(%arg0: i32) -> (i32, i32) {
    %c0_i32 = arith.constant 0 : i32
    %c0_i32_0 = arith.constant 0 : i32
    %c0_i32_1 = arith.constant 0 : i32
    return %c0_i32, %c0_i32_0 : i32, i32
  }
  func.func @transform_1(%arg0: i32) -> (i32, i32) {
    %c0_i32 = arith.constant 0 : i32
    %c0_i32_0 = arith.constant 0 : i32
    return %c0_i32, %arg0 : i32, i32
  }
  func.func @transform_2(%arg0: i32) -> (i32, i32) {
    %c0_i32 = arith.constant 0 : i32
    %c0_i32_0 = arith.constant 0 : i32
    return %c0_i32, %arg0 : i32, i32
  }
}

module attributes {stable_mosaic.version = 11 : i64} {
  func.func @_conv_gemm_kernel(%arg0: i32, %arg1: memref<64x576xbf16, #tpu.memory_space<vmem>>, %arg2: memref<576x98xbf16, #tpu.memory_space<vmem>>, %arg3: memref<64x98xbf16, #tpu.memory_space<vmem>>) attributes {dimension_semantics = [#tpu.dimension_semantics<parallel>], iteration_bounds = array<i64: 1>, scalar_prefetch = 0 : i64, scratch_operands = 0 : i64, tpu.core_type = #tpu.core_type<tc>, window_params = [{pipeline_mode = #tpu.pipeline_mode<synchronous>, transform_indices = @transform_0, window_bounds = array<i64: 64, 576>}, {transform_indices = @transform_1, window_bounds = array<i64: 576, 98>}, {transform_indices = @transform_2, window_bounds = array<i64: 64, 98>}]} {
    %c0 = arith.constant 0 : index
    %c0_0 = arith.constant 0 : index
    %0 = vector.load %arg1[%c0, %c0_0] : memref<64x576xbf16, #tpu.memory_space<vmem>>, vector<64x576xbf16>
    %c0_1 = arith.constant 0 : index
    %c0_2 = arith.constant 0 : index
    %1 = vector.load %arg2[%c0_1, %c0_2] : memref<576x98xbf16, #tpu.memory_space<vmem>>, vector<576x98xbf16>
    %cst = arith.constant dense<0.000000e+00> : vector<64x98xf32>
    %2 = tpu.matmul %0, %1, %cst {dimension_numbers = #tpu.dot_dimension_numbers<[1], [0], [0], [1], [0, 0, 1, 1], [], []>} : vector<64x576xbf16>, vector<576x98xbf16>, vector<64x98xf32> -> vector<64x98xf32>
    %cst_3 = arith.constant 0.000000e+00 : f32
    %3 = vector.broadcast %cst_3 : f32 to vector<64x98xf32>
    %4 = arith.maximumf %2, %3 : vector<64x98xf32>
    %5 = arith.truncf %4 : vector<64x98xf32> to vector<64x98xbf16>
    %c0_4 = arith.constant 0 : index
    %c0_5 = arith.constant 0 : index
    %6 = vector.load %arg3[%c0_4, %c0_5] : memref<64x98xbf16, #tpu.memory_space<vmem>>, vector<64x98xbf16>
    tpu.vector_store %arg3[%c0_4, %c0_5], %5 {strides = array<i32>} : memref<64x98xbf16, #tpu.memory_space<vmem>>, vector<64x98xbf16>,
    return
  }
  func.func @transform_0(%arg0: i32) -> (i32, i32) {
    %c0_i32 = arith.constant 0 : i32
    %c0_i32_0 = arith.constant 0 : i32
    %c0_i32_1 = arith.constant 0 : i32
    return %c0_i32, %c0_i32_0 : i32, i32
  }
  func.func @transform_1(%arg0: i32) -> (i32, i32) {
    %c0_i32 = arith.constant 0 : i32
    %c0_i32_0 = arith.constant 0 : i32
    return %c0_i32, %arg0 : i32, i32
  }
  func.func @transform_2(%arg0: i32) -> (i32, i32) {
    %c0_i32 = arith.constant 0 : i32
    %c0_i32_0 = arith.constant 0 : i32
    return %c0_i32, %arg0 : i32, i32
  }
}

module attributes {stable_mosaic.version = 11 : i64} {
  func.func @_fc_fused_kernel(%arg0: i32, %arg1: memref<2x3136xbf16, #tpu.memory_space<vmem>>, %arg2: memref<3136x128xbf16, #tpu.memory_space<vmem>>, %arg3: memref<1x128xf32, #tpu.memory_space<vmem>>, %arg4: memref<512x6xf32, #tpu.memory_space<vmem>>, %arg5: memref<1x6xf32, #tpu.memory_space<vmem>>, %arg6: memref<2x6xf32, #tpu.memory_space<vmem>>, %arg7: memref<2x512xf32, #tpu.memory_space<vmem>>) attributes {dimension_semantics = [#tpu.dimension_semantics<arbitrary>], iteration_bounds = array<i64: 4>, scalar_prefetch = 0 : i64, scratch_operands = 0 : i64, tpu.core_type = #tpu.core_type<tc>, window_params = [{pipeline_mode = #tpu.pipeline_mode<synchronous>, transform_indices = @transform_0, window_bounds = array<i64: 2, 3136>}, {transform_indices = @transform_1, window_bounds = array<i64: 3136, 128>}, {transform_indices = @transform_2, window_bounds = array<i64: 1, 128>}, {pipeline_mode = #tpu.pipeline_mode<synchronous>, transform_indices = @transform_3, window_bounds = array<i64: 512, 6>}, {pipeline_mode = #tpu.pipeline_mode<synchronous>, transform_indices = @transform_4, window_bounds = array<i64: 1, 6>}, {pipeline_mode = #tpu.pipeline_mode<synchronous>, transform_indices = @transform_5, window_bounds = array<i64: 2, 6>}, {pipeline_mode = #tpu.pipeline_mode<synchronous>, transform_indices = @transform_6, window_bounds = array<i64: 2, 512>}]} {
    %c0 = arith.constant 0 : index
    %c0_0 = arith.constant 0 : index
    %0 = vector.load %arg1[%c0, %c0_0] : memref<2x3136xbf16, #tpu.memory_space<vmem>>, vector<2x3136xbf16>
    %c0_1 = arith.constant 0 : index
    %c0_2 = arith.constant 0 : index
    %1 = vector.load %arg2[%c0_1, %c0_2] : memref<3136x128xbf16, #tpu.memory_space<vmem>>, vector<3136x128xbf16>
    %cst = arith.constant dense<0.000000e+00> : vector<2x128xf32>
    %2 = tpu.matmul %0, %1, %cst {dimension_numbers = #tpu.dot_dimension_numbers<[1], [0], [0], [1], [0, 0, 1, 1], [], []>} : vector<2x3136xbf16>, vector<3136x128xbf16>, vector<2x128xf32> -> vector<2x128xf32>
    %c0_3 = arith.constant 0 : index
    %c0_4 = arith.constant 0 : index
    %3 = vector.load %arg3[%c0_3, %c0_4] : memref<1x128xf32, #tpu.memory_space<vmem>>, vector<1x128xf32>
    %4 = vector.broadcast %3 : vector<1x128xf32> to vector<2x128xf32>
    %5 = arith.addf %2, %4 : vector<2x128xf32>
    %cst_5 = arith.constant 0.000000e+00 : f32
    %6 = vector.broadcast %cst_5 : f32 to vector<2x128xf32>
    %7 = arith.maximumf %5, %6 : vector<2x128xf32>
    %c128_i32 = arith.constant 128 : i32
    %8 = arith.muli %arg0, %c128_i32 : i32
    %9 = tpu.assume_multiple %8, 128 : i32
    %c0_6 = arith.constant 0 : index
    %10 = arith.index_cast %9 : i32 to index
    %11 = vector.load %arg7[%c0_6, %10] : memref<2x512xf32, #tpu.memory_space<vmem>>, vector<2x128xf32>
    tpu.vector_store %arg7[%c0_6, %10], %7 {strides = array<i32>} : memref<2x512xf32, #tpu.memory_space<vmem>>, vector<2x128xf32>,
    %c3_i32 = arith.constant 3 : i32
    %12 = arith.cmpi eq, %arg0, %c3_i32 : i32
    %13 = arith.extui %12 : i1 to i32
    %c0_i32 = arith.constant 0 : i32
    %14 = arith.cmpi ne, %13, %c0_i32 : i32
    scf.if %14 {
      %c0_7 = arith.constant 0 : index
      %c0_8 = arith.constant 0 : index
      %15 = vector.load %arg7[%c0_7, %c0_8] : memref<2x512xf32, #tpu.memory_space<vmem>>, vector<2x512xf32>
      %c0_9 = arith.constant 0 : index
      %c0_10 = arith.constant 0 : index
      %16 = vector.load %arg4[%c0_9, %c0_10] : memref<512x6xf32, #tpu.memory_space<vmem>>, vector<512x6xf32>
      %cst_11 = arith.constant dense<0.000000e+00> : vector<2x6xf32>
      %17 = tpu.matmul %15, %16, %cst_11 {dimension_numbers = #tpu.dot_dimension_numbers<[1], [0], [0], [1], [0, 0, 1, 1], [], []>} : vector<2x512xf32>, vector<512x6xf32>, vector<2x6xf32> -> vector<2x6xf32>
      %c0_12 = arith.constant 0 : index
      %c0_13 = arith.constant 0 : index
      %18 = vector.load %arg5[%c0_12, %c0_13] : memref<1x6xf32, #tpu.memory_space<vmem>>, vector<1x6xf32>
      %19 = vector.broadcast %18 : vector<1x6xf32> to vector<2x6xf32>
      %20 = arith.addf %17, %19 : vector<2x6xf32>
      %c0_14 = arith.constant 0 : index
      %c0_15 = arith.constant 0 : index
      %21 = vector.load %arg6[%c0_14, %c0_15] : memref<2x6xf32, #tpu.memory_space<vmem>>, vector<2x6xf32>
      tpu.vector_store %arg6[%c0_14, %c0_15], %20 {strides = array<i32>} : memref<2x6xf32, #tpu.memory_space<vmem>>, vector<2x6xf32>,
    } else {
    }
    return
  }
  func.func @transform_0(%arg0: i32) -> (i32, i32) {
    %c0_i32 = arith.constant 0 : i32
    %c0_i32_0 = arith.constant 0 : i32
    %c0_i32_1 = arith.constant 0 : i32
    return %c0_i32, %c0_i32_0 : i32, i32
  }
  func.func @transform_1(%arg0: i32) -> (i32, i32) {
    %c0_i32 = arith.constant 0 : i32
    %c0_i32_0 = arith.constant 0 : i32
    return %c0_i32, %arg0 : i32, i32
  }
  func.func @transform_2(%arg0: i32) -> (i32, i32) {
    %c0_i32 = arith.constant 0 : i32
    %c0_i32_0 = arith.constant 0 : i32
    return %c0_i32, %arg0 : i32, i32
  }
  func.func @transform_3(%arg0: i32) -> (i32, i32) {
    %c0_i32 = arith.constant 0 : i32
    %c0_i32_0 = arith.constant 0 : i32
    %c0_i32_1 = arith.constant 0 : i32
    return %c0_i32, %c0_i32_0 : i32, i32
  }
  func.func @transform_4(%arg0: i32) -> (i32, i32) {
    %c0_i32 = arith.constant 0 : i32
    %c0_i32_0 = arith.constant 0 : i32
    %c0_i32_1 = arith.constant 0 : i32
    return %c0_i32, %c0_i32_0 : i32, i32
  }
  func.func @transform_5(%arg0: i32) -> (i32, i32) {
    %c0_i32 = arith.constant 0 : i32
    %c0_i32_0 = arith.constant 0 : i32
    %c0_i32_1 = arith.constant 0 : i32
    return %c0_i32, %c0_i32_0 : i32, i32
  }
  func.func @transform_6(%arg0: i32) -> (i32, i32) {
    %c0_i32 = arith.constant 0 : i32
    %c0_i32_0 = arith.constant 0 : i32
    %c0_i32_1 = arith.constant 0 : i32
    return %c0_i32, %c0_i32_0 : i32, i32
  }
}

</mosaic_0001>

<bundles_post_ra>
// kernel: dqn_forward.4
= control target key start
LH: loop header
LB: loop body
LE: loop exit
PB: predicated region body
PF: predicated region fallthrough
CT: control target
= control target key end

     0   :  { %s2909_s9 = smov 0   ;;  %s2911_s10 = smov 0   ;;  %s4407_s0 = inlined_call_operand.vmem [shape: bf16[32,256], index: 0, kind: input, shape index: {}]   ;;  %s4408_s1 = inlined_call_operand.vmem [shape: bf16[256,800], index: 1, kind: input, shape index: {}]   ;;  %s4409_s2 = inlined_call_operand.vmem [shape: bf16[32,800], index: 2, kind: output, shape index: {}]  }
   0x1   :  { %s2913_s11 = smov 0  }
   0x2 LB: > { %s2925_s12 = sadd.s32 4294967295, %s2760_s11   ;;  %s2928_s13 = sadd.s32 1, %s2760_s11   ;;  %s2760_s11 = sphi %s2913_s11, %s4447_s11   ;;  %s2756_s10 = sphi %s2911_s10, %s4446_s10   ;;  %s2752_s9 = sphi %s2909_s9, %s4445_s9  }
   0x3   : > { %s37_s14 = ssub.s32 %s2760_s11, %s2928_s13  ;;  %s40_s15 = sadd.s32 1, %s2756_s10 }
   0x4   : > { %p38_p0 = scmp.eq.s32.totalorder %s37_s14, 0  ;;  %p47_p1 = scmp.ne.s32.totalorder %s2756_s10, %s2752_s9 }
   0x5   : > { %p48_p2 = scmp.eq.s32.totalorder %s2760_s11, 0  ;;  %p77_p3 = scmp.eq.s32.totalorder %s2925_s12, 1 }
   0x6   : > { %s2938_s16 = scalar_select %p38_p0, %s2756_s10, %s40_s15  }
   0x7   : > { %p49_p4 = por %p48_p2, %p47_p1  ;;  %p2940_p5 = por %p77_p3, %p47_p1 }
   0x8   : > { %p2070_p6 = scmp.ge.s32.totalorder %s2760_s11, 2 }
   0xa   : > { %102 = sbr.rel (%p2070_p6) target bundleno = 259 (0x103), region = 20 }
  0x11   : > { %105 = sbr.rel (!%p49_p4) target bundleno = 259 (0x103), region = 24  ;;  %s107_s18 = sand.u32 (%p49_p4), 1, %s2756_s10  }
  0x12   : > { %s2072_s19 = sshll.u32 (%p49_p4), %s2760_s11, 2  ;;  %s2071_s20 = sshll.u32 (%p49_p4), %s107_s18, 9 }
  0x13   : > { %s111_s21 = ssub.s32 (%p49_p4), 7, %s2072_s19  ;;  %s2206_s22 = sshll.u32 (%p49_p4), %s2760_s11, 4 }
  0x14   : > { %p112_p7 = scmp.lt.s32.totalorder (%p49_p4), %s111_s21, 4  ;;  %s2951_s25 = scalar_lea.vmem (%p49_p4), %s4408_s1, %s2206_s22  }
  0x15   : > { %s2955_s28 = scalar_lea.vmem (%p49_p4), [#allocation2], %s2071_s20  }
  0x18   : > { %s4449_s21 = smov (!%p112_p7, %s111_s21), 4 }
  0x19   : > { %s2073_s26 = sshll.u32 %s4449_s21, 11  ;;  %s2953_s27 = sshll.u32 %s4449_s21, 2 }
  0x1a   : > { %p2077_p8 = scmp.eq.s32.totalorder %s2073_s26, 0 }
  0x1b   : > { %p122_p9 = scmp.lt.u32.totalorder (!%p2077_p8), %s2953_s27, 8 }
  0x1c   : > { %121 = sbr.rel (%p2077_p8) target bundleno = 259 (0x103), region = 28 }
  0x23   : > { %125 = sbr.rel (%p122_p9) target bundleno = 224 (0xe0), region = 32  ;;  %s2959_s29 = sand.u32 (!%p122_p9), 7, %s2953_s27  }
  0x24   : > { %p203_p10 = scmp.eq.s32.totalorder (!%p122_p9), %s2959_s29, 0  ;;  %p2078_p11 = scmp.ne.s32.totalorder (!%p122_p9), %s2959_s29, 0 }
  0x2a   : > { %206 = sbr.rel (%p2078_p11) target bundleno = 116 (0x74), region = 47  ;;  %s207_s30 = sshrl.u32 (!%p2078_p11), %s2953_s27, 3 }
  0x2b   : > { %s2966_s3 = sshrl.u32 (!%p2078_p11), %s207_s30, 1 }
  0x2c   : > { %p2079_p12 = scmp.le.s32.totalorder (!%p2078_p11), %s2966_s3, 0 }
  0x31   : > { %1940 = sbr.rel (%p2079_p12) target bundleno = 89 (0x59), region = 225  ;;  %s4411_s4 = smov (!%p2079_p12), %s2955_s28 }
  0x32   : > { %s4412_s5 = smov (!%p2079_p12), %s2951_s25  ;;  %s2975_s6 = smov (!%p2079_p12), 0  }
  0x33   : > { %s2977_s7 = smov (!%p2079_p12), 0  }
  0x38 LB: >> { %v220_v0 = vld [vmem:[%s2768_s5] sm:$0xff]  ;;  %v222_v1 = vld [vmem:[%s2768_s5 + $0x8] sm:$0xff]  ;;  %s348_s8 = sadd.s32 1, %s2772_s6  ;;  %v228_v4 = vld [vmem:[%s2768_s5 + $0x38] sm:$0xff]  ;;  %s214_s7 = sadd.s32 1, %s2776_s7   ;;  %s2776_s7 = sphi %s2977_s7, %s214_s7   ;;  %s2772_s6 = sphi %s2975_s6, %s4415_s6   ;;  %s2768_s5 = sphi %s4412_s5, %s4414_s5   ;;  %s2764_s4 = sphi %s4411_s4, %s4413_s4  }
  0x39   : >> { %v224_v2 = vld [vmem:[%s2768_s5 + $0x1c] sm:$0xff]  ;;  %221 = vst [vmem:[%s2764_s4] sm:$0xff] %v220_v0  ;;  %223 = vst [vmem:[%s2764_s4 + $0x8] sm:$0xff] %v222_v1  ;;  %v226_v3 = vld [vmem:[%s2768_s5 + $0x24] sm:$0xff]  ;;  %p349_p13 = scmp.ge.s32.totalorder %s348_s8, %s2966_s3  ;;  %p213_p0 = scmp.ge.s32.totalorder %s214_s7, %s2966_s3 }
  0x3a   : >> { %225 = vst [vmem:[%s2764_s4 + $0x10] sm:$0xff] %v224_v2  ;;  %v230_v5 = vld [vmem:[%s2768_s5 + $0x40] sm:$0xff]  ;;  %227 = vst [vmem:[%s2764_s4 + $0x18] sm:$0xff] %v226_v3  ;;  %v232_v6 = vld [vmem:[%s2768_s5 + $0x54] sm:$0xff] }
  0x3b   : >> { %229 = vst [vmem:[%s2764_s4 + $0x20] sm:$0xff] %v228_v4  ;;  %231 = vst [vmem:[%s2764_s4 + $0x28] sm:$0xff] %v230_v5  ;;  %v234_v7 = vld [vmem:[%s2768_s5 + $0x5c] sm:$0xff]  ;;  %v236_v8 = vld [vmem:[%s2768_s5 + $0x70] sm:$0xff]  ;;  %s4451_s8 = smov (%p349_p13, %s348_s8), 0 }
  0x3c   : >> { %233 = vst [vmem:[%s2764_s4 + $0x30] sm:$0xff] %v232_v6  ;;  %235 = vst [vmem:[%s2764_s4 + $0x38] sm:$0xff] %v234_v7  ;;  %v238_v9 = vld [vmem:[%s2768_s5 + $0x78] sm:$0xff]  ;;  %v240_v10 = vld [vmem:[%s2768_s5 + $0x8c] sm:$0xff]  ;;  %s2080_s14 = sshll.u32 %s4451_s8, 4  ;;  %s4415_s6 = smov %s4451_s8 }
  0x3d   : >> { %237 = vst [vmem:[%s2764_s4 + $0x40] sm:$0xff] %v236_v8  ;;  %v242_v11 = vld [vmem:[%s2768_s5 + $0x94] sm:$0xff]  ;;  %239 = vst [vmem:[%s2764_s4 + $0x48] sm:$0xff] %v238_v9  ;;  %v244_v12 = vld [vmem:[%s2768_s5 + $0xa8] sm:$0xff]  ;;  %s3033_s15 = scalar_lea.vmem %s2951_s25, %s2080_s14   ;;  %s3036_s18 = scalar_lea.vmem %s2955_s28, %s2080_s14 [#allocation2]  }
  0x3e   : >> { %241 = vst [vmem:[%s2764_s4 + $0x50] sm:$0xff] %v240_v10  ;;  %243 = vst [vmem:[%s2764_s4 + $0x58] sm:$0xff] %v242_v11  ;;  %v246_v13 = vld [vmem:[%s2768_s5 + $0xb0] sm:$0xff]  ;;  %v248_v14 = vld [vmem:[%s2768_s5 + $0xc4] sm:$0xff] }
  0x3f   : >> { %245 = vst [vmem:[%s2764_s4 + $0x60] sm:$0xff] %v244_v12  ;;  %247 = vst [vmem:[%s2764_s4 + $0x68] sm:$0xff] %v246_v13  ;;  %v250_v15 = vld [vmem:[%s2768_s5 + $0xcc] sm:$0xff]  ;;  %v252_v16 = vld [vmem:[%s2768_s5 + $0xe0] sm:$0xff] }
  0x40   : >> { %249 = vst [vmem:[%s2764_s4 + $0x70] sm:$0xff] %v248_v14  ;;  %v254_v17 = vld [vmem:[%s2768_s5 + $0xe8] sm:$0xff]  ;;  %251 = vst [vmem:[%s2764_s4 + $0x78] sm:$0xff] %v250_v15  ;;  %v256_v18 = vld [vmem:[%s2768_s5 + $0xfc] sm:$0xff] }
  0x41   : >> { %253 = vst [vmem:[%s2764_s4 + $0x80] sm:$0xff] %v252_v16  ;;  %255 = vst [vmem:[%s2764_s4 + $0x88] sm:$0xff] %v254_v17  ;;  %v258_v19 = vld [vmem:[%s2768_s5 + $0x104] sm:$0xff]  ;;  %v260_v20 = vld [vmem:[%s2768_s5 + $0x118] sm:$0xff] }
  0x42   : >> { %257 = vst [vmem:[%s2764_s4 + $0x90] sm:$0xff] %v256_v18  ;;  %259 = vst [vmem:[%s2764_s4 + $0x98] sm:$0xff] %v258_v19  ;;  %v262_v21 = vld [vmem:[%s2768_s5 + $0x120] sm:$0xff]  ;;  %v264_v22 = vld [vmem:[%s2768_s5 + $0x134] sm:$0xff] }
  0x43   : >> { %261 = vst [vmem:[%s2764_s4 + $0xa0] sm:$0xff] %v260_v20  ;;  %v266_v23 = vld [vmem:[%s2768_s5 + $0x13c] sm:$0xff]  ;;  %263 = vst [vmem:[%s2764_s4 + $0xa8] sm:$0xff] %v262_v21  ;;  %v268_v24 = vld [vmem:[%s2768_s5 + $0x150] sm:$0xff] }
  0x44   : >> { %265 = vst [vmem:[%s2764_s4 + $0xb0] sm:$0xff] %v264_v22  ;;  %267 = vst [vmem:[%s2764_s4 + $0xb8] sm:$0xff] %v266_v23  ;;  %v270_v25 = vld [vmem:[%s2768_s5 + $0x158] sm:$0xff]  ;;  %v272_v26 = vld [vmem:[%s2768_s5 + $0x16c] sm:$0xff] }
  0x45   : >> { %269 = vst [vmem:[%s2764_s4 + $0xc0] sm:$0xff] %v268_v24  ;;  %271 = vst [vmem:[%s2764_s4 + $0xc8] sm:$0xff] %v270_v25  ;;  %v274_v27 = vld [vmem:[%s2768_s5 + $0x174] sm:$0xff]  ;;  %v276_v28 = vld [vmem:[%s2768_s5 + $0x188] sm:$0xff] }
  0x46   : >> { %273 = vst [vmem:[%s2764_s4 + $0xd0] sm:$0xff] %v272_v26  ;;  %v278_v29 = vld [vmem:[%s2768_s5 + $0x190] sm:$0xff]  ;;  %275 = vst [vmem:[%s2764_s4 + $0xd8] sm:$0xff] %v274_v27  ;;  %v280_v30 = vld [vmem:[%s2768_s5 + $0x1a4] sm:$0xff] }
  0x47   : >> { %277 = vst [vmem:[%s2764_s4 + $0xe0] sm:$0xff] %v276_v28  ;;  %279 = vst [vmem:[%s2764_s4 + $0xe8] sm:$0xff] %v278_v29  ;;  %v282_v31 = vld [vmem:[%s2768_s5 + $0x1ac] sm:$0xff]  ;;  %v284_v32 = vld [vmem:[%s2768_s5 + $0x1c0] sm:$0xff] }
  0x48   : >> { %281 = vst [vmem:[%s2764_s4 + $0xf0] sm:$0xff] %v280_v30  ;;  %283 = vst [vmem:[%s2764_s4 + $0xf8] sm:$0xff] %v282_v31  ;;  %v286_v33 = vld [vmem:[%s2768_s5 + $0x1c8] sm:$0xff]  ;;  %v288_v34 = vld [vmem:[%s2768_s5 + $0x1dc] sm:$0xff] }
  0x49   : >> { %285 = vst [vmem:[%s2764_s4 + $0x100] sm:$0xff] %v284_v32  ;;  %v290_v35 = vld [vmem:[%s2768_s5 + $0x1e4] sm:$0xff]  ;;  %287 = vst [vmem:[%s2764_s4 + $0x108] sm:$0xff] %v286_v33  ;;  %v292_v36 = vld [vmem:[%s2768_s5 + $0x1f8] sm:$0xff] }
  0x4a   : >> { %289 = vst [vmem:[%s2764_s4 + $0x110] sm:$0xff] %v288_v34  ;;  %291 = vst [vmem:[%s2764_s4 + $0x118] sm:$0xff] %v290_v35  ;;  %v294_v37 = vld [vmem:[%s2768_s5 + $0x200] sm:$0xff]  ;;  %v296_v38 = vld [vmem:[%s2768_s5 + $0x214] sm:$0xff] }
  0x4b   : >> { %293 = vst [vmem:[%s2764_s4 + $0x120] sm:$0xff] %v292_v36  ;;  %295 = vst [vmem:[%s2764_s4 + $0x128] sm:$0xff] %v294_v37  ;;  %v298_v39 = vld [vmem:[%s2768_s5 + $0x21c] sm:$0xff]  ;;  %v300_v40 = vld [vmem:[%s2768_s5 + $0x230] sm:$0xff] }
  0x4c   : >> { %297 = vst [vmem:[%s2764_s4 + $0x130] sm:$0xff] %v296_v38  ;;  %v302_v41 = vld [vmem:[%s2768_s5 + $0x238] sm:$0xff]  ;;  %299 = vst [vmem:[%s2764_s4 + $0x138] sm:$0xff] %v298_v39  ;;  %v304_v42 = vld [vmem:[%s2768_s5 + $0x24c] sm:$0xff] }
  0x4d   : >> { %301 = vst [vmem:[%s2764_s4 + $0x140] sm:$0xff] %v300_v40  ;;  %303 = vst [vmem:[%s2764_s4 + $0x148] sm:$0xff] %v302_v41  ;;  %v306_v43 = vld [vmem:[%s2768_s5 + $0x254] sm:$0xff]  ;;  %v308_v44 = vld [vmem:[%s2768_s5 + $0x268] sm:$0xff] }
  0x4e   : >> { %305 = vst [vmem:[%s2764_s4 + $0x150] sm:$0xff] %v304_v42  ;;  %307 = vst [vmem:[%s2764_s4 + $0x158] sm:$0xff] %v306_v43  ;;  %v310_v45 = vld [vmem:[%s2768_s5 + $0x270] sm:$0xff]  ;;  %v312_v46 = vld [vmem:[%s2768_s5 + $0x284] sm:$0xff] }
  0x4f   : >> { %309 = vst [vmem:[%s2764_s4 + $0x160] sm:$0xff] %v308_v44  ;;  %v314_v47 = vld [vmem:[%s2768_s5 + $0x28c] sm:$0xff]  ;;  %311 = vst [vmem:[%s2764_s4 + $0x168] sm:$0xff] %v310_v45  ;;  %v316_v48 = vld [vmem:[%s2768_s5 + $0x2a0] sm:$0xff] }
  0x50   : >> { %313 = vst [vmem:[%s2764_s4 + $0x170] sm:$0xff] %v312_v46  ;;  %315 = vst [vmem:[%s2764_s4 + $0x178] sm:$0xff] %v314_v47  ;;  %v318_v49 = vld [vmem:[%s2768_s5 + $0x2a8] sm:$0xff]  ;;  %v320_v50 = vld [vmem:[%s2768_s5 + $0x2bc] sm:$0xff] }
  0x51   : >> { %317 = vst [vmem:[%s2764_s4 + $0x180] sm:$0xff] %v316_v48  ;;  %319 = vst [vmem:[%s2764_s4 + $0x188] sm:$0xff] %v318_v49  ;;  %v322_v51 = vld [vmem:[%s2768_s5 + $0x2c4] sm:$0xff]  ;;  %v324_v52 = vld [vmem:[%s2768_s5 + $0x2d8] sm:$0xff] }
  0x52   : >> { %321 = vst [vmem:[%s2764_s4 + $0x190] sm:$0xff] %v320_v50  ;;  %v326_v53 = vld [vmem:[%s2768_s5 + $0x2e0] sm:$0xff]  ;;  %323 = vst [vmem:[%s2764_s4 + $0x198] sm:$0xff] %v322_v51  ;;  %v328_v54 = vld [vmem:[%s2768_s5 + $0x2f4] sm:$0xff]  ;;  %216 = sbr.rel (!%p213_p0) target bundleno = 56 (0x38), region = 231 }
  0x53   : >> { %325 = vst [vmem:[%s2764_s4 + $0x1a0] sm:$0xff] %v324_v52  ;;  %327 = vst [vmem:[%s2764_s4 + $0x1a8] sm:$0xff] %v326_v53  ;;  %v330_v55 = vld [vmem:[%s2768_s5 + $0x2fc] sm:$0xff]  ;;  %v332_v56 = vld [vmem:[%s2768_s5 + $0x310] sm:$0xff] }
  0x54   : >> { %329 = vst [vmem:[%s2764_s4 + $0x1b0] sm:$0xff] %v328_v54  ;;  %331 = vst [vmem:[%s2764_s4 + $0x1b8] sm:$0xff] %v330_v55  ;;  %v334_v57 = vld [vmem:[%s2768_s5 + $0x318] sm:$0xff]  ;;  %v336_v58 = vld [vmem:[%s2768_s5 + $0x32c] sm:$0xff] }
  0x55   : >> { %333 = vst [vmem:[%s2764_s4 + $0x1c0] sm:$0xff] %v332_v56  ;;  %v338_v59 = vld [vmem:[%s2768_s5 + $0x334] sm:$0xff]  ;;  %335 = vst [vmem:[%s2764_s4 + $0x1c8] sm:$0xff] %v334_v57  ;;  %v340_v60 = vld [vmem:[%s2768_s5 + $0x348] sm:$0xff] }
  0x56   : >> { %337 = vst [vmem:[%s2764_s4 + $0x1d0] sm:$0xff] %v336_v58  ;;  %339 = vst [vmem:[%s2764_s4 + $0x1d8] sm:$0xff] %v338_v59  ;;  %v342_v61 = vld [vmem:[%s2768_s5 + $0x350] sm:$0xff]  ;;  %v344_v62 = vld [vmem:[%s2768_s5 + $0x364] sm:$0xff] }
  0x57   : >> { %341 = vst [vmem:[%s2764_s4 + $0x1e0] sm:$0xff] %v340_v60  ;;  %343 = vst [vmem:[%s2764_s4 + $0x1e8] sm:$0xff] %v342_v61  ;;  %v346_v63 = vld [vmem:[%s2768_s5 + $0x36c] sm:$0xff]  ;;  %s4414_s5 = smov %s3033_s15 }
  0x58   : >> { %345 = vst [vmem:[%s2764_s4 + $0x1f0] sm:$0xff] %v344_v62  ;;  %347 = vst [vmem:[%s2764_s4 + $0x1f8] sm:$0xff] %v346_v63  ;;  %s4413_s4 = smov %s3036_s18 }
  0x59 PF: > { %s3142_s19 = sand.u32 1, %s207_s30   ;;  %s2207_s20 = sshll.u32 %s2966_s3, 8 }
  0x5a   : > { %s359_s21 = sshra.s32 %s2207_s20, 4  ;;  %p2085_p1 = scmp.le.s32.totalorder %s3142_s19, 0 }
  0x5b   : > { %s3146_s22 = scalar_lea.vmem %s2951_s25, %s359_s21   ;;  %s3149_s23 = scalar_lea.vmem %s2955_s28, %s359_s21 [#allocation2]  }
  0x5c   : > { %1954 = sbr.rel (%p2085_p1) target bundleno = 116 (0x74), region = 236  ;;  %s4416_s24 = smov (!%p2085_p1), %s3149_s23 }
  0x5d   : > { %s4417_s26 = smov (!%p2085_p1), %s3146_s22  ;;  %s3158_s4 = smov (!%p2085_p1), 0  }
  0x5e   : > { %s3160_s5 = smov (!%p2085_p1), 0  }
  0x63 LB: >> { %v375_v0 = vld [vmem:[%s2784_s26] sm:$0xff]  ;;  %v379_v2 = vld [vmem:[%s2784_s26 + $0x38] sm:$0xff]  ;;  %s439_s30 = sadd.s32 1, %s2788_s4  ;;  %v383_v4 = vld [vmem:[%s2784_s26 + $0x70] sm:$0xff]  ;;  %s369_s5 = sadd.s32 1, %s2792_s5   ;;  %s2792_s5 = sphi %s3160_s5, %s369_s5   ;;  %s2788_s4 = sphi %s3158_s4, %s4420_s4   ;;  %s2784_s26 = sphi %s4417_s26, %s4419_s26   ;;  %s2780_s24 = sphi %s4416_s24, %s4418_s24  }
  0x64   : >> { %v377_v1 = vld [vmem:[%s2784_s26 + $0x1c] sm:$0xff]  ;;  %376 = vst [vmem:[%s2780_s24] sm:$0xff] %v375_v0  ;;  %380 = vst [vmem:[%s2780_s24 + $0x20] sm:$0xff] %v379_v2  ;;  %v381_v3 = vld [vmem:[%s2784_s26 + $0x54] sm:$0xff]  ;;  %p440_p2 = scmp.ge.s32.totalorder %s439_s30, %s3142_s19  ;;  %p368_p3 = scmp.ge.s32.totalorder %s369_s5, %s3142_s19 }
  0x65   : >> { %378 = vst [vmem:[%s2780_s24 + $0x10] sm:$0xff] %v377_v1  ;;  %v385_v5 = vld [vmem:[%s2784_s26 + $0x8c] sm:$0xff]  ;;  %382 = vst [vmem:[%s2780_s24 + $0x30] sm:$0xff] %v381_v3  ;;  %v389_v7 = vld [vmem:[%s2784_s26 + $0xc4] sm:$0xff] }
  0x66   : >> { %384 = vst [vmem:[%s2780_s24 + $0x40] sm:$0xff] %v383_v4  ;;  %386 = vst [vmem:[%s2780_s24 + $0x50] sm:$0xff] %v385_v5  ;;  %v387_v6 = vld [vmem:[%s2784_s26 + $0xa8] sm:$0xff]  ;;  %v391_v8 = vld [vmem:[%s2784_s26 + $0xe0] sm:$0xff]  ;;  %s4453_s30 = smov (%p440_p2, %s439_s30), 0 }
  0x67   : >> { %388 = vst [vmem:[%s2780_s24 + $0x60] sm:$0xff] %v387_v6  ;;  %390 = vst [vmem:[%s2780_s24 + $0x70] sm:$0xff] %v389_v7  ;;  %v393_v9 = vld [vmem:[%s2784_s26 + $0xfc] sm:$0xff]  ;;  %v397_v11 = vld [vmem:[%s2784_s26 + $0x134] sm:$0xff]  ;;  %s2086_s3 = sshll.u32 %s4453_s30, 3  ;;  %s4420_s4 = smov %s4453_s30 }
  0x68   : >> { %392 = vst [vmem:[%s2780_s24 + $0x80] sm:$0xff] %v391_v8  ;;  %v395_v10 = vld [vmem:[%s2784_s26 + $0x118] sm:$0xff]  ;;  %394 = vst [vmem:[%s2780_s24 + $0x90] sm:$0xff] %v393_v9  ;;  %v399_v12 = vld [vmem:[%s2784_s26 + $0x150] sm:$0xff]  ;;  %s3216_s6 = scalar_lea.vmem %s3146_s22, %s2086_s3   ;;  %s445_s7 = scalar_lea.vmem %s3149_s23, %s2086_s3 [#allocation2]  }
  0x69   : >> { %396 = vst [vmem:[%s2780_s24 + $0xa0] sm:$0xff] %v395_v10  ;;  %398 = vst [vmem:[%s2780_s24 + $0xb0] sm:$0xff] %v397_v11  ;;  %v401_v13 = vld [vmem:[%s2784_s26 + $0x16c] sm:$0xff]  ;;  %v405_v15 = vld [vmem:[%s2784_s26 + $0x1a4] sm:$0xff] }
  0x6a   : >> { %v403_v14 = vld [vmem:[%s2784_s26 + $0x188] sm:$0xff]  ;;  %400 = vst [vmem:[%s2780_s24 + $0xc0] sm:$0xff] %v399_v12  ;;  %402 = vst [vmem:[%s2780_s24 + $0xd0] sm:$0xff] %v401_v13  ;;  %v407_v16 = vld [vmem:[%s2784_s26 + $0x1c0] sm:$0xff] }
  0x6b   : >> { %404 = vst [vmem:[%s2780_s24 + $0xe0] sm:$0xff] %v403_v14  ;;  %v409_v17 = vld [vmem:[%s2784_s26 + $0x1dc] sm:$0xff]  ;;  %406 = vst [vmem:[%s2780_s24 + $0xf0] sm:$0xff] %v405_v15  ;;  %v413_v19 = vld [vmem:[%s2784_s26 + $0x214] sm:$0xff] }
  0x6c   : >> { %408 = vst [vmem:[%s2780_s24 + $0x100] sm:$0xff] %v407_v16  ;;  %410 = vst [vmem:[%s2780_s24 + $0x110] sm:$0xff] %v409_v17  ;;  %v411_v18 = vld [vmem:[%s2784_s26 + $0x1f8] sm:$0xff]  ;;  %v415_v20 = vld [vmem:[%s2784_s26 + $0x230] sm:$0xff] }
  0x6d   : >> { %412 = vst [vmem:[%s2780_s24 + $0x120] sm:$0xff] %v411_v18  ;;  %414 = vst [vmem:[%s2780_s24 + $0x130] sm:$0xff] %v413_v19  ;;  %v417_v21 = vld [vmem:[%s2784_s26 + $0x24c] sm:$0xff]  ;;  %v421_v23 = vld [vmem:[%s2784_s26 + $0x284] sm:$0xff]  ;;  %371 = sbr.rel (!%p368_p3) target bundleno = 99 (0x63), region = 242 }
  0x6e   : >> { %416 = vst [vmem:[%s2780_s24 + $0x140] sm:$0xff] %v415_v20  ;;  %v419_v22 = vld [vmem:[%s2784_s26 + $0x268] sm:$0xff]  ;;  %418 = vst [vmem:[%s2780_s24 + $0x150] sm:$0xff] %v417_v21  ;;  %v423_v24 = vld [vmem:[%s2784_s26 + $0x2a0] sm:$0xff] }
  0x6f   : >> { %420 = vst [vmem:[%s2780_s24 + $0x160] sm:$0xff] %v419_v22  ;;  %422 = vst [vmem:[%s2780_s24 + $0x170] sm:$0xff] %v421_v23  ;;  %v425_v25 = vld [vmem:[%s2784_s26 + $0x2bc] sm:$0xff]  ;;  %v429_v27 = vld [vmem:[%s2784_s26 + $0x2f4] sm:$0xff] }
  0x70   : >> { %v427_v26 = vld [vmem:[%s2784_s26 + $0x2d8] sm:$0xff]  ;;  %424 = vst [vmem:[%s2780_s24 + $0x180] sm:$0xff] %v423_v24  ;;  %426 = vst [vmem:[%s2780_s24 + $0x190] sm:$0xff] %v425_v25  ;;  %v431_v28 = vld [vmem:[%s2784_s26 + $0x310] sm:$0xff] }
  0x71   : >> { %428 = vst [vmem:[%s2780_s24 + $0x1a0] sm:$0xff] %v427_v26  ;;  %v433_v29 = vld [vmem:[%s2784_s26 + $0x32c] sm:$0xff]  ;;  %430 = vst [vmem:[%s2780_s24 + $0x1b0] sm:$0xff] %v429_v27  ;;  %v437_v31 = vld [vmem:[%s2784_s26 + $0x364] sm:$0xff] }
  0x72   : >> { %432 = vst [vmem:[%s2780_s24 + $0x1c0] sm:$0xff] %v431_v28  ;;  %434 = vst [vmem:[%s2780_s24 + $0x1d0] sm:$0xff] %v433_v29  ;;  %v435_v30 = vld [vmem:[%s2784_s26 + $0x348] sm:$0xff]  ;;  %s4419_s26 = smov %s3216_s6 }
  0x73   : >> { %436 = vst [vmem:[%s2780_s24 + $0x1e0] sm:$0xff] %v435_v30  ;;  %438 = vst [vmem:[%s2780_s24 + $0x1f0] sm:$0xff] %v437_v31  ;;  %s4418_s24 = smov %s445_s7 }
  0x74 PF: > { %448 = sbr.rel (%p203_p10) target bundleno = 224 (0xe0), region = 65  ;;  %s450_s8 = ssub.s32 (!%p203_p10), %s2953_s27, %s2959_s29 }
  0x75   : > { %s454_s14 = sshrl.u32 (!%p203_p10), %s2953_s27, 3  ;;  %s3262_s15 = scalar_lea.vmem (!%p203_p10), %s2951_s25, %s450_s8 }
  0x76   : > { %s3265_s18 = scalar_lea.vmem (!%p203_p10), %s2955_s28, %s450_s8 [#allocation2]  ;;  %s3269_s20 = sshrl.u32 (!%p203_p10), %s454_s14, 1 }
  0x77   : > { %p2088_p4 = scmp.le.s32.totalorder (!%p203_p10), %s3269_s20, 0 }
  0x7b   : > { %1968 = sbr.rel (%p2088_p4) target bundleno = 163 (0xa3), region = 247  ;;  %s4421_s19 = smov (!%p2088_p4), %s2955_s28 }
  0x7c   : > { %s4422_s21 = smov (!%p2088_p4), %s2951_s25  ;;  %s3278_s22 = smov (!%p2088_p4), 0  }
  0x7d   : > { %s3280_s23 = smov (!%p2088_p4), 0  }
  0x82 LB: >> { %v467_v32 = vld [vmem:[%s2800_s21] sm:$0xff]  ;;  %v469_v33 = vld [vmem:[%s2800_s21 + $0x8] sm:$0xff]  ;;  %s595_s24 = sadd.s32 1, %s2804_s22  ;;  %v475_v36 = vld [vmem:[%s2800_s21 + $0x38] sm:$0xff]  ;;  %s461_s23 = sadd.s32 1, %s2808_s23   ;;  %s2808_s23 = sphi %s3280_s23, %s461_s23   ;;  %s2804_s22 = sphi %s3278_s22, %s4425_s22   ;;  %s2800_s21 = sphi %s4422_s21, %s4424_s21   ;;  %s2796_s19 = sphi %s4421_s19, %s4423_s19  }
  0x83   : >> { %v471_v34 = vld [vmem:[%s2800_s21 + $0x1c] sm:$0xff]  ;;  %468 = vst [vmem:[%s2796_s19] sm:$0xff] %v467_v32  ;;  %470 = vst [vmem:[%s2796_s19 + $0x8] sm:$0xff] %v469_v33  ;;  %v473_v35 = vld [vmem:[%s2800_s21 + $0x24] sm:$0xff]  ;;  %p596_p6 = scmp.ge.s32.totalorder %s595_s24, %s3269_s20  ;;  %p460_p7 = scmp.ge.s32.totalorder %s461_s23, %s3269_s20 }
  0x84   : >> { %472 = vst [vmem:[%s2796_s19 + $0x10] sm:$0xff] %v471_v34  ;;  %v477_v37 = vld [vmem:[%s2800_s21 + $0x40] sm:$0xff]  ;;  %474 = vst [vmem:[%s2796_s19 + $0x18] sm:$0xff] %v473_v35  ;;  %v479_v38 = vld [vmem:[%s2800_s21 + $0x54] sm:$0xff] }
  0x85   : >> { %476 = vst [vmem:[%s2796_s19 + $0x20] sm:$0xff] %v475_v36  ;;  %478 = vst [vmem:[%s2796_s19 + $0x28] sm:$0xff] %v477_v37  ;;  %v481_v39 = vld [vmem:[%s2800_s21 + $0x5c] sm:$0xff]  ;;  %v483_v40 = vld [vmem:[%s2800_s21 + $0x70] sm:$0xff]  ;;  %s4455_s24 = smov (%p596_p6, %s595_s24), 0 }
  0x86   : >> { %480 = vst [vmem:[%s2796_s19 + $0x30] sm:$0xff] %v479_v38  ;;  %482 = vst [vmem:[%s2796_s19 + $0x38] sm:$0xff] %v481_v39  ;;  %v485_v41 = vld [vmem:[%s2800_s21 + $0x78] sm:$0xff]  ;;  %v487_v42 = vld [vmem:[%s2800_s21 + $0x8c] sm:$0xff]  ;;  %s2089_s26 = sshll.u32 %s4455_s24, 4  ;;  %s4425_s22 = smov %s4455_s24 }
  0x87   : >> { %484 = vst [vmem:[%s2796_s19 + $0x40] sm:$0xff] %v483_v40  ;;  %v489_v43 = vld [vmem:[%s2800_s21 + $0x94] sm:$0xff]  ;;  %486 = vst [vmem:[%s2796_s19 + $0x48] sm:$0xff] %v485_v41  ;;  %v491_v44 = vld [vmem:[%s2800_s21 + $0xa8] sm:$0xff]  ;;  %s3336_s4 = scalar_lea.vmem %s2951_s25, %s2089_s26   ;;  %s3339_s5 = scalar_lea.vmem %s2955_s28, %s2089_s26 [#allocation2]  }
  0x88   : >> { %488 = vst [vmem:[%s2796_s19 + $0x50] sm:$0xff] %v487_v42  ;;  %490 = vst [vmem:[%s2796_s19 + $0x58] sm:$0xff] %v489_v43  ;;  %v493_v45 = vld [vmem:[%s2800_s21 + $0xb0] sm:$0xff]  ;;  %v495_v46 = vld [vmem:[%s2800_s21 + $0xc4] sm:$0xff] }
  0x89   : >> { %492 = vst [vmem:[%s2796_s19 + $0x60] sm:$0xff] %v491_v44  ;;  %494 = vst [vmem:[%s2796_s19 + $0x68] sm:$0xff] %v493_v45  ;;  %v497_v47 = vld [vmem:[%s2800_s21 + $0xcc] sm:$0xff]  ;;  %v499_v48 = vld [vmem:[%s2800_s21 + $0xe0] sm:$0xff] }
  0x8a   : >> { %496 = vst [vmem:[%s2796_s19 + $0x70] sm:$0xff] %v495_v46  ;;  %v501_v49 = vld [vmem:[%s2800_s21 + $0xe8] sm:$0xff]  ;;  %498 = vst [vmem:[%s2796_s19 + $0x78] sm:$0xff] %v497_v47  ;;  %v503_v50 = vld [vmem:[%s2800_s21 + $0xfc] sm:$0xff] }
  0x8b   : >> { %500 = vst [vmem:[%s2796_s19 + $0x80] sm:$0xff] %v499_v48  ;;  %502 = vst [vmem:[%s2796_s19 + $0x88] sm:$0xff] %v501_v49  ;;  %v505_v51 = vld [vmem:[%s2800_s21 + $0x104] sm:$0xff]  ;;  %v507_v52 = vld [vmem:[%s2800_s21 + $0x118] sm:$0xff] }
  0x8c   : >> { %504 = vst [vmem:[%s2796_s19 + $0x90] sm:$0xff] %v503_v50  ;;  %506 = vst [vmem:[%s2796_s19 + $0x98] sm:$0xff] %v505_v51  ;;  %v509_v53 = vld [vmem:[%s2800_s21 + $0x120] sm:$0xff]  ;;  %v511_v54 = vld [vmem:[%s2800_s21 + $0x134] sm:$0xff] }
  0x8d   : >> { %508 = vst [vmem:[%s2796_s19 + $0xa0] sm:$0xff] %v507_v52  ;;  %v513_v55 = vld [vmem:[%s2800_s21 + $0x13c] sm:$0xff]  ;;  %510 = vst [vmem:[%s2796_s19 + $0xa8] sm:$0xff] %v509_v53  ;;  %v515_v56 = vld [vmem:[%s2800_s21 + $0x150] sm:$0xff] }
  0x8e   : >> { %512 = vst [vmem:[%s2796_s19 + $0xb0] sm:$0xff] %v511_v54  ;;  %514 = vst [vmem:[%s2796_s19 + $0xb8] sm:$0xff] %v513_v55  ;;  %v517_v57 = vld [vmem:[%s2800_s21 + $0x158] sm:$0xff]  ;;  %v519_v58 = vld [vmem:[%s2800_s21 + $0x16c] sm:$0xff] }
  0x8f   : >> { %516 = vst [vmem:[%s2796_s19 + $0xc0] sm:$0xff] %v515_v56  ;;  %518 = vst [vmem:[%s2796_s19 + $0xc8] sm:$0xff] %v517_v57  ;;  %v521_v59 = vld [vmem:[%s2800_s21 + $0x174] sm:$0xff]  ;;  %v523_v60 = vld [vmem:[%s2800_s21 + $0x188] sm:$0xff] }
  0x90   : >> { %520 = vst [vmem:[%s2796_s19 + $0xd0] sm:$0xff] %v519_v58  ;;  %v525_v61 = vld [vmem:[%s2800_s21 + $0x190] sm:$0xff]  ;;  %522 = vst [vmem:[%s2796_s19 + $0xd8] sm:$0xff] %v521_v59  ;;  %v527_v62 = vld [vmem:[%s2800_s21 + $0x1a4] sm:$0xff] }
  0x91   : >> { %524 = vst [vmem:[%s2796_s19 + $0xe0] sm:$0xff] %v523_v60  ;;  %526 = vst [vmem:[%s2796_s19 + $0xe8] sm:$0xff] %v525_v61  ;;  %v529_v63 = vld [vmem:[%s2800_s21 + $0x1ac] sm:$0xff]  ;;  %v531_v0 = vld [vmem:[%s2800_s21 + $0x1c0] sm:$0xff] }
  0x92   : >> { %528 = vst [vmem:[%s2796_s19 + $0xf0] sm:$0xff] %v527_v62  ;;  %530 = vst [vmem:[%s2796_s19 + $0xf8] sm:$0xff] %v529_v63  ;;  %v533_v1 = vld [vmem:[%s2800_s21 + $0x1c8] sm:$0xff]  ;;  %v535_v2 = vld [vmem:[%s2800_s21 + $0x1dc] sm:$0xff] }
  0x93   : >> { %532 = vst [vmem:[%s2796_s19 + $0x100] sm:$0xff] %v531_v0  ;;  %v537_v3 = vld [vmem:[%s2800_s21 + $0x1e4] sm:$0xff]  ;;  %534 = vst [vmem:[%s2796_s19 + $0x108] sm:$0xff] %v533_v1  ;;  %v539_v4 = vld [vmem:[%s2800_s21 + $0x1f8] sm:$0xff] }
  0x94   : >> { %536 = vst [vmem:[%s2796_s19 + $0x110] sm:$0xff] %v535_v2  ;;  %538 = vst [vmem:[%s2796_s19 + $0x118] sm:$0xff] %v537_v3  ;;  %v541_v5 = vld [vmem:[%s2800_s21 + $0x200] sm:$0xff]  ;;  %v543_v6 = vld [vmem:[%s2800_s21 + $0x214] sm:$0xff] }
  0x95   : >> { %540 = vst [vmem:[%s2796_s19 + $0x120] sm:$0xff] %v539_v4  ;;  %542 = vst [vmem:[%s2796_s19 + $0x128] sm:$0xff] %v541_v5  ;;  %v545_v7 = vld [vmem:[%s2800_s21 + $0x21c] sm:$0xff]  ;;  %v547_v8 = vld [vmem:[%s2800_s21 + $0x230] sm:$0xff] }
  0x96   : >> { %544 = vst [vmem:[%s2796_s19 + $0x130] sm:$0xff] %v543_v6  ;;  %v549_v9 = vld [vmem:[%s2800_s21 + $0x238] sm:$0xff]  ;;  %546 = vst [vmem:[%s2796_s19 + $0x138] sm:$0xff] %v545_v7  ;;  %v551_v10 = vld [vmem:[%s2800_s21 + $0x24c] sm:$0xff] }
  0x97   : >> { %548 = vst [vmem:[%s2796_s19 + $0x140] sm:$0xff] %v547_v8  ;;  %550 = vst [vmem:[%s2796_s19 + $0x148] sm:$0xff] %v549_v9  ;;  %v553_v11 = vld [vmem:[%s2800_s21 + $0x254] sm:$0xff]  ;;  %v555_v12 = vld [vmem:[%s2800_s21 + $0x268] sm:$0xff] }
  0x98   : >> { %552 = vst [vmem:[%s2796_s19 + $0x150] sm:$0xff] %v551_v10  ;;  %554 = vst [vmem:[%s2796_s19 + $0x158] sm:$0xff] %v553_v11  ;;  %v557_v13 = vld [vmem:[%s2800_s21 + $0x270] sm:$0xff]  ;;  %v559_v14 = vld [vmem:[%s2800_s21 + $0x284] sm:$0xff] }
  0x99   : >> { %556 = vst [vmem:[%s2796_s19 + $0x160] sm:$0xff] %v555_v12  ;;  %v561_v15 = vld [vmem:[%s2800_s21 + $0x28c] sm:$0xff]  ;;  %558 = vst [vmem:[%s2796_s19 + $0x168] sm:$0xff] %v557_v13  ;;  %v563_v16 = vld [vmem:[%s2800_s21 + $0x2a0] sm:$0xff] }
  0x9a   : >> { %560 = vst [vmem:[%s2796_s19 + $0x170] sm:$0xff] %v559_v14  ;;  %562 = vst [vmem:[%s2796_s19 + $0x178] sm:$0xff] %v561_v15  ;;  %v565_v17 = vld [vmem:[%s2800_s21 + $0x2a8] sm:$0xff]  ;;  %v567_v18 = vld [vmem:[%s2800_s21 + $0x2bc] sm:$0xff] }
  0x9b   : >> { %564 = vst [vmem:[%s2796_s19 + $0x180] sm:$0xff] %v563_v16  ;;  %566 = vst [vmem:[%s2796_s19 + $0x188] sm:$0xff] %v565_v17  ;;  %v569_v19 = vld [vmem:[%s2800_s21 + $0x2c4] sm:$0xff]  ;;  %v571_v20 = vld [vmem:[%s2800_s21 + $0x2d8] sm:$0xff] }
  0x9c   : >> { %568 = vst [vmem:[%s2796_s19 + $0x190] sm:$0xff] %v567_v18  ;;  %v573_v21 = vld [vmem:[%s2800_s21 + $0x2e0] sm:$0xff]  ;;  %570 = vst [vmem:[%s2796_s19 + $0x198] sm:$0xff] %v569_v19  ;;  %v575_v22 = vld [vmem:[%s2800_s21 + $0x2f4] sm:$0xff]  ;;  %463 = sbr.rel (!%p460_p7) target bundleno = 130 (0x82), region = 253 }
  0x9d   : >> { %572 = vst [vmem:[%s2796_s19 + $0x1a0] sm:$0xff] %v571_v20  ;;  %574 = vst [vmem:[%s2796_s19 + $0x1a8] sm:$0xff] %v573_v21  ;;  %v577_v23 = vld [vmem:[%s2800_s21 + $0x2fc] sm:$0xff]  ;;  %v579_v24 = vld [vmem:[%s2800_s21 + $0x310] sm:$0xff] }
  0x9e   : >> { %576 = vst [vmem:[%s2796_s19 + $0x1b0] sm:$0xff] %v575_v22  ;;  %578 = vst [vmem:[%s2796_s19 + $0x1b8] sm:$0xff] %v577_v23  ;;  %v581_v25 = vld [vmem:[%s2800_s21 + $0x318] sm:$0xff]  ;;  %v583_v26 = vld [vmem:[%s2800_s21 + $0x32c] sm:$0xff] }
  0x9f   : >> { %580 = vst [vmem:[%s2796_s19 + $0x1c0] sm:$0xff] %v579_v24  ;;  %v585_v27 = vld [vmem:[%s2800_s21 + $0x334] sm:$0xff]  ;;  %582 = vst [vmem:[%s2796_s19 + $0x1c8] sm:$0xff] %v581_v25  ;;  %v587_v28 = vld [vmem:[%s2800_s21 + $0x348] sm:$0xff] }
  0xa0   : >> { %584 = vst [vmem:[%s2796_s19 + $0x1d0] sm:$0xff] %v583_v26  ;;  %586 = vst [vmem:[%s2796_s19 + $0x1d8] sm:$0xff] %v585_v27  ;;  %v589_v29 = vld [vmem:[%s2800_s21 + $0x350] sm:$0xff]  ;;  %v591_v30 = vld [vmem:[%s2800_s21 + $0x364] sm:$0xff] }
  0xa1   : >> { %588 = vst [vmem:[%s2796_s19 + $0x1e0] sm:$0xff] %v587_v28  ;;  %590 = vst [vmem:[%s2796_s19 + $0x1e8] sm:$0xff] %v589_v29  ;;  %v593_v31 = vld [vmem:[%s2800_s21 + $0x36c] sm:$0xff]  ;;  %s4424_s21 = smov %s3336_s4 }
  0xa2   : >> { %592 = vst [vmem:[%s2796_s19 + $0x1f0] sm:$0xff] %v591_v30  ;;  %594 = vst [vmem:[%s2796_s19 + $0x1f8] sm:$0xff] %v593_v31  ;;  %s4423_s19 = smov %s3339_s5 }
  0xa3 PF: > { %s3445_s30 = sand.u32 1, %s454_s14   ;;  %s2209_s3 = sshll.u32 %s3269_s20, 8 }
  0xa4   : > { %s606_s6 = sshra.s32 %s2209_s3, 4  ;;  %p2094_p8 = scmp.le.s32.totalorder %s3445_s30, 0 }
  0xa5   : > { %s3449_s7 = scalar_lea.vmem %s2951_s25, %s606_s6   ;;  %s3452_s8 = scalar_lea.vmem %s2955_s28, %s606_s6 [#allocation2]  }
  0xa6   : > { %1982 = sbr.rel (%p2094_p8) target bundleno = 190 (0xbe), region = 258  ;;  %s4426_s19 = smov (!%p2094_p8), %s3452_s8 }
  0xa7   : > { %s4427_s21 = smov (!%p2094_p8), %s3449_s7  ;;  %s3461_s22 = smov (!%p2094_p8), 0  }
  0xa8   : > { %s3463_s23 = smov (!%p2094_p8), 0  }
  0xad LB: >> { %v622_v32 = vld [vmem:[%s2816_s21] sm:$0xff]  ;;  %v626_v34 = vld [vmem:[%s2816_s21 + $0x38] sm:$0xff]  ;;  %s686_s14 = sadd.s32 1, %s2820_s22  ;;  %v630_v36 = vld [vmem:[%s2816_s21 + $0x70] sm:$0xff]  ;;  %s616_s23 = sadd.s32 1, %s2824_s23   ;;  %s2824_s23 = sphi %s3463_s23, %s616_s23   ;;  %s2820_s22 = sphi %s3461_s22, %s4430_s22   ;;  %s2816_s21 = sphi %s4427_s21, %s4429_s21   ;;  %s2812_s19 = sphi %s4426_s19, %s4428_s19  }
  0xae   : >> { %v624_v33 = vld [vmem:[%s2816_s21 + $0x1c] sm:$0xff]  ;;  %623 = vst [vmem:[%s2812_s19] sm:$0xff] %v622_v32  ;;  %627 = vst [vmem:[%s2812_s19 + $0x20] sm:$0xff] %v626_v34  ;;  %v628_v35 = vld [vmem:[%s2816_s21 + $0x54] sm:$0xff]  ;;  %p687_p9 = scmp.ge.s32.totalorder %s686_s14, %s3445_s30  ;;  %p615_p10 = scmp.ge.s32.totalorder %s616_s23, %s3445_s30 }
  0xaf   : >> { %625 = vst [vmem:[%s2812_s19 + $0x10] sm:$0xff] %v624_v33  ;;  %v632_v37 = vld [vmem:[%s2816_s21 + $0x8c] sm:$0xff]  ;;  %629 = vst [vmem:[%s2812_s19 + $0x30] sm:$0xff] %v628_v35  ;;  %v636_v39 = vld [vmem:[%s2816_s21 + $0xc4] sm:$0xff] }
  0xb0   : >> { %631 = vst [vmem:[%s2812_s19 + $0x40] sm:$0xff] %v630_v36  ;;  %633 = vst [vmem:[%s2812_s19 + $0x50] sm:$0xff] %v632_v37  ;;  %v634_v38 = vld [vmem:[%s2816_s21 + $0xa8] sm:$0xff]  ;;  %v638_v40 = vld [vmem:[%s2816_s21 + $0xe0] sm:$0xff]  ;;  %s4457_s14 = smov (%p687_p9, %s686_s14), 0 }
  0xb1   : >> { %635 = vst [vmem:[%s2812_s19 + $0x60] sm:$0xff] %v634_v38  ;;  %637 = vst [vmem:[%s2812_s19 + $0x70] sm:$0xff] %v636_v39  ;;  %v640_v41 = vld [vmem:[%s2816_s21 + $0xfc] sm:$0xff]  ;;  %v644_v43 = vld [vmem:[%s2816_s21 + $0x134] sm:$0xff]  ;;  %s2095_s20 = sshll.u32 %s4457_s14, 3  ;;  %s4430_s22 = smov %s4457_s14 }
  0xb2   : >> { %639 = vst [vmem:[%s2812_s19 + $0x80] sm:$0xff] %v638_v40  ;;  %v642_v42 = vld [vmem:[%s2816_s21 + $0x118] sm:$0xff]  ;;  %641 = vst [vmem:[%s2812_s19 + $0x90] sm:$0xff] %v640_v41  ;;  %v646_v44 = vld [vmem:[%s2816_s21 + $0x150] sm:$0xff]  ;;  %s3519_s24 = scalar_lea.vmem %s3449_s7, %s2095_s20   ;;  %s692_s26 = scalar_lea.vmem %s3452_s8, %s2095_s20 [#allocation2]  }
  0xb3   : >> { %643 = vst [vmem:[%s2812_s19 + $0xa0] sm:$0xff] %v642_v42  ;;  %645 = vst [vmem:[%s2812_s19 + $0xb0] sm:$0xff] %v644_v43  ;;  %v648_v45 = vld [vmem:[%s2816_s21 + $0x16c] sm:$0xff]  ;;  %v652_v47 = vld [vmem:[%s2816_s21 + $0x1a4] sm:$0xff] }
  0xb4   : >> { %v650_v46 = vld [vmem:[%s2816_s21 + $0x188] sm:$0xff]  ;;  %647 = vst [vmem:[%s2812_s19 + $0xc0] sm:$0xff] %v646_v44  ;;  %649 = vst [vmem:[%s2812_s19 + $0xd0] sm:$0xff] %v648_v45  ;;  %v654_v48 = vld [vmem:[%s2816_s21 + $0x1c0] sm:$0xff] }
  0xb5   : >> { %651 = vst [vmem:[%s2812_s19 + $0xe0] sm:$0xff] %v650_v46  ;;  %v656_v49 = vld [vmem:[%s2816_s21 + $0x1dc] sm:$0xff]  ;;  %653 = vst [vmem:[%s2812_s19 + $0xf0] sm:$0xff] %v652_v47  ;;  %v660_v51 = vld [vmem:[%s2816_s21 + $0x214] sm:$0xff] }
  0xb6   : >> { %655 = vst [vmem:[%s2812_s19 + $0x100] sm:$0xff] %v654_v48  ;;  %657 = vst [vmem:[%s2812_s19 + $0x110] sm:$0xff] %v656_v49  ;;  %v658_v50 = vld [vmem:[%s2816_s21 + $0x1f8] sm:$0xff]  ;;  %v662_v52 = vld [vmem:[%s2816_s21 + $0x230] sm:$0xff] }
  0xb7   : >> { %659 = vst [vmem:[%s2812_s19 + $0x120] sm:$0xff] %v658_v50  ;;  %661 = vst [vmem:[%s2812_s19 + $0x130] sm:$0xff] %v660_v51  ;;  %v664_v53 = vld [vmem:[%s2816_s21 + $0x24c] sm:$0xff]  ;;  %v668_v55 = vld [vmem:[%s2816_s21 + $0x284] sm:$0xff]  ;;  %618 = sbr.rel (!%p615_p10) target bundleno = 173 (0xad), region = 264 }
  0xb8   : >> { %663 = vst [vmem:[%s2812_s19 + $0x140] sm:$0xff] %v662_v52  ;;  %v666_v54 = vld [vmem:[%s2816_s21 + $0x268] sm:$0xff]  ;;  %665 = vst [vmem:[%s2812_s19 + $0x150] sm:$0xff] %v664_v53  ;;  %v670_v56 = vld [vmem:[%s2816_s21 + $0x2a0] sm:$0xff] }
  0xb9   : >> { %667 = vst [vmem:[%s2812_s19 + $0x160] sm:$0xff] %v666_v54  ;;  %669 = vst [vmem:[%s2812_s19 + $0x170] sm:$0xff] %v668_v55  ;;  %v672_v57 = vld [vmem:[%s2816_s21 + $0x2bc] sm:$0xff]  ;;  %v676_v59 = vld [vmem:[%s2816_s21 + $0x2f4] sm:$0xff] }
  0xba   : >> { %v674_v58 = vld [vmem:[%s2816_s21 + $0x2d8] sm:$0xff]  ;;  %671 = vst [vmem:[%s2812_s19 + $0x180] sm:$0xff] %v670_v56  ;;  %673 = vst [vmem:[%s2812_s19 + $0x190] sm:$0xff] %v672_v57  ;;  %v678_v60 = vld [vmem:[%s2816_s21 + $0x310] sm:$0xff] }
  0xbb   : >> { %675 = vst [vmem:[%s2812_s19 + $0x1a0] sm:$0xff] %v674_v58  ;;  %v680_v61 = vld [vmem:[%s2816_s21 + $0x32c] sm:$0xff]  ;;  %677 = vst [vmem:[%s2812_s19 + $0x1b0] sm:$0xff] %v676_v59  ;;  %v684_v63 = vld [vmem:[%s2816_s21 + $0x364] sm:$0xff] }
  0xbc   : >> { %679 = vst [vmem:[%s2812_s19 + $0x1c0] sm:$0xff] %v678_v60  ;;  %681 = vst [vmem:[%s2812_s19 + $0x1d0] sm:$0xff] %v680_v61  ;;  %v682_v62 = vld [vmem:[%s2816_s21 + $0x348] sm:$0xff]  ;;  %s4429_s21 = smov %s3519_s24 }
  0xbd   : >> { %683 = vst [vmem:[%s2812_s19 + $0x1e0] sm:$0xff] %v682_v62  ;;  %685 = vst [vmem:[%s2812_s19 + $0x1f0] sm:$0xff] %v684_v63  ;;  %s4428_s19 = smov %s692_s26 }
  0xbe PF: > { %s2890_s4 = smov 0  }
  0xbf   : > { %s3560_s5 = sshllo.u32 %s2890_s4, %s2959_s29 }
  0xc0   : > { %v702_v0 = vld [vmem:[%s3262_s15] sm:%s3560_s5]  ;;  %v706_v2 = vld [vmem:[%s3262_s15 + $0x38] sm:%s3560_s5] }
  0xc1   : > { %v704_v1 = vld [vmem:[%s3262_s15 + $0x1c] sm:%s3560_s5]  ;;  %703 = vst [vmem:[%s3265_s18] sm:%s3560_s5] %v702_v0 }
  0xc2   : > { %705 = vst [vmem:[%s3265_s18 + $0x10] sm:%s3560_s5] %v704_v1  ;;  %v708_v3 = vld [vmem:[%s3262_s15 + $0x54] sm:%s3560_s5] }
  0xc3   : > { %707 = vst [vmem:[%s3265_s18 + $0x20] sm:%s3560_s5] %v706_v2  ;;  %709 = vst [vmem:[%s3265_s18 + $0x30] sm:%s3560_s5] %v708_v3 }
  0xc4   : > { %v710_v4 = vld [vmem:[%s3262_s15 + $0x70] sm:%s3560_s5]  ;;  %v714_v6 = vld [vmem:[%s3262_s15 + $0xa8] sm:%s3560_s5] }
  0xc5   : > { %v712_v5 = vld [vmem:[%s3262_s15 + $0x8c] sm:%s3560_s5]  ;;  %711 = vst [vmem:[%s3265_s18 + $0x40] sm:%s3560_s5] %v710_v4 }
  0xc6   : > { %713 = vst [vmem:[%s3265_s18 + $0x50] sm:%s3560_s5] %v712_v5  ;;  %v716_v7 = vld [vmem:[%s3262_s15 + $0xc4] sm:%s3560_s5] }
  0xc7   : > { %715 = vst [vmem:[%s3265_s18 + $0x60] sm:%s3560_s5] %v714_v6  ;;  %717 = vst [vmem:[%s3265_s18 + $0x70] sm:%s3560_s5] %v716_v7 }
  0xc8   : > { %v718_v8 = vld [vmem:[%s3262_s15 + $0xe0] sm:%s3560_s5]  ;;  %v722_v10 = vld [vmem:[%s3262_s15 + $0x118] sm:%s3560_s5] }
  0xc9   : > { %v720_v9 = vld [vmem:[%s3262_s15 + $0xfc] sm:%s3560_s5]  ;;  %719 = vst [vmem:[%s3265_s18 + $0x80] sm:%s3560_s5] %v718_v8 }
  0xca   : > { %721 = vst [vmem:[%s3265_s18 + $0x90] sm:%s3560_s5] %v720_v9  ;;  %v724_v11 = vld [vmem:[%s3262_s15 + $0x134] sm:%s3560_s5] }
  0xcb   : > { %723 = vst [vmem:[%s3265_s18 + $0xa0] sm:%s3560_s5] %v722_v10  ;;  %725 = vst [vmem:[%s3265_s18 + $0xb0] sm:%s3560_s5] %v724_v11 }
  0xcc   : > { %v726_v12 = vld [vmem:[%s3262_s15 + $0x150] sm:%s3560_s5]  ;;  %v730_v14 = vld [vmem:[%s3262_s15 + $0x188] sm:%s3560_s5] }
  0xcd   : > { %v728_v13 = vld [vmem:[%s3262_s15 + $0x16c] sm:%s3560_s5]  ;;  %727 = vst [vmem:[%s3265_s18 + $0xc0] sm:%s3560_s5] %v726_v12 }
  0xce   : > { %729 = vst [vmem:[%s3265_s18 + $0xd0] sm:%s3560_s5] %v728_v13  ;;  %v732_v15 = vld [vmem:[%s3262_s15 + $0x1a4] sm:%s3560_s5] }
  0xcf   : > { %731 = vst [vmem:[%s3265_s18 + $0xe0] sm:%s3560_s5] %v730_v14  ;;  %733 = vst [vmem:[%s3265_s18 + $0xf0] sm:%s3560_s5] %v732_v15 }
  0xd0   : > { %v734_v16 = vld [vmem:[%s3262_s15 + $0x1c0] sm:%s3560_s5]  ;;  %v738_v18 = vld [vmem:[%s3262_s15 + $0x1f8] sm:%s3560_s5] }
  0xd1   : > { %v736_v17 = vld [vmem:[%s3262_s15 + $0x1dc] sm:%s3560_s5]  ;;  %735 = vst [vmem:[%s3265_s18 + $0x100] sm:%s3560_s5] %v734_v16 }
  0xd2   : > { %737 = vst [vmem:[%s3265_s18 + $0x110] sm:%s3560_s5] %v736_v17  ;;  %v740_v19 = vld [vmem:[%s3262_s15 + $0x214] sm:%s3560_s5] }
  0xd3   : > { %739 = vst [vmem:[%s3265_s18 + $0x120] sm:%s3560_s5] %v738_v18  ;;  %741 = vst [vmem:[%s3265_s18 + $0x130] sm:%s3560_s5] %v740_v19 }
  0xd4   : > { %v742_v20 = vld [vmem:[%s3262_s15 + $0x230] sm:%s3560_s5]  ;;  %v746_v22 = vld [vmem:[%s3262_s15 + $0x268] sm:%s3560_s5] }
  0xd5   : > { %v744_v21 = vld [vmem:[%s3262_s15 + $0x24c] sm:%s3560_s5]  ;;  %743 = vst [vmem:[%s3265_s18 + $0x140] sm:%s3560_s5] %v742_v20 }
  0xd6   : > { %745 = vst [vmem:[%s3265_s18 + $0x150] sm:%s3560_s5] %v744_v21  ;;  %v748_v23 = vld [vmem:[%s3262_s15 + $0x284] sm:%s3560_s5] }
  0xd7   : > { %747 = vst [vmem:[%s3265_s18 + $0x160] sm:%s3560_s5] %v746_v22  ;;  %749 = vst [vmem:[%s3265_s18 + $0x170] sm:%s3560_s5] %v748_v23 }
  0xd8   : > { %v750_v24 = vld [vmem:[%s3262_s15 + $0x2a0] sm:%s3560_s5]  ;;  %v754_v26 = vld [vmem:[%s3262_s15 + $0x2d8] sm:%s3560_s5] }
  0xd9   : > { %v752_v25 = vld [vmem:[%s3262_s15 + $0x2bc] sm:%s3560_s5]  ;;  %751 = vst [vmem:[%s3265_s18 + $0x180] sm:%s3560_s5] %v750_v24 }
  0xda   : > { %753 = vst [vmem:[%s3265_s18 + $0x190] sm:%s3560_s5] %v752_v25  ;;  %v756_v27 = vld [vmem:[%s3262_s15 + $0x2f4] sm:%s3560_s5] }
  0xdb   : > { %755 = vst [vmem:[%s3265_s18 + $0x1a0] sm:%s3560_s5] %v754_v26  ;;  %757 = vst [vmem:[%s3265_s18 + $0x1b0] sm:%s3560_s5] %v756_v27 }
  0xdc   : > { %v758_v28 = vld [vmem:[%s3262_s15 + $0x310] sm:%s3560_s5]  ;;  %v762_v30 = vld [vmem:[%s3262_s15 + $0x348] sm:%s3560_s5] }
  0xdd   : > { %v760_v29 = vld [vmem:[%s3262_s15 + $0x32c] sm:%s3560_s5]  ;;  %759 = vst [vmem:[%s3265_s18 + $0x1c0] sm:%s3560_s5] %v758_v28 }
  0xde   : > { %761 = vst [vmem:[%s3265_s18 + $0x1d0] sm:%s3560_s5] %v760_v29  ;;  %v764_v31 = vld [vmem:[%s3262_s15 + $0x364] sm:%s3560_s5] }
  0xdf   : > { %763 = vst [vmem:[%s3265_s18 + $0x1e0] sm:%s3560_s5] %v762_v30  ;;  %765 = vst [vmem:[%s3265_s18 + $0x1f0] sm:%s3560_s5] %v764_v31 }
  0xe0 PF: > { %p2097_p11 = scmp.ge.u32.totalorder %s2953_s27, 8 }
  0xe1   : > { %s2891_s29 = smov (!%p2097_p11), 0  }
  0xe2   : > { %128 = sbr.rel (%p2097_p11) target bundleno = 259 (0x103), region = 36  ;;  %s3692_s15 = sshllo.u32 (!%p2097_p11), %s2891_s29, %s2953_s27 }
  0xe3   : > { %v138_v32 = vld [vmem:[%s2951_s25] sm:%s3692_s15] (!%p2097_p11)  ;;  %v142_v34 = vld [vmem:[%s2951_s25 + $0x38] sm:%s3692_s15] (!%p2097_p11) }
  0xe4   : > { %v140_v33 = vld [vmem:[%s2951_s25 + $0x1c] sm:%s3692_s15] (!%p2097_p11)  ;;  %139 = vst [vmem:[%s2955_s28] sm:%s3692_s15] (!%p2097_p11), %v138_v32 }
  0xe5   : > { %141 = vst [vmem:[%s2955_s28 + $0x10] sm:%s3692_s15] (!%p2097_p11), %v140_v33  ;;  %v144_v35 = vld [vmem:[%s2951_s25 + $0x54] sm:%s3692_s15] (!%p2097_p11) }
  0xe6   : > { %143 = vst [vmem:[%s2955_s28 + $0x20] sm:%s3692_s15] (!%p2097_p11), %v142_v34  ;;  %145 = vst [vmem:[%s2955_s28 + $0x30] sm:%s3692_s15] (!%p2097_p11), %v144_v35 }
  0xe7   : > { %v146_v36 = vld [vmem:[%s2951_s25 + $0x70] sm:%s3692_s15] (!%p2097_p11)  ;;  %v150_v38 = vld [vmem:[%s2951_s25 + $0xa8] sm:%s3692_s15] (!%p2097_p11) }
  0xe8   : > { %v148_v37 = vld [vmem:[%s2951_s25 + $0x8c] sm:%s3692_s15] (!%p2097_p11)  ;;  %147 = vst [vmem:[%s2955_s28 + $0x40] sm:%s3692_s15] (!%p2097_p11), %v146_v36 }
  0xe9   : > { %149 = vst [vmem:[%s2955_s28 + $0x50] sm:%s3692_s15] %v148_v37  ;;  %v152_v39 = vld [vmem:[%s2951_s25 + $0xc4] sm:%s3692_s15] }
  0xea   : > { %151 = vst [vmem:[%s2955_s28 + $0x60] sm:%s3692_s15] %v150_v38  ;;  %153 = vst [vmem:[%s2955_s28 + $0x70] sm:%s3692_s15] %v152_v39 }
  0xeb   : > { %v154_v40 = vld [vmem:[%s2951_s25 + $0xe0] sm:%s3692_s15]  ;;  %v158_v42 = vld [vmem:[%s2951_s25 + $0x118] sm:%s3692_s15] }
  0xec   : > { %v156_v41 = vld [vmem:[%s2951_s25 + $0xfc] sm:%s3692_s15]  ;;  %155 = vst [vmem:[%s2955_s28 + $0x80] sm:%s3692_s15] %v154_v40 }
  0xed   : > { %157 = vst [vmem:[%s2955_s28 + $0x90] sm:%s3692_s15] %v156_v41  ;;  %v160_v43 = vld [vmem:[%s2951_s25 + $0x134] sm:%s3692_s15] }
  0xee   : > { %159 = vst [vmem:[%s2955_s28 + $0xa0] sm:%s3692_s15] %v158_v42  ;;  %161 = vst [vmem:[%s2955_s28 + $0xb0] sm:%s3692_s15] %v160_v43 }
  0xef   : > { %v162_v44 = vld [vmem:[%s2951_s25 + $0x150] sm:%s3692_s15]  ;;  %v166_v46 = vld [vmem:[%s2951_s25 + $0x188] sm:%s3692_s15] }
  0xf0   : > { %v164_v45 = vld [vmem:[%s2951_s25 + $0x16c] sm:%s3692_s15]  ;;  %163 = vst [vmem:[%s2955_s28 + $0xc0] sm:%s3692_s15] %v162_v44 }
  0xf1   : > { %165 = vst [vmem:[%s2955_s28 + $0xd0] sm:%s3692_s15] %v164_v45  ;;  %v168_v47 = vld [vmem:[%s2951_s25 + $0x1a4] sm:%s3692_s15] }
  0xf2   : > { %167 = vst [vmem:[%s2955_s28 + $0xe0] sm:%s3692_s15] %v166_v46  ;;  %169 = vst [vmem:[%s2955_s28 + $0xf0] sm:%s3692_s15] %v168_v47 }
  0xf3   : > { %v170_v48 = vld [vmem:[%s2951_s25 + $0x1c0] sm:%s3692_s15]  ;;  %v174_v50 = vld [vmem:[%s2951_s25 + $0x1f8] sm:%s3692_s15] }
  0xf4   : > { %v172_v49 = vld [vmem:[%s2951_s25 + $0x1dc] sm:%s3692_s15]  ;;  %171 = vst [vmem:[%s2955_s28 + $0x100] sm:%s3692_s15] %v170_v48 }
  0xf5   : > { %173 = vst [vmem:[%s2955_s28 + $0x110] sm:%s3692_s15] %v172_v49  ;;  %v176_v51 = vld [vmem:[%s2951_s25 + $0x214] sm:%s3692_s15] }
  0xf6   : > { %175 = vst [vmem:[%s2955_s28 + $0x120] sm:%s3692_s15] %v174_v50  ;;  %177 = vst [vmem:[%s2955_s28 + $0x130] sm:%s3692_s15] %v176_v51 }
  0xf7   : > { %v178_v52 = vld [vmem:[%s2951_s25 + $0x230] sm:%s3692_s15]  ;;  %v182_v54 = vld [vmem:[%s2951_s25 + $0x268] sm:%s3692_s15] }
  0xf8   : > { %v180_v53 = vld [vmem:[%s2951_s25 + $0x24c] sm:%s3692_s15]  ;;  %179 = vst [vmem:[%s2955_s28 + $0x140] sm:%s3692_s15] %v178_v52 }
  0xf9   : > { %181 = vst [vmem:[%s2955_s28 + $0x150] sm:%s3692_s15] %v180_v53  ;;  %v184_v55 = vld [vmem:[%s2951_s25 + $0x284] sm:%s3692_s15] }
  0xfa   : > { %183 = vst [vmem:[%s2955_s28 + $0x160] sm:%s3692_s15] %v182_v54  ;;  %185 = vst [vmem:[%s2955_s28 + $0x170] sm:%s3692_s15] %v184_v55 }
  0xfb   : > { %v186_v56 = vld [vmem:[%s2951_s25 + $0x2a0] sm:%s3692_s15]  ;;  %v190_v58 = vld [vmem:[%s2951_s25 + $0x2d8] sm:%s3692_s15] }
  0xfc   : > { %v188_v57 = vld [vmem:[%s2951_s25 + $0x2bc] sm:%s3692_s15]  ;;  %187 = vst [vmem:[%s2955_s28 + $0x180] sm:%s3692_s15] %v186_v56 }
  0xfd   : > { %189 = vst [vmem:[%s2955_s28 + $0x190] sm:%s3692_s15] %v188_v57  ;;  %v192_v59 = vld [vmem:[%s2951_s25 + $0x2f4] sm:%s3692_s15] }
  0xfe   : > { %191 = vst [vmem:[%s2955_s28 + $0x1a0] sm:%s3692_s15] %v190_v58  ;;  %193 = vst [vmem:[%s2955_s28 + $0x1b0] sm:%s3692_s15] %v192_v59 }
  0xff   : > { %v194_v60 = vld [vmem:[%s2951_s25 + $0x310] sm:%s3692_s15]  ;;  %v198_v62 = vld [vmem:[%s2951_s25 + $0x348] sm:%s3692_s15] }
 0x100   : > { %v196_v61 = vld [vmem:[%s2951_s25 + $0x32c] sm:%s3692_s15]  ;;  %195 = vst [vmem:[%s2955_s28 + $0x1c0] sm:%s3692_s15] %v194_v60 }
 0x101   : > { %197 = vst [vmem:[%s2955_s28 + $0x1d0] sm:%s3692_s15] %v196_v61  ;;  %v200_v63 = vld [vmem:[%s2951_s25 + $0x364] sm:%s3692_s15] }
 0x102   : > { %199 = vst [vmem:[%s2955_s28 + $0x1e0] sm:%s3692_s15] %v198_v62  ;;  %201 = vst [vmem:[%s2955_s28 + $0x1f0] sm:%s3692_s15] %v200_v63 }
 0x103 PF: > { %p2098_p12 = scmp.ge.s32.totalorder %s2760_s11, 1  ;;  %p768_p13 = scmp.lt.s32.totalorder %s2760_s11, 3 }
 0x105   : > { %p769_p0 = pnand %p2098_p12, %p768_p13 }
 0x106   : > { %s775_s27 = sand.u32 (!%p769_p0), 1, %s2752_s9   ;;  %v2606_v0 = vld [vmem:[%s4407_s0 + $0x4] ss:$8 sps:$4 sm:$0xff] (!%p769_p0)  }
 0x107   : > { %772 = sbr.rel (%p769_p0) target bundleno = 728 (0x2d8), region = 90  ;;  %s2099_s18 = sshll.u32 (!%p769_p0), %s775_s27, 9  ;;  %1245 = vmatprep.mubr.bf16.mxu0 (!%p769_p0), %v2606_v0  ;;  %1298 = vmatprep.mubr.bf16.mxu1 (!%p769_p0), %v2606_v0 }
 0x108   : > { %s3830_s25 = scalar_lea.vmem (!%p769_p0), [#allocation2], %s2099_s18  ;;  %s2100_s21 = sshll.u32 (!%p769_p0), %s775_s27, 6 }
 0x109   : > { %v2508_v1 = vld [vmem:[%s3830_s25 + $0x4] ss:$16 sps:$4 sm:$0xff] (!%p769_p0)   ;;  %v2510_v2 = vld [vmem:[%s3830_s25 + $0xc] ss:$16 sps:$4 sm:$0xff] (!%p769_p0)   ;;  %v2512_v3 = vld [vmem:[%s3830_s25] ss:$16 sps:$4 sm:$0xff] (!%p769_p0)  }
 0x10a   : > { %1213 = vmatprep.subr.bf16.mxu0 (!%p769_p0), %v2508_v1  ;;  %v2513_v4 = vld [vmem:[%s3830_s25 + $0x8] ss:$16 sps:$4 sm:$0xff] (!%p769_p0)   ;;  %1266 = vmatprep.subr.bf16.mxu1 (!%p769_p0), %v2510_v2  ;;  %v2514_v5 = vld [vmem:[%s3830_s25 + $0x24] ss:$16 sps:$4 sm:$0xff] (!%p769_p0)   ;;  %v2516_v6 = vld [vmem:[%s3830_s25 + $0x2c] ss:$16 sps:$4 sm:$0xff] (!%p769_p0)  }
 0x10b   : > { %1214 = vmatpush1.bf16.msra.mxu0 (!%p769_p0), %v2512_v3  ;;  %1267 = vmatpush1.bf16.msra.mxu1 (!%p769_p0), %v2513_v4  ;;  %v2518_v7 = vld [vmem:[%s3830_s25 + $0x20] ss:$16 sps:$4 sm:$0xff] (!%p769_p0)   ;;  %v2519_v8 = vld [vmem:[%s3830_s25 + $0x28] ss:$16 sps:$4 sm:$0xff] (!%p769_p0)   ;;  %v2520_v9 = vld [vmem:[%s3830_s25 + $0x44] ss:$16 sps:$4 sm:$0xff] (!%p769_p0)  }
 0x10c   : > { %1215 = vmatprep.subr.bf16.mxu0 (!%p769_p0), %v2514_v5  ;;  %1268 = vmatprep.subr.bf16.mxu1 (!%p769_p0), %v2516_v6  ;;  %v2522_v10 = vld [vmem:[%s3830_s25 + $0x4c] ss:$16 sps:$4 sm:$0xff] (!%p769_p0)   ;;  %v2524_v11 = vld [vmem:[%s3830_s25 + $0x40] ss:$16 sps:$4 sm:$0xff] (!%p769_p0)   ;;  %v2525_v12 = vld [vmem:[%s3830_s25 + $0x48] ss:$16 sps:$4 sm:$0xff] (!%p769_p0)  }
 0x10d   : > { %v2526_v13 = vld [vmem:[%s3830_s25 + $0x64] ss:$16 sps:$4 sm:$0xff] (!%p769_p0)   ;;  %v2528_v14 = vld [vmem:[%s3830_s25 + $0x6c] ss:$16 sps:$4 sm:$0xff] (!%p769_p0)   ;;  %v2530_v15 = vld [vmem:[%s3830_s25 + $0x60] ss:$16 sps:$4 sm:$0xff] (!%p769_p0)  }
 0x10e   : > { %v2531_v16 = vld [vmem:[%s3830_s25 + $0x68] ss:$16 sps:$4 sm:$0xff]   ;;  %v2532_v17 = vld [vmem:[%s3830_s25 + $0x84] ss:$16 sps:$4 sm:$0xff]   ;;  %v2534_v18 = vld [vmem:[%s3830_s25 + $0x8c] ss:$16 sps:$4 sm:$0xff]  }
 0x10f   : > { %1216 = vmatpush1.bf16.msra.mxu0 %v2518_v7  ;;  %1269 = vmatpush1.bf16.msra.mxu1 %v2519_v8  ;;  %v2536_v19 = vld [vmem:[%s3830_s25 + $0x80] ss:$16 sps:$4 sm:$0xff]   ;;  %v2537_v20 = vld [vmem:[%s3830_s25 + $0x88] ss:$16 sps:$4 sm:$0xff]   ;;  %v2538_v21 = vld [vmem:[%s3830_s25 + $0xa4] ss:$16 sps:$4 sm:$0xff]  }
 0x110   : > { %1217 = vmatprep.subr.bf16.mxu0 %v2520_v9  ;;  %1270 = vmatprep.subr.bf16.mxu1 %v2522_v10  ;;  %v2540_v22 = vld [vmem:[%s3830_s25 + $0xac] ss:$16 sps:$4 sm:$0xff]   ;;  %v2542_v23 = vld [vmem:[%s3830_s25 + $0xa0] ss:$16 sps:$4 sm:$0xff]   ;;  %v2543_v24 = vld [vmem:[%s3830_s25 + $0xa8] ss:$16 sps:$4 sm:$0xff]  }
 0x111   : > { %v2544_v25 = vld [vmem:[%s3830_s25 + $0xc4] ss:$16 sps:$4 sm:$0xff]   ;;  %v2546_v26 = vld [vmem:[%s3830_s25 + $0xcc] ss:$16 sps:$4 sm:$0xff]   ;;  %v2548_v27 = vld [vmem:[%s3830_s25 + $0xc0] ss:$16 sps:$4 sm:$0xff]  }
 0x112   : > { %v2549_v28 = vld [vmem:[%s3830_s25 + $0xc8] ss:$16 sps:$4 sm:$0xff]   ;;  %v2550_v29 = vld [vmem:[%s3830_s25 + $0xe4] ss:$16 sps:$4 sm:$0xff]   ;;  %v2552_v30 = vld [vmem:[%s3830_s25 + $0xec] ss:$16 sps:$4 sm:$0xff]  }
 0x113   : > { %1218 = vmatpush1.bf16.msra.mxu0 %v2524_v11  ;;  %1271 = vmatpush1.bf16.msra.mxu1 %v2525_v12  ;;  %v2554_v31 = vld [vmem:[%s3830_s25 + $0xe0] ss:$16 sps:$4 sm:$0xff]   ;;  %v2555_v32 = vld [vmem:[%s3830_s25 + $0xe8] ss:$16 sps:$4 sm:$0xff]   ;;  %v2556_v33 = vld [vmem:[%s3830_s25 + $0x104] ss:$16 sps:$4 sm:$0xff]  }
 0x114   : > { %1219 = vmatprep.subr.bf16.mxu0 %v2526_v13  ;;  %1272 = vmatprep.subr.bf16.mxu1 %v2528_v14  ;;  %v2558_v34 = vld [vmem:[%s3830_s25 + $0x10c] ss:$16 sps:$4 sm:$0xff]   ;;  %v2560_v35 = vld [vmem:[%s3830_s25 + $0x100] ss:$16 sps:$4 sm:$0xff]   ;;  %v2561_v36 = vld [vmem:[%s3830_s25 + $0x108] ss:$16 sps:$4 sm:$0xff]  }
 0x115   : > { %v2562_v37 = vld [vmem:[%s3830_s25 + $0x124] ss:$16 sps:$4 sm:$0xff]   ;;  %v2564_v38 = vld [vmem:[%s3830_s25 + $0x12c] ss:$16 sps:$4 sm:$0xff]   ;;  %v2566_v39 = vld [vmem:[%s3830_s25 + $0x120] ss:$16 sps:$4 sm:$0xff]  }
 0x116   : > { %v2567_v40 = vld [vmem:[%s3830_s25 + $0x128] ss:$16 sps:$4 sm:$0xff]   ;;  %v2568_v41 = vld [vmem:[%s3830_s25 + $0x144] ss:$16 sps:$4 sm:$0xff]   ;;  %v2570_v42 = vld [vmem:[%s3830_s25 + $0x14c] ss:$16 sps:$4 sm:$0xff]  }
 0x117   : > { %1220 = vmatpush1.bf16.msra.mxu0 %v2530_v15  ;;  %1273 = vmatpush1.bf16.msra.mxu1 %v2531_v16  ;;  %v2572_v43 = vld [vmem:[%s3830_s25 + $0x140] ss:$16 sps:$4 sm:$0xff]   ;;  %v2573_v44 = vld [vmem:[%s3830_s25 + $0x148] ss:$16 sps:$4 sm:$0xff]   ;;  %v2574_v45 = vld [vmem:[%s3830_s25 + $0x164] ss:$16 sps:$4 sm:$0xff]  }
 0x118   : > { %1221 = vmatprep.subr.bf16.mxu0 %v2532_v17  ;;  %1274 = vmatprep.subr.bf16.mxu1 %v2534_v18  ;;  %v2576_v46 = vld [vmem:[%s3830_s25 + $0x16c] ss:$16 sps:$4 sm:$0xff]   ;;  %v2578_v47 = vld [vmem:[%s3830_s25 + $0x160] ss:$16 sps:$4 sm:$0xff]   ;;  %v2579_v48 = vld [vmem:[%s3830_s25 + $0x168] ss:$16 sps:$4 sm:$0xff]  }
 0x119   : > { %v2580_v49 = vld [vmem:[%s3830_s25 + $0x184] ss:$16 sps:$4 sm:$0xff]   ;;  %v2582_v50 = vld [vmem:[%s3830_s25 + $0x18c] ss:$16 sps:$4 sm:$0xff]   ;;  %v2584_v51 = vld [vmem:[%s3830_s25 + $0x180] ss:$16 sps:$4 sm:$0xff]  }
 0x11a   : > { %v2585_v52 = vld [vmem:[%s3830_s25 + $0x188] ss:$16 sps:$4 sm:$0xff]   ;;  %v2586_v53 = vld [vmem:[%s3830_s25 + $0x1a4] ss:$16 sps:$4 sm:$0xff]   ;;  %v2588_v54 = vld [vmem:[%s3830_s25 + $0x1ac] ss:$16 sps:$4 sm:$0xff]  }
 0x11b   : > { %1222 = vmatpush1.bf16.msra.mxu0 %v2536_v19  ;;  %1275 = vmatpush1.bf16.msra.mxu1 %v2537_v20  ;;  %v2590_v55 = vld [vmem:[%s3830_s25 + $0x1a0] ss:$16 sps:$4 sm:$0xff]   ;;  %v2591_v56 = vld [vmem:[%s3830_s25 + $0x1a8] ss:$16 sps:$4 sm:$0xff]   ;;  %v2592_v57 = vld [vmem:[%s3830_s25 + $0x1c4] ss:$16 sps:$4 sm:$0xff]  }
 0x11c   : > { %1223 = vmatprep.subr.bf16.mxu0 %v2538_v21  ;;  %1276 = vmatprep.subr.bf16.mxu1 %v2540_v22  ;;  %v2594_v58 = vld [vmem:[%s3830_s25 + $0x1cc] ss:$16 sps:$4 sm:$0xff]   ;;  %v2596_v59 = vld [vmem:[%s3830_s25 + $0x1c0] ss:$16 sps:$4 sm:$0xff]   ;;  %v2597_v60 = vld [vmem:[%s3830_s25 + $0x1c8] ss:$16 sps:$4 sm:$0xff]  }
 0x11d   : > { %v2598_v61 = vld [vmem:[%s3830_s25 + $0x1e4] ss:$16 sps:$4 sm:$0xff]   ;;  %v2600_v62 = vld [vmem:[%s3830_s25 + $0x1ec] ss:$16 sps:$4 sm:$0xff]   ;;  %v2602_v63 = vld [vmem:[%s3830_s25 + $0x1e0] ss:$16 sps:$4 sm:$0xff]  }
 0x11e   : > { %v2603_v0 = vld [vmem:[%s3830_s25 + $0x1e8] ss:$16 sps:$4 sm:$0xff]   ;;  %v2607_v2 = vld [vmem:[%s4407_s0 + $0x14] ss:$8 sps:$4 sm:$0xff]   ;;  %s3907_s9 = scalar_lea.vmem [#allocation3], %s2100_s21   ;;  %s2178_s22 = sshll.u32 (%p2940_p5), %s2925_s12, 2 }
 0x11f   : > { %1224 = vmatpush1.bf16.msra.mxu0 %v2542_v23  ;;  %1277 = vmatpush1.bf16.msra.mxu1 %v2543_v24  ;;  %v2604_v1 = vld [vmem:[%s4407_s0] ss:$8 sps:$4 sm:$0xff]   ;;  %v2609_v3 = vld [vmem:[%s4407_s0 + $0x10] ss:$8 sps:$4 sm:$0xff]   ;;  %s2219_s23 = sshll.u32 (%p2940_p5), %s2925_s12, 4  ;;  %s1415_s14 = ssub.s32 (%p2940_p5), 7, %s2178_s22 }
 0x120   : > { %1225 = vmatprep.subr.bf16.mxu0 %v2544_v25  ;;  %1278 = vmatprep.subr.bf16.mxu1 %v2546_v26  ;;  %s3924_s26 = scalar_lea.vmem (%p2940_p5), %s4409_s2, %s2219_s23   ;;  %p1416_p1 = scmp.lt.s32.totalorder (%p2940_p5), %s1415_s14, 4 }
 0x123   : > { %1226 = vmatpush1.bf16.msra.mxu0 %v2548_v27  ;;  %1279 = vmatpush1.bf16.msra.mxu1 %v2549_v28 }
 0x124   : > { %1227 = vmatprep.subr.bf16.mxu0 %v2550_v29  ;;  %1280 = vmatprep.subr.bf16.mxu1 %v2552_v30 }
 0x127   : > { %1228 = vmatpush1.bf16.msra.mxu0 %v2554_v31  ;;  %1281 = vmatpush1.bf16.msra.mxu1 %v2555_v32 }
 0x128   : > { %1229 = vmatprep.subr.bf16.mxu0 %v2556_v33  ;;  %1282 = vmatprep.subr.bf16.mxu1 %v2558_v34 }
 0x12b   : > { %1230 = vmatpush1.bf16.msra.mxu0 %v2560_v35  ;;  %1283 = vmatpush1.bf16.msra.mxu1 %v2561_v36 }
 0x12c   : > { %1231 = vmatprep.subr.bf16.mxu0 %v2562_v37  ;;  %1284 = vmatprep.subr.bf16.mxu1 %v2564_v38 }
 0x12f   : > { %1232 = vmatpush1.bf16.msra.mxu0 %v2566_v39  ;;  %1285 = vmatpush1.bf16.msra.mxu1 %v2567_v40 }
 0x130   : > { %1233 = vmatprep.subr.bf16.mxu0 %v2568_v41  ;;  %1286 = vmatprep.subr.bf16.mxu1 %v2570_v42 }
 0x133   : > { %1234 = vmatpush1.bf16.msra.mxu0 %v2572_v43  ;;  %1287 = vmatpush1.bf16.msra.mxu1 %v2573_v44 }
 0x134   : > { %1235 = vmatprep.subr.bf16.mxu0 %v2574_v45  ;;  %1288 = vmatprep.subr.bf16.mxu1 %v2576_v46 }
 0x137   : > { %1236 = vmatpush1.bf16.msra.mxu0 %v2578_v47  ;;  %1289 = vmatpush1.bf16.msra.mxu1 %v2579_v48 }
 0x138   : > { %1237 = vmatprep.subr.bf16.mxu0 %v2580_v49  ;;  %1290 = vmatprep.subr.bf16.mxu1 %v2582_v50 }
 0x13b   : > { %1238 = vmatpush1.bf16.msra.mxu0 %v2584_v51  ;;  %1291 = vmatpush1.bf16.msra.mxu1 %v2585_v52 }
 0x13c   : > { %1239 = vmatprep.subr.bf16.mxu0 %v2586_v53  ;;  %1292 = vmatprep.subr.bf16.mxu1 %v2588_v54 }
 0x13f   : > { %1240 = vmatpush1.bf16.msra.mxu0 %v2590_v55  ;;  %1293 = vmatpush1.bf16.msra.mxu1 %v2591_v56 }
 0x140   : > { %1241 = vmatprep.subr.bf16.mxu0 %v2592_v57  ;;  %1294 = vmatprep.subr.bf16.mxu1 %v2594_v58 }
 0x143   : > { %1242 = vmatpush1.bf16.msra.mxu0 %v2596_v59  ;;  %1295 = vmatpush1.bf16.msra.mxu1 %v2597_v60 }
 0x144   : > { %1243 = vmatprep.subr.bf16.mxu0 %v2598_v61  ;;  %1296 = vmatprep.subr.bf16.mxu1 %v2600_v62 }
 0x147   : > { %1244 = vmatpush1.bf16.msra.mxu0 %v2602_v63  ;;  %1297 = vmatpush1.bf16.msra.mxu1 %v2603_v0 }
 0x14a   : > { %1246 = vmatmul.mubr.bf16.vlgmr.msra.gmra.mrb[0].mxu0 %v2604_v1  ;;  %1299 = vmatmul.mubr.bf16.vlgmr.msra.gmra.mrb[0].mxu1 %v2604_v1 }
 0x14b   : > { %1255 = vmatprep.mubr.bf16.mxu0 %v2607_v2  ;;  %1308 = vmatprep.mubr.bf16.mxu1 %v2607_v2 }
 0x152   : > { %1256 = vmatmul.mubr.bf16.gmra.mrb[4].mxu0 %v2609_v3  ;;  %1309 = vmatmul.mubr.bf16.gmra.mrb[4].mxu1 %v2609_v3 }
 0x21d   : > { %v1247_v4 = vpop.f32.mrb[0].mxu0  ;;  %v1300_v5 = vpop.f32.mrb[0].mxu1 }
 0x21e   : > { %v1319_v6 = vmul.f32 0.003921569, %v1247_v4  ;;  %v1321_v7 = vmul.f32 0.003921569, %v1300_v5  ;;  %v1249_v8 = vpop.f32.mrb[1].mxu0  ;;  %v1302_v9 = vpop.f32.mrb[1].mxu1 }
 0x21f   : > { %v1320_v10 = vmul.f32 0.003921569, %v1249_v8  ;;  %v1322_v11 = vmul.f32 0.003921569, %v1302_v9  ;;  %v1251_v12 = vpop.f32.mrb[2].mxu0  ;;  %v1304_v13 = vpop.f32.mrb[2].mxu1 }
 0x220   : > { %v1335_v14 = vmax.f32 %v1319_v6, 0.0  ;;  %v1337_v15 = vmax.f32 %v1321_v7, 0.0  ;;  %v1323_v16 = vmul.f32 0.003921569, %v1251_v12  ;;  %v1325_v17 = vmul.f32 0.003921569, %v1304_v13 }
 0x221   : > { %v1336_v18 = vmax.f32 %v1320_v10, 0.0  ;;  %v1338_v19 = vmax.f32 %v1322_v11, 0.0  ;;  %v1253_v20 = vpop.f32.mrb[3].mxu0  ;;  %v1306_v21 = vpop.f32.mrb[3].mxu1 }
 0x222   : > { %v1339_v22 = vmax.f32 %v1323_v16, 0.0  ;;  %v1341_v23 = vmax.f32 %v1325_v17, 0.0  ;;  %v1324_v24 = vmul.f32 0.003921569, %v1253_v20  ;;  %v1326_v25 = vmul.f32 0.003921569, %v1306_v21 }
 0x223   : > { %v2211_v26 = vpack.c.bf16 %v1336_v18, %v1335_v14  ;;  %v2212_v27 = vpack.c.bf16 %v1338_v19, %v1337_v15 }
 0x224   : > { %v1340_v28 = vmax.f32 %v1324_v24, 0.0  ;;  %v1342_v29 = vmax.f32 %v1326_v25, 0.0 }
 0x225   : > { %1399 = vst [vmem:[%s3907_s9] sm:$0xff] %v2211_v26  ;;  %1400 = vst [vmem:[%s3907_s9 + $0x8] sm:$0xff] %v2212_v27  ;;  %v1257_v30 = vpop.f32.mrb[4].mxu0  ;;  %v1310_v31 = vpop.f32.mrb[4].mxu1 }
 0x226   : > { %v2213_v32 = vpack.c.bf16 %v1340_v28, %v1339_v22  ;;  %v2214_v33 = vpack.c.bf16 %v1342_v29, %v1341_v23  ;;  %v1327_v34 = vmul.f32 0.003921569, %v1257_v30  ;;  %v1329_v35 = vmul.f32 0.003921569, %v1310_v31  ;;  %v1259_v36 = vpop.f32.mrb[5].mxu0  ;;  %v1312_v37 = vpop.f32.mrb[5].mxu1 }
 0x227   : > { %v1328_v38 = vmul.f32 0.003921569, %v1259_v36  ;;  %v1330_v39 = vmul.f32 0.003921569, %v1312_v37  ;;  %v1261_v40 = vpop.f32.mrb[6].mxu0  ;;  %v1314_v41 = vpop.f32.mrb[6].mxu1 }
 0x228   : > { %1401 = vst [vmem:[%s3907_s9 + $0x10] sm:$0xff] %v2213_v32  ;;  %1402 = vst [vmem:[%s3907_s9 + $0x18] sm:$0xff] %v2214_v33  ;;  %v1343_v42 = vmax.f32 %v1327_v34, 0.0  ;;  %v1345_v43 = vmax.f32 %v1329_v35, 0.0  ;;  %v1331_v44 = vmul.f32 0.003921569, %v1261_v40 }
 0x229   : > { %v1333_v45 = vmul.f32 0.003921569, %v1314_v41  ;;  %v1344_v46 = vmax.f32 %v1328_v38, 0.0  ;;  %v1346_v47 = vmax.f32 %v1330_v39, 0.0  ;;  %v1263_v48 = vpop.f32.mrb[7].mxu0  ;;  %v1316_v49 = vpop.f32.mrb[7].mxu1 }
 0x22a   : > { %v1347_v50 = vmax.f32 %v1331_v44, 0.0  ;;  %v1332_v52 = vmul.f32 0.003921569, %v1263_v48  ;;  %v1334_v53 = vmul.f32 0.003921569, %v1316_v49  ;;  %1413 = sbr.rel (!%p2940_p5) target bundleno = 728 (0x2d8), region = 98 }
 0x22b   : > { %v1349_v51 = vmax.f32 %v1333_v45, 0.0  ;;  %v2215_v54 = vpack.c.bf16 %v1344_v46, %v1343_v42  ;;  %v2216_v55 = vpack.c.bf16 %v1346_v47, %v1345_v43 }
 0x22c   : > { %v1348_v56 = vmax.f32 %v1332_v52, 0.0  ;;  %v1350_v57 = vmax.f32 %v1334_v53, 0.0 }
 0x22d   : > { %1403 = vst [vmem:[%s3907_s9 + $0x20] sm:$0xff] %v2215_v54  ;;  %1404 = vst [vmem:[%s3907_s9 + $0x28] sm:$0xff] %v2216_v55 }
 0x22e   : > { %v2217_v58 = vpack.c.bf16 %v1348_v56, %v1347_v50  ;;  %v2218_v59 = vpack.c.bf16 %v1350_v57, %v1349_v51 }
 0x230   : > { %1405 = vst [vmem:[%s3907_s9 + $0x30] sm:$0xff] %v2217_v58  ;;  %1406 = vst [vmem:[%s3907_s9 + $0x38] sm:$0xff] %v2218_v59 }
 0x231   : > { %s4459_s14 = smov (!%p1416_p1, %s1415_s14), 4 }
 0x232   : > { %s2179_s4 = sshll.u32 %s4459_s14, 8  ;;  %s3926_s5 = sshll.u32 %s4459_s14, 2 }
 0x233   : > { %p2183_p2 = scmp.eq.s32.totalorder %s2179_s4, 0 }
 0x234   : > { %p1426_p3 = scmp.lt.u32.totalorder (!%p2183_p2), %s3926_s5, 8 }
 0x235   : > { %1425 = sbr.rel (%p2183_p2) target bundleno = 728 (0x2d8), region = 102 }
 0x23c   : > { %1429 = sbr.rel (%p1426_p3) target bundleno = 719 (0x2cf), region = 106  ;;  %s3930_s17 = sand.u32 (!%p1426_p3), 7, %s3926_s5  }
 0x23d   : > { %p1451_p5 = scmp.eq.s32.totalorder (!%p1426_p3), %s3930_s17, 0  ;;  %p2184_p4 = scmp.ne.s32.totalorder (!%p1426_p3), %s3930_s17, 0 }
 0x243   : > { %1454 = sbr.rel (%p2184_p4) target bundleno = 646 (0x286), region = 121  ;;  %s1455_s12 = sshrl.u32 (!%p2184_p4), %s3926_s5, 3 }
 0x244   : > { %s3937_s29 = sshrl.u32 (!%p2184_p4), %s1455_s12, 4 }
 0x245   : > { %p2185_p6 = scmp.le.s32.totalorder (!%p2184_p4), %s3937_s29, 0 }
 0x24a   : > { %1996 = sbr.rel (%p2185_p6) target bundleno = 626 (0x272), region = 269  ;;  %s4431_s15 = smov (!%p2185_p6), %s3924_s26 }
 0x24b   : > { %s4432_s27 = smov (!%p2185_p6), %s3907_s9  ;;  %s3946_s18 = smov (!%p2185_p6), 0  }
 0x24c   : > { %s3948_s30 = smov (!%p2185_p6), 0  }
 0x251 LB: >> { %v3963_v60 = vld [vmem:[%s2832_s27 + $0x48] sm:$0xff]  ;;  %v3966_v61 = vld [vmem:[%s2832_s27 + $0x50] sm:$0xff]  ;;  %v3969_v62 = vld [vmem:[%s2832_s27 + $0x58] sm:$0xff]  ;;  %s1596_s3 = sadd.s32 1, %s2836_s18  ;;  %s1462_s30 = sadd.s32 1, %s2840_s30   ;;  %s2840_s30 = sphi %s3948_s30, %s1462_s30   ;;  %s2836_s18 = sphi %s3946_s18, %s4434_s18   ;;  %s2832_s27 = sphi %s4432_s27, %s1601_s27   ;;  %s2828_s15 = sphi %s4431_s15, %s1602_s15  }
 0x252   : >> { %1487 = vst [vmem:[%s2828_s15 + $0x48] sm:$0xff] %v3963_v60  ;;  %1489 = vst [vmem:[%s2828_s15 + $0x50] sm:$0xff] %v3966_v61  ;;  %v3978_v63 = vld [vmem:[%s2832_s27 + $0x60] sm:$0xff]  ;;  %v3981_v0 = vld [vmem:[%s2832_s27 + $0x68] sm:$0xff]  ;;  %p4018_p7 = scmp.ge.s32.totalorder %s1596_s3, %s3937_s29  ;;  %p1461_p8 = scmp.ge.s32.totalorder %s1462_s30, %s3937_s29 }
 0x253   : >> { %1491 = vst [vmem:[%s2828_s15 + $0x58] sm:$0xff] %v3969_v62  ;;  %v3984_v1 = vld [vmem:[%s2832_s27 + $0x70] sm:$0xff]  ;;  %1493 = vst [vmem:[%s2828_s15 + $0x60] sm:$0xff] %v3978_v63  ;;  %v3993_v2 = vld [vmem:[%s2832_s27 + $0x78] sm:$0xff] }
 0x254   : >> { %1495 = vst [vmem:[%s2828_s15 + $0x68] sm:$0xff] %v3981_v0  ;;  %1497 = vst [vmem:[%s2828_s15 + $0x70] sm:$0xff] %v3984_v1  ;;  %v1480_v3 = vld [vmem:[%s2832_s27 + $0x30] sm:$0xff]  ;;  %v1482_v4 = vld [vmem:[%s2832_s27 + $0x38] sm:$0xff]  ;;  %s4461_s3 = smov (%p4018_p7, %s1596_s3), 0 }
 0x255   : >> { %1515 = vst [vmem:[%s2828_s15 + $0x54] sm:$0xff] %v3963_v60  ;;  %1499 = vst [vmem:[%s2828_s15 + $0x78] sm:$0xff] %v3993_v2  ;;  %v1484_v5 = vld [vmem:[%s2832_s27 + $0x40] sm:$0xff]  ;;  %v1530_v7 = vld [vmem:[%s2832_s27 + $0x88] sm:$0xff]  ;;  %s2186_s11 = sshll.u32 %s4461_s3, 7  ;;  %s4434_s18 = smov %s4461_s3 }
 0x256   : >> { %1481 = vst [vmem:[%s2828_s15 + $0x30] sm:$0xff] %v1480_v3  ;;  %1483 = vst [vmem:[%s2828_s15 + $0x38] sm:$0xff] %v1482_v4  ;;  %v1528_v6 = vld [vmem:[%s2832_s27 + $0x80] sm:$0xff]  ;;  %v1474_v8 = vld [vmem:[%s2832_s27 + $0x18] sm:$0xff] }
 0x257   : >> { %1517 = vst [vmem:[%s2828_s15 + $0x5c] sm:$0xff] %v3966_v61  ;;  %1519 = vst [vmem:[%s2828_s15 + $0x64] sm:$0xff] %v3969_v62  ;;  %v1476_v9 = vld [vmem:[%s2832_s27 + $0x20] sm:$0xff]  ;;  %v1478_v10 = vld [vmem:[%s2832_s27 + $0x28] sm:$0xff] }
 0x258   : >> { %1521 = vst [vmem:[%s2828_s15 + $0x6c] sm:$0xff] %v3978_v63  ;;  %1527 = vst [vmem:[%s2828_s15 + $0x84] sm:$0xff] %v3993_v2  ;;  %v1560_v11 = vld [vmem:[%s2832_s27 + $0x90] sm:$0xff]  ;;  %v1562_v12 = vld [vmem:[%s2832_s27 + $0x98] sm:$0xff] }
 0x259   : >> { %1485 = vst [vmem:[%s2828_s15 + $0x40] sm:$0xff] %v1484_v5  ;;  %1513 = vst [vmem:[%s2828_s15 + $0x4c] sm:$0xff] %v1484_v5  ;;  %v1468_v13 = vld [vmem:[%s2832_s27] sm:$0xff]  ;;  %v1470_v14 = vld [vmem:[%s2832_s27 + $0x8] sm:$0xff] }
 0x25a   : >> { %1523 = vst [vmem:[%s2828_s15 + $0x74] sm:$0xff] %v3981_v0  ;;  %1525 = vst [vmem:[%s2828_s15 + $0x7c] sm:$0xff] %v3984_v1  ;;  %v1472_v15 = vld [vmem:[%s2832_s27 + $0x10] sm:$0xff]  ;;  %v1592_v16 = vld [vmem:[%s2832_s27 + $0xa0] sm:$0xff] }
 0x25b   : >> { %1529 = vst [vmem:[%s2828_s15 + $0x8c] sm:$0xff] %v1528_v6  ;;  %1531 = vst [vmem:[%s2828_s15 + $0x94] sm:$0xff] %v1530_v7  ;;  %v1594_v17 = vld [vmem:[%s2832_s27 + $0xa8] sm:$0xff]  ;;  %s1601_s27 = scalar_lea.vmem %s3907_s9, %s2186_s11 [#allocation3]  }
 0x25c   : >> { %1541 = vst [vmem:[%s2828_s15 + $0x58] sm:$0xff] %v1484_v5  ;;  %1543 = vst [vmem:[%s2828_s15 + $0x60] sm:$0xff] %v3963_v60 }
 0x25d   : >> { %1545 = vst [vmem:[%s2828_s15 + $0x68] sm:$0xff] %v3966_v61  ;;  %1559 = vst [vmem:[%s2828_s15 + $0xa0] sm:$0xff] %v1530_v7 }
 0x25e   : >> { %1475 = vst [vmem:[%s2828_s15 + $0x18] sm:$0xff] %v1474_v8  ;;  %1477 = vst [vmem:[%s2828_s15 + $0x20] sm:$0xff] %v1476_v9 }
 0x25f   : >> { %1479 = vst [vmem:[%s2828_s15 + $0x28] sm:$0xff] %v1478_v10  ;;  %1507 = vst [vmem:[%s2828_s15 + $0x34] sm:$0xff] %v1478_v10 }
 0x260   : >> { %1509 = vst [vmem:[%s2828_s15 + $0x3c] sm:$0xff] %v1480_v3  ;;  %1511 = vst [vmem:[%s2828_s15 + $0x44] sm:$0xff] %v1482_v4 }
 0x261   : >> { %1539 = vst [vmem:[%s2828_s15 + $0x50] sm:$0xff] %v1482_v4  ;;  %1547 = vst [vmem:[%s2828_s15 + $0x70] sm:$0xff] %v3969_v62 }
 0x262   : >> { %1549 = vst [vmem:[%s2828_s15 + $0x78] sm:$0xff] %v3978_v63  ;;  %1551 = vst [vmem:[%s2828_s15 + $0x80] sm:$0xff] %v3981_v0 }
 0x263   : >> { %1553 = vst [vmem:[%s2828_s15 + $0x88] sm:$0xff] %v3984_v1  ;;  %1555 = vst [vmem:[%s2828_s15 + $0x90] sm:$0xff] %v3993_v2 }
 0x264   : >> { %1557 = vst [vmem:[%s2828_s15 + $0x98] sm:$0xff] %v1528_v6  ;;  %1567 = vst [vmem:[%s2828_s15 + $0x5c] sm:$0xff] %v1482_v4 }
 0x265   : >> { %1569 = vst [vmem:[%s2828_s15 + $0x64] sm:$0xff] %v1484_v5  ;;  %1561 = vst [vmem:[%s2828_s15 + $0xa8] sm:$0xff] %v1560_v11 }
 0x266   : >> { %1563 = vst [vmem:[%s2828_s15 + $0xb0] sm:$0xff] %v1562_v12  ;;  %1469 = vst [vmem:[%s2828_s15] sm:$0xff] %v1468_v13 }
 0x267   : >> { %1503 = vst [vmem:[%s2828_s15 + $0x24] sm:$0xff] %v1474_v8  ;;  %1505 = vst [vmem:[%s2828_s15 + $0x2c] sm:$0xff] %v1476_v9 }
 0x268   : >> { %1533 = vst [vmem:[%s2828_s15 + $0x38] sm:$0xff] %v1476_v9  ;;  %1535 = vst [vmem:[%s2828_s15 + $0x40] sm:$0xff] %v1478_v10 }
 0x269   : >> { %1537 = vst [vmem:[%s2828_s15 + $0x48] sm:$0xff] %v1480_v3  ;;  %1565 = vst [vmem:[%s2828_s15 + $0x54] sm:$0xff] %v1480_v3 }
 0x26a   : >> { %1571 = vst [vmem:[%s2828_s15 + $0x6c] sm:$0xff] %v3963_v60  ;;  %1573 = vst [vmem:[%s2828_s15 + $0x74] sm:$0xff] %v3966_v61 }
 0x26b   : >> { %1575 = vst [vmem:[%s2828_s15 + $0x7c] sm:$0xff] %v3969_v62  ;;  %1577 = vst [vmem:[%s2828_s15 + $0x84] sm:$0xff] %v3978_v63  ;;  %1464 = sbr.rel (!%p1461_p8) target bundleno = 593 (0x251), region = 275 }
 0x26c   : >> { %1579 = vst [vmem:[%s2828_s15 + $0x8c] sm:$0xff] %v3981_v0  ;;  %1581 = vst [vmem:[%s2828_s15 + $0x94] sm:$0xff] %v3984_v1 }
 0x26d   : >> { %1583 = vst [vmem:[%s2828_s15 + $0x9c] sm:$0xff] %v3993_v2  ;;  %1591 = vst [vmem:[%s2828_s15 + $0xbc] sm:$0xff] %v1562_v12 }
 0x26e   : >> { %1471 = vst [vmem:[%s2828_s15 + $0x8] sm:$0xff] %v1470_v14  ;;  %1473 = vst [vmem:[%s2828_s15 + $0x10] sm:$0xff] %v1472_v15 }
 0x26f   : >> { %1501 = vst [vmem:[%s2828_s15 + $0x1c] sm:$0xff] %v1472_v15  ;;  %1585 = vst [vmem:[%s2828_s15 + $0xa4] sm:$0xff] %v1528_v6 }
 0x270   : >> { %1587 = vst [vmem:[%s2828_s15 + $0xac] sm:$0xff] %v1530_v7  ;;  %1589 = vst [vmem:[%s2828_s15 + $0xb4] sm:$0xff] %v1560_v11 }
 0x271   : >> { %1593 = vst [vmem:[%s2828_s15 + $0xc4] sm:$0xff] %v1592_v16  ;;  %1595 = vst [vmem:[%s2828_s15 + $0xcc] sm:$0xff] %v1594_v17  ;;  %s1602_s15 = scalar_lea.vmem %s3924_s26, %s2186_s11  }
 0x272 PF: > { %s4120_s28 = sand.u32 15, %s1455_s12   ;;  %s2220_s6 = sshll.u32 %s3937_s29, 11 }
 0x273   : > { %s1607_s7 = sshra.s32 %s2220_s6, 4  ;;  %p2191_p9 = scmp.le.s32.totalorder %s4120_s28, 0 }
 0x274   : > { %s4124_s8 = scalar_lea.vmem %s3907_s9, %s1607_s7 [#allocation3]   ;;  %s4127_s19 = scalar_lea.vmem %s3924_s26, %s1607_s7  }
 0x275   : > { %2010 = sbr.rel (%p2191_p9) target bundleno = 646 (0x286), region = 280  ;;  %s4435_s21 = smov (!%p2191_p9), %s4127_s19 }
 0x276   : > { %s4436_s22 = smov (!%p2191_p9), %s4124_s8  ;;  %s4136_s23 = smov (!%p2191_p9), 0  }
 0x277   : > { %s2854_s14 = smov (!%p2191_p9), 0  }
 0x27c LB: >> { %v1623_v18 = vld [vmem:[%s2848_s22] sm:$0xff]  ;;  %v1625_v19 = vld [vmem:[%s2848_s22 + $0x10] sm:$0xff]  ;;  %s1631_s20 = sadd.s32 1, %s2852_s23  ;;  %s1617_s14 = sadd.s32 1, %s2856_s14   ;;  %s2856_s14 = sphi %s2854_s14, %s1617_s14   ;;  %s2852_s23 = sphi %s4136_s23, %s4437_s23   ;;  %s2848_s22 = sphi %s4436_s22, %s1636_s22   ;;  %s2844_s21 = sphi %s4435_s21, %s1637_s21  }
 0x27d   : >> { %v1627_v20 = vld [vmem:[%s2848_s22 + $0x20] sm:$0xff]  ;;  %1624 = vst [vmem:[%s2844_s21] sm:$0xff] %v1623_v18  ;;  %1626 = vst [vmem:[%s2844_s21 + $0x1c] sm:$0xff] %v1625_v19  ;;  %v1629_v21 = vld [vmem:[%s2848_s22 + $0x30] sm:$0xff]  ;;  %p1632_p10 = scmp.ge.s32.totalorder %s1631_s20, %s4120_s28  ;;  %p1616_p11 = scmp.ge.s32.totalorder %s1617_s14, %s4120_s28 }
 0x27e   : >> { %1628 = vst [vmem:[%s2844_s21 + $0x38] sm:$0xff] %v1627_v20  ;;  %1630 = vst [vmem:[%s2844_s21 + $0x54] sm:$0xff] %v1629_v21 }
 0x27f   : >> { %s4463_s20 = smov (%p1632_p10, %s1631_s20), 0  ;;  %1619 = sbr.rel (!%p1616_p11) target bundleno = 636 (0x27c), region = 286 }
 0x280   : >> { %s2192_s24 = sshll.u32 %s4463_s20, 3  ;;  %s4437_s23 = smov %s4463_s20 }
 0x281   : >> { %s1636_s22 = scalar_lea.vmem %s4124_s8, %s2192_s24 [#allocation3]   ;;  %s1637_s21 = scalar_lea.vmem %s4127_s19, %s2192_s24  }
 0x286 PF: > { %1640 = sbr.rel (%p1451_p5) target bundleno = 719 (0x2cf), region = 139  ;;  %s1642_s4 = ssub.s32 (!%p1451_p5), %s3926_s5, %s3930_s17 }
 0x287   : > { %s1646_s12 = sshrl.u32 (!%p1451_p5), %s3926_s5, 3  ;;  %s4157_s29 = scalar_lea.vmem (!%p1451_p5), %s3907_s9, %s1642_s4 [#allocation3] }
 0x288   : > { %s4160_s15 = scalar_lea.vmem (!%p1451_p5), %s3924_s26, %s1642_s4  ;;  %s4164_s27 = sshrl.u32 (!%p1451_p5), %s1646_s12, 4 }
 0x289   : > { %p2194_p12 = scmp.le.s32.totalorder (!%p1451_p5), %s4164_s27, 0 }
 0x28d   : > { %2024 = sbr.rel (%p2194_p12) target bundleno = 693 (0x2b5), region = 291  ;;  %s4438_s18 = smov (!%p2194_p12), %s3924_s26 }
 0x28e   : > { %s4439_s30 = smov (!%p2194_p12), %s3907_s9  ;;  %s4173_s3 = smov (!%p2194_p12), 0  }
 0x28f   : > { %s4175_s25 = smov (!%p2194_p12), 0  }
 0x294 LB: >> { %v4190_v22 = vld [vmem:[%s2864_s30 + $0x48] sm:$0xff]  ;;  %v4193_v23 = vld [vmem:[%s2864_s30 + $0x50] sm:$0xff]  ;;  %v4196_v24 = vld [vmem:[%s2864_s30 + $0x58] sm:$0xff]  ;;  %s1787_s11 = sadd.s32 1, %s2868_s3  ;;  %s1653_s25 = sadd.s32 1, %s2872_s25   ;;  %s2872_s25 = sphi %s4175_s25, %s1653_s25   ;;  %s2868_s3 = sphi %s4173_s3, %s4441_s3   ;;  %s2864_s30 = sphi %s4439_s30, %s1792_s30   ;;  %s2860_s18 = sphi %s4438_s18, %s1793_s18  }
 0x295   : >> { %1678 = vst [vmem:[%s2860_s18 + $0x48] sm:$0xff] %v4190_v22  ;;  %1680 = vst [vmem:[%s2860_s18 + $0x50] sm:$0xff] %v4193_v23  ;;  %v4205_v25 = vld [vmem:[%s2864_s30 + $0x60] sm:$0xff]  ;;  %v4208_v26 = vld [vmem:[%s2864_s30 + $0x68] sm:$0xff]  ;;  %p4245_p13 = scmp.ge.s32.totalorder %s1787_s11, %s4164_s27  ;;  %p1652_p0 = scmp.ge.s32.totalorder %s1653_s25, %s4164_s27 }
 0x296   : >> { %1682 = vst [vmem:[%s2860_s18 + $0x58] sm:$0xff] %v4196_v24  ;;  %v4211_v27 = vld [vmem:[%s2864_s30 + $0x70] sm:$0xff]  ;;  %1684 = vst [vmem:[%s2860_s18 + $0x60] sm:$0xff] %v4205_v25  ;;  %v4220_v28 = vld [vmem:[%s2864_s30 + $0x78] sm:$0xff] }
 0x297   : >> { %1686 = vst [vmem:[%s2860_s18 + $0x68] sm:$0xff] %v4208_v26  ;;  %1688 = vst [vmem:[%s2860_s18 + $0x70] sm:$0xff] %v4211_v27  ;;  %v1671_v29 = vld [vmem:[%s2864_s30 + $0x30] sm:$0xff]  ;;  %v1673_v30 = vld [vmem:[%s2864_s30 + $0x38] sm:$0xff]  ;;  %s4465_s11 = smov (%p4245_p13, %s1787_s11), 0 }
 0x298   : >> { %1706 = vst [vmem:[%s2860_s18 + $0x54] sm:$0xff] %v4190_v22  ;;  %1690 = vst [vmem:[%s2860_s18 + $0x78] sm:$0xff] %v4220_v28  ;;  %v1675_v31 = vld [vmem:[%s2864_s30 + $0x40] sm:$0xff]  ;;  %v1721_v33 = vld [vmem:[%s2864_s30 + $0x88] sm:$0xff]  ;;  %s2195_s6 = sshll.u32 %s4465_s11, 7  ;;  %s4441_s3 = smov %s4465_s11 }
 0x299   : >> { %1672 = vst [vmem:[%s2860_s18 + $0x30] sm:$0xff] %v1671_v29  ;;  %1674 = vst [vmem:[%s2860_s18 + $0x38] sm:$0xff] %v1673_v30  ;;  %v1719_v32 = vld [vmem:[%s2864_s30 + $0x80] sm:$0xff]  ;;  %v1665_v34 = vld [vmem:[%s2864_s30 + $0x18] sm:$0xff] }
 0x29a   : >> { %1708 = vst [vmem:[%s2860_s18 + $0x5c] sm:$0xff] %v4193_v23  ;;  %1710 = vst [vmem:[%s2860_s18 + $0x64] sm:$0xff] %v4196_v24  ;;  %v1667_v35 = vld [vmem:[%s2864_s30 + $0x20] sm:$0xff]  ;;  %v1669_v36 = vld [vmem:[%s2864_s30 + $0x28] sm:$0xff] }
 0x29b   : >> { %1712 = vst [vmem:[%s2860_s18 + $0x6c] sm:$0xff] %v4205_v25  ;;  %1718 = vst [vmem:[%s2860_s18 + $0x84] sm:$0xff] %v4220_v28  ;;  %v1751_v37 = vld [vmem:[%s2864_s30 + $0x90] sm:$0xff]  ;;  %v1753_v38 = vld [vmem:[%s2864_s30 + $0x98] sm:$0xff] }
 0x29c   : >> { %1676 = vst [vmem:[%s2860_s18 + $0x40] sm:$0xff] %v1675_v31  ;;  %1704 = vst [vmem:[%s2860_s18 + $0x4c] sm:$0xff] %v1675_v31  ;;  %v1659_v39 = vld [vmem:[%s2864_s30] sm:$0xff]  ;;  %v1661_v40 = vld [vmem:[%s2864_s30 + $0x8] sm:$0xff] }
 0x29d   : >> { %1714 = vst [vmem:[%s2860_s18 + $0x74] sm:$0xff] %v4208_v26  ;;  %1716 = vst [vmem:[%s2860_s18 + $0x7c] sm:$0xff] %v4211_v27  ;;  %v1663_v41 = vld [vmem:[%s2864_s30 + $0x10] sm:$0xff]  ;;  %v1783_v42 = vld [vmem:[%s2864_s30 + $0xa0] sm:$0xff] }
 0x29e   : >> { %1720 = vst [vmem:[%s2860_s18 + $0x8c] sm:$0xff] %v1719_v32  ;;  %1722 = vst [vmem:[%s2860_s18 + $0x94] sm:$0xff] %v1721_v33  ;;  %v1785_v43 = vld [vmem:[%s2864_s30 + $0xa8] sm:$0xff]  ;;  %s1792_s30 = scalar_lea.vmem %s3907_s9, %s2195_s6 [#allocation3]  }
 0x29f   : >> { %1732 = vst [vmem:[%s2860_s18 + $0x58] sm:$0xff] %v1675_v31  ;;  %1734 = vst [vmem:[%s2860_s18 + $0x60] sm:$0xff] %v4190_v22 }
 0x2a0   : >> { %1736 = vst [vmem:[%s2860_s18 + $0x68] sm:$0xff] %v4193_v23  ;;  %1750 = vst [vmem:[%s2860_s18 + $0xa0] sm:$0xff] %v1721_v33 }
 0x2a1   : >> { %1666 = vst [vmem:[%s2860_s18 + $0x18] sm:$0xff] %v1665_v34  ;;  %1668 = vst [vmem:[%s2860_s18 + $0x20] sm:$0xff] %v1667_v35 }
 0x2a2   : >> { %1670 = vst [vmem:[%s2860_s18 + $0x28] sm:$0xff] %v1669_v36  ;;  %1698 = vst [vmem:[%s2860_s18 + $0x34] sm:$0xff] %v1669_v36 }
 0x2a3   : >> { %1700 = vst [vmem:[%s2860_s18 + $0x3c] sm:$0xff] %v1671_v29  ;;  %1702 = vst [vmem:[%s2860_s18 + $0x44] sm:$0xff] %v1673_v30 }
 0x2a4   : >> { %1730 = vst [vmem:[%s2860_s18 + $0x50] sm:$0xff] %v1673_v30  ;;  %1738 = vst [vmem:[%s2860_s18 + $0x70] sm:$0xff] %v4196_v24 }
 0x2a5   : >> { %1740 = vst [vmem:[%s2860_s18 + $0x78] sm:$0xff] %v4205_v25  ;;  %1742 = vst [vmem:[%s2860_s18 + $0x80] sm:$0xff] %v4208_v26 }
 0x2a6   : >> { %1744 = vst [vmem:[%s2860_s18 + $0x88] sm:$0xff] %v4211_v27  ;;  %1746 = vst [vmem:[%s2860_s18 + $0x90] sm:$0xff] %v4220_v28 }
 0x2a7   : >> { %1748 = vst [vmem:[%s2860_s18 + $0x98] sm:$0xff] %v1719_v32  ;;  %1758 = vst [vmem:[%s2860_s18 + $0x5c] sm:$0xff] %v1673_v30 }
 0x2a8   : >> { %1760 = vst [vmem:[%s2860_s18 + $0x64] sm:$0xff] %v1675_v31  ;;  %1752 = vst [vmem:[%s2860_s18 + $0xa8] sm:$0xff] %v1751_v37 }
 0x2a9   : >> { %1754 = vst [vmem:[%s2860_s18 + $0xb0] sm:$0xff] %v1753_v38  ;;  %1660 = vst [vmem:[%s2860_s18] sm:$0xff] %v1659_v39 }
 0x2aa   : >> { %1694 = vst [vmem:[%s2860_s18 + $0x24] sm:$0xff] %v1665_v34  ;;  %1696 = vst [vmem:[%s2860_s18 + $0x2c] sm:$0xff] %v1667_v35 }
 0x2ab   : >> { %1724 = vst [vmem:[%s2860_s18 + $0x38] sm:$0xff] %v1667_v35  ;;  %1726 = vst [vmem:[%s2860_s18 + $0x40] sm:$0xff] %v1669_v36 }
 0x2ac   : >> { %1728 = vst [vmem:[%s2860_s18 + $0x48] sm:$0xff] %v1671_v29  ;;  %1756 = vst [vmem:[%s2860_s18 + $0x54] sm:$0xff] %v1671_v29 }
 0x2ad   : >> { %1762 = vst [vmem:[%s2860_s18 + $0x6c] sm:$0xff] %v4190_v22  ;;  %1764 = vst [vmem:[%s2860_s18 + $0x74] sm:$0xff] %v4193_v23 }
 0x2ae   : >> { %1766 = vst [vmem:[%s2860_s18 + $0x7c] sm:$0xff] %v4196_v24  ;;  %1768 = vst [vmem:[%s2860_s18 + $0x84] sm:$0xff] %v4205_v25  ;;  %1655 = sbr.rel (!%p1652_p0) target bundleno = 660 (0x294), region = 297 }
 0x2af   : >> { %1770 = vst [vmem:[%s2860_s18 + $0x8c] sm:$0xff] %v4208_v26  ;;  %1772 = vst [vmem:[%s2860_s18 + $0x94] sm:$0xff] %v4211_v27 }
 0x2b0   : >> { %1774 = vst [vmem:[%s2860_s18 + $0x9c] sm:$0xff] %v4220_v28  ;;  %1782 = vst [vmem:[%s2860_s18 + $0xbc] sm:$0xff] %v1753_v38 }
 0x2b1   : >> { %1662 = vst [vmem:[%s2860_s18 + $0x8] sm:$0xff] %v1661_v40  ;;  %1664 = vst [vmem:[%s2860_s18 + $0x10] sm:$0xff] %v1663_v41 }
 0x2b2   : >> { %1692 = vst [vmem:[%s2860_s18 + $0x1c] sm:$0xff] %v1663_v41  ;;  %1776 = vst [vmem:[%s2860_s18 + $0xa4] sm:$0xff] %v1719_v32 }
 0x2b3   : >> { %1778 = vst [vmem:[%s2860_s18 + $0xac] sm:$0xff] %v1721_v33  ;;  %1780 = vst [vmem:[%s2860_s18 + $0xb4] sm:$0xff] %v1751_v37 }
 0x2b4   : >> { %1784 = vst [vmem:[%s2860_s18 + $0xc4] sm:$0xff] %v1783_v42  ;;  %1786 = vst [vmem:[%s2860_s18 + $0xcc] sm:$0xff] %v1785_v43  ;;  %s1793_s18 = scalar_lea.vmem %s3924_s26, %s2195_s6  }
 0x2b5 PF: > { %s4347_s7 = sand.u32 15, %s1646_s12   ;;  %s2222_s8 = sshll.u32 %s4164_s27, 11 }
 0x2b6   : > { %s1798_s19 = sshra.s32 %s2222_s8, 4  ;;  %p2200_p1 = scmp.le.s32.totalorder %s4347_s7, 0 }
 0x2b7   : > { %s4351_s21 = scalar_lea.vmem %s3907_s9, %s1798_s19 [#allocation3]   ;;  %s4354_s22 = scalar_lea.vmem %s3924_s26, %s1798_s19  }
 0x2b8   : > { %2038 = sbr.rel (%p2200_p1) target bundleno = 713 (0x2c9), region = 302  ;;  %s4442_s23 = smov (!%p2200_p1), %s4354_s22 }
 0x2b9   : > { %s4443_s14 = smov (!%p2200_p1), %s4351_s21  ;;  %s4363_s20 = smov (!%p2200_p1), 0  }
 0x2ba   : > { %s2886_s24 = smov (!%p2200_p1), 0  }
 0x2bf LB: >> { %v1814_v44 = vld [vmem:[%s2880_s14] sm:$0xff]  ;;  %v1816_v45 = vld [vmem:[%s2880_s14 + $0x10] sm:$0xff]  ;;  %s1822_s4 = sadd.s32 1, %s2884_s20  ;;  %s1808_s24 = sadd.s32 1, %s2888_s24   ;;  %s2888_s24 = sphi %s2886_s24, %s1808_s24   ;;  %s2884_s20 = sphi %s4363_s20, %s4444_s20   ;;  %s2880_s14 = sphi %s4443_s14, %s1827_s14   ;;  %s2876_s23 = sphi %s4442_s23, %s1828_s23  }
 0x2c0   : >> { %v1818_v46 = vld [vmem:[%s2880_s14 + $0x20] sm:$0xff]  ;;  %1815 = vst [vmem:[%s2876_s23] sm:$0xff] %v1814_v44  ;;  %1817 = vst [vmem:[%s2876_s23 + $0x1c] sm:$0xff] %v1816_v45  ;;  %v1820_v47 = vld [vmem:[%s2880_s14 + $0x30] sm:$0xff]  ;;  %p1823_p2 = scmp.ge.s32.totalorder %s1822_s4, %s4347_s7  ;;  %p1807_p3 = scmp.ge.s32.totalorder %s1808_s24, %s4347_s7 }
 0x2c1   : >> { %1819 = vst [vmem:[%s2876_s23 + $0x38] sm:$0xff] %v1818_v46  ;;  %1821 = vst [vmem:[%s2876_s23 + $0x54] sm:$0xff] %v1820_v47 }
 0x2c2   : >> { %s4467_s4 = smov (%p1823_p2, %s1822_s4), 0  ;;  %1810 = sbr.rel (!%p1807_p3) target bundleno = 703 (0x2bf), region = 308 }
 0x2c3   : >> { %s2201_s12 = sshll.u32 %s4467_s4, 3  ;;  %s4444_s20 = smov %s4467_s4 }
 0x2c4   : >> { %s1827_s14 = scalar_lea.vmem %s4351_s21, %s2201_s12 [#allocation3]   ;;  %s1828_s23 = scalar_lea.vmem %s4354_s22, %s2201_s12  }
 0x2c9 PF: > { %s2892_s27 = smov 0  }
 0x2ca   : > { %s1829_s18 = sshllo.u32 %s2892_s27, %s3930_s17 }
 0x2cb   : > { %v1838_v48 = vld [vmem:[%s4157_s29] sm:%s1829_s18]  ;;  %v1840_v49 = vld [vmem:[%s4157_s29 + $0x10] sm:%s1829_s18] }
 0x2cc   : > { %1839 = vst [vmem:[%s4160_s15] sm:%s1829_s18] %v1838_v48  ;;  %1841 = vst [vmem:[%s4160_s15 + $0x1c] sm:%s1829_s18] %v1840_v49 }
 0x2cd   : > { %v1842_v50 = vld [vmem:[%s4157_s29 + $0x20] sm:%s1829_s18]  ;;  %v1844_v51 = vld [vmem:[%s4157_s29 + $0x30] sm:%s1829_s18] }
 0x2ce   : > { %1843 = vst [vmem:[%s4160_s15 + $0x38] sm:%s1829_s18] %v1842_v50  ;;  %1845 = vst [vmem:[%s4160_s15 + $0x54] sm:%s1829_s18] %v1844_v51 }
 0x2cf PF: > { %p2203_p5 = scmp.ge.u32.totalorder %s3926_s5, 8 }
 0x2d0   : > { %s2893_s30 = smov (!%p2203_p5), 0  }
 0x2d1   : > { %1432 = sbr.rel (%p2203_p5) target bundleno = 728 (0x2d8), region = 110  ;;  %s1433_s17 = sshllo.u32 (!%p2203_p5), %s2893_s30, %s3926_s5 }
 0x2d2   : > { %v1442_v52 = vld [vmem:[%s3907_s9] sm:%s1433_s17] (!%p2203_p5)  ;;  %v1444_v53 = vld [vmem:[%s3907_s9 + $0x10] sm:%s1433_s17] (!%p2203_p5) }
 0x2d3   : > { %1443 = vst [vmem:[%s3924_s26] sm:%s1433_s17] (!%p2203_p5), %v1442_v52  ;;  %1445 = vst [vmem:[%s3924_s26 + $0x1c] sm:%s1433_s17] (!%p2203_p5), %v1444_v53 }
 0x2d4   : > { %v1446_v54 = vld [vmem:[%s3907_s9 + $0x20] sm:%s1433_s17] (!%p2203_p5)  ;;  %v1448_v55 = vld [vmem:[%s3907_s9 + $0x30] sm:%s1433_s17] (!%p2203_p5) }
 0x2d5   : > { %1447 = vst [vmem:[%s3924_s26 + $0x38] sm:%s1433_s17] (!%p2203_p5), %v1446_v54  ;;  %1449 = vst [vmem:[%s3924_s26 + $0x54] sm:%s1433_s17] (!%p2203_p5), %v1448_v55 }
 0x2d8 PF: > { %p9_p4 = scmp.ge.s32.totalorder %s2928_s13, 4   ;;  %s4445_s9 = smov %s2756_s10 }
 0x2d9   : > { %s4446_s10 = smov %s2938_s16  ;;  %s4447_s11 = smov %s2928_s13 }
 0x2da   :  { %11 = sbr.rel (!%p9_p4) target bundleno = 2 (0x2), region = 319 }

// kernel: dqn_forward.5
= control target key start
LH: loop header
LB: loop body
LE: loop exit
PB: predicated region body
PF: predicated region fallthrough
CT: control target
= control target key end

     0   :  { %vm701_vm0 = vcmask 1043456   ;;  %vm702_vm1 = vcmask 277508   ;;  %s1247_s1 = inlined_call_operand.vmem [shape: bf16[512,162], index: 1, kind: input, shape index: {}]   ;;  %s1248_s0 = inlined_call_operand.vmem [shape: bf16[64,512], index: 0, kind: input, shape index: {}]   ;;  %s1249_s2 = inlined_call_operand.vmem [shape: bf16[64,162], index: 2, kind: output, shape index: {}]  }
   0x1   :  { %v828_v0 = vld [vmem:[%s1247_s1 + $0x4] ss:$8 sps:$4 sm:$0xff]   ;;  %v832_v2 = vld [vmem:[%s1247_s1] ss:$8 sps:$4 sm:$0xff]   ;;  %v834_v4 = vld [vmem:[%s1247_s1 + $0x14] ss:$8 sps:$4 sm:$0xff]  }
   0x2   :  { %v830_v1 = vld [vmem:[%s1247_s1 + $0x104] ss:$8 sps:$4 sm:$0xff]   ;;  %491 = vmatprep.subr.bf16.mxu1 %v828_v0  ;;  %v833_v3 = vld [vmem:[%s1247_s1 + $0x100] ss:$8 sps:$4 sm:$0xff]   ;;  %v836_v5 = vld [vmem:[%s1247_s1 + $0x114] ss:$8 sps:$4 sm:$0xff]  }
   0x3   :  { %564 = vmatprep.subr.bf16.mxu0 %v830_v1  ;;  %492 = vmatpush1.bf16.msra.mxu1 %v832_v2  ;;  %v838_v6 = vld [vmem:[%s1247_s1 + $0x10] ss:$8 sps:$4 sm:$0xff]   ;;  %v840_v8 = vld [vmem:[%s1247_s1 + $0x24] ss:$8 sps:$4 sm:$0xff]   ;;  %v844_v10 = vld [vmem:[%s1247_s1 + $0x20] ss:$8 sps:$4 sm:$0xff]  }
   0x4   :  { %565 = vmatpush1.bf16.msra.mxu0 %v833_v3  ;;  %493 = vmatprep.subr.bf16.mxu1 %v834_v4  ;;  %v839_v7 = vld [vmem:[%s1247_s1 + $0x110] ss:$8 sps:$4 sm:$0xff]   ;;  %v842_v9 = vld [vmem:[%s1247_s1 + $0x124] ss:$8 sps:$4 sm:$0xff]   ;;  %v845_v11 = vld [vmem:[%s1247_s1 + $0x120] ss:$8 sps:$4 sm:$0xff]  }
   0x5   :  { %566 = vmatprep.subr.bf16.mxu0 %v836_v5  ;;  %v846_v12 = vld [vmem:[%s1247_s1 + $0x34] ss:$8 sps:$4 sm:$0xff]   ;;  %v850_v14 = vld [vmem:[%s1247_s1 + $0x30] ss:$8 sps:$4 sm:$0xff]   ;;  %v852_v16 = vld [vmem:[%s1247_s1 + $0x44] ss:$8 sps:$4 sm:$0xff]  }
   0x6   :  { %v848_v13 = vld [vmem:[%s1247_s1 + $0x134] ss:$8 sps:$4 sm:$0xff]   ;;  %v851_v15 = vld [vmem:[%s1247_s1 + $0x130] ss:$8 sps:$4 sm:$0xff]   ;;  %v854_v17 = vld [vmem:[%s1247_s1 + $0x144] ss:$8 sps:$4 sm:$0xff]  }
   0x7   :  { %494 = vmatpush1.bf16.msra.mxu1 %v838_v6  ;;  %v856_v18 = vld [vmem:[%s1247_s1 + $0x40] ss:$8 sps:$4 sm:$0xff]   ;;  %v858_v20 = vld [vmem:[%s1247_s1 + $0x54] ss:$8 sps:$4 sm:$0xff]   ;;  %v862_v22 = vld [vmem:[%s1247_s1 + $0x50] ss:$8 sps:$4 sm:$0xff]  }
   0x8   :  { %567 = vmatpush1.bf16.msra.mxu0 %v839_v7  ;;  %495 = vmatprep.subr.bf16.mxu1 %v840_v8  ;;  %v857_v19 = vld [vmem:[%s1247_s1 + $0x140] ss:$8 sps:$4 sm:$0xff]   ;;  %v860_v21 = vld [vmem:[%s1247_s1 + $0x154] ss:$8 sps:$4 sm:$0xff]   ;;  %v863_v23 = vld [vmem:[%s1247_s1 + $0x150] ss:$8 sps:$4 sm:$0xff]  }
   0x9   :  { %568 = vmatprep.subr.bf16.mxu0 %v842_v9  ;;  %v864_v24 = vld [vmem:[%s1247_s1 + $0x64] ss:$8 sps:$4 sm:$0xff]   ;;  %v868_v26 = vld [vmem:[%s1247_s1 + $0x60] ss:$8 sps:$4 sm:$0xff]   ;;  %v870_v28 = vld [vmem:[%s1247_s1 + $0x74] ss:$8 sps:$4 sm:$0xff]  }
   0xa   :  { %v866_v25 = vld [vmem:[%s1247_s1 + $0x164] ss:$8 sps:$4 sm:$0xff]   ;;  %v869_v27 = vld [vmem:[%s1247_s1 + $0x160] ss:$8 sps:$4 sm:$0xff]   ;;  %v872_v29 = vld [vmem:[%s1247_s1 + $0x174] ss:$8 sps:$4 sm:$0xff]  }
   0xb   :  { %496 = vmatpush1.bf16.msra.mxu1 %v844_v10  ;;  %v874_v30 = vld [vmem:[%s1247_s1 + $0x70] ss:$8 sps:$4 sm:$0xff]   ;;  %v876_v32 = vld [vmem:[%s1247_s1 + $0x84] ss:$8 sps:$4 sm:$0xff]   ;;  %v880_v34 = vld [vmem:[%s1247_s1 + $0x80] ss:$8 sps:$4 sm:$0xff]  }
   0xc   :  { %569 = vmatpush1.bf16.msra.mxu0 %v845_v11  ;;  %497 = vmatprep.subr.bf16.mxu1 %v846_v12  ;;  %v875_v31 = vld [vmem:[%s1247_s1 + $0x170] ss:$8 sps:$4 sm:$0xff]   ;;  %v878_v33 = vld [vmem:[%s1247_s1 + $0x184] ss:$8 sps:$4 sm:$0xff]   ;;  %v881_v35 = vld [vmem:[%s1247_s1 + $0x180] ss:$8 sps:$4 sm:$0xff]  }
   0xd   :  { %570 = vmatprep.subr.bf16.mxu0 %v848_v13  ;;  %v882_v36 = vld [vmem:[%s1247_s1 + $0x94] ss:$8 sps:$4 sm:$0xff]   ;;  %v886_v38 = vld [vmem:[%s1247_s1 + $0x90] ss:$8 sps:$4 sm:$0xff]   ;;  %v888_v40 = vld [vmem:[%s1247_s1 + $0xa4] ss:$8 sps:$4 sm:$0xff]  }
   0xe   :  { %v884_v37 = vld [vmem:[%s1247_s1 + $0x194] ss:$8 sps:$4 sm:$0xff]   ;;  %v887_v39 = vld [vmem:[%s1247_s1 + $0x190] ss:$8 sps:$4 sm:$0xff]   ;;  %v890_v41 = vld [vmem:[%s1247_s1 + $0x1a4] ss:$8 sps:$4 sm:$0xff]  }
   0xf   :  { %498 = vmatpush1.bf16.msra.mxu1 %v850_v14  ;;  %v892_v42 = vld [vmem:[%s1247_s1 + $0xa0] ss:$8 sps:$4 sm:$0xff]   ;;  %v894_v44 = vld [vmem:[%s1247_s1 + $0xb4] ss:$8 sps:$4 sm:$0xff]   ;;  %v898_v46 = vld [vmem:[%s1247_s1 + $0xb0] ss:$8 sps:$4 sm:$0xff]  }
  0x10   :  { %571 = vmatpush1.bf16.msra.mxu0 %v851_v15  ;;  %499 = vmatprep.subr.bf16.mxu1 %v852_v16  ;;  %v893_v43 = vld [vmem:[%s1247_s1 + $0x1a0] ss:$8 sps:$4 sm:$0xff]   ;;  %v896_v45 = vld [vmem:[%s1247_s1 + $0x1b4] ss:$8 sps:$4 sm:$0xff]   ;;  %v899_v47 = vld [vmem:[%s1247_s1 + $0x1b0] ss:$8 sps:$4 sm:$0xff]  }
  0x11   :  { %572 = vmatprep.subr.bf16.mxu0 %v854_v17  ;;  %v900_v48 = vld [vmem:[%s1247_s1 + $0xc4] ss:$8 sps:$4 sm:$0xff]   ;;  %v904_v52 = vld [vmem:[%s1247_s1 + $0xc0] ss:$8 sps:$4 sm:$0xff]   ;;  %v906_v54 = vld [vmem:[%s1247_s1 + $0xd4] ss:$8 sps:$4 sm:$0xff]  }
  0x12   :  { %v926_v49 = vld [vmem:[%s1248_s0 + $0x4] ss:$16 sps:$4 sm:$0xff]   ;;  %v929_v51 = vld [vmem:[%s1248_s0 + $0xc] ss:$16 sps:$4 sm:$0xff]   ;;  %v905_v53 = vld [vmem:[%s1247_s1 + $0x1c0] ss:$8 sps:$4 sm:$0xff]  }
  0x13   :  { %500 = vmatpush1.bf16.msra.mxu1 %v856_v18  ;;  %v902_v50 = vld [vmem:[%s1247_s1 + $0x1c4] ss:$8 sps:$4 sm:$0xff]   ;;  %523 = vmatprep.mubr.bf16.mxu1 %v926_v49  ;;  %v908_v55 = vld [vmem:[%s1247_s1 + $0x1d4] ss:$8 sps:$4 sm:$0xff]   ;;  %v910_v56 = vld [vmem:[%s1247_s1 + $0xd0] ss:$8 sps:$4 sm:$0xff]  }
  0x14   :  { %573 = vmatpush1.bf16.msra.mxu0 %v857_v19  ;;  %501 = vmatprep.subr.bf16.mxu1 %v858_v20  ;;  %v911_v57 = vld [vmem:[%s1247_s1 + $0x1d0] ss:$8 sps:$4 sm:$0xff]   ;;  %v912_v58 = vld [vmem:[%s1247_s1 + $0xe4] ss:$8 sps:$4 sm:$0xff]   ;;  %v916_v60 = vld [vmem:[%s1247_s1 + $0xe0] ss:$8 sps:$4 sm:$0xff]  }
  0x15   :  { %574 = vmatprep.subr.bf16.mxu0 %v860_v21  ;;  %596 = vmatprep.mubr.bf16.mxu0 %v929_v51  ;;  %v914_v59 = vld [vmem:[%s1247_s1 + $0x1e4] ss:$8 sps:$4 sm:$0xff]   ;;  %v917_v61 = vld [vmem:[%s1247_s1 + $0x1e0] ss:$8 sps:$4 sm:$0xff]   ;;  %v918_v62 = vld [vmem:[%s1247_s1 + $0xf4] ss:$8 sps:$4 sm:$0xff]  }
  0x16   :  { %v920_v63 = vld [vmem:[%s1247_s1 + $0x1f4] ss:$8 sps:$4 sm:$0xff]   ;;  %v922_v0 = vld [vmem:[%s1247_s1 + $0xf0] ss:$8 sps:$4 sm:$0xff]   ;;  %vm1203_vm2 = vmor %vm702_vm1, %vm701_vm0 }
  0x17   :  { %502 = vmatpush1.bf16.msra.mxu1 %v862_v22  ;;  %v923_v1 = vld [vmem:[%s1247_s1 + $0x1f0] ss:$8 sps:$4 sm:$0xff]   ;;  %v930_v4 = vld [vmem:[%s1248_s0 + $0x24] ss:$16 sps:$4 sm:$0xff]   ;;  %v932_v5 = vld [vmem:[%s1248_s0 + $0x2c] ss:$16 sps:$4 sm:$0xff]  }
  0x18   :  { %575 = vmatpush1.bf16.msra.mxu0 %v863_v23  ;;  %503 = vmatprep.subr.bf16.mxu1 %v864_v24  ;;  %v924_v2 = vld [vmem:[%s1248_s0] ss:$16 sps:$4 sm:$0xff]   ;;  %v927_v3 = vld [vmem:[%s1248_s0 + $0x8] ss:$16 sps:$4 sm:$0xff]   ;;  %v936_v8 = vld [vmem:[%s1248_s0 + $0x44] ss:$16 sps:$4 sm:$0xff]  }
  0x19   :  { %576 = vmatprep.subr.bf16.mxu0 %v866_v25  ;;  %v934_v6 = vld [vmem:[%s1248_s0 + $0x20] ss:$16 sps:$4 sm:$0xff]   ;;  %v935_v7 = vld [vmem:[%s1248_s0 + $0x28] ss:$16 sps:$4 sm:$0xff]   ;;  %v938_v9 = vld [vmem:[%s1248_s0 + $0x4c] ss:$16 sps:$4 sm:$0xff]  }
  0x1a   :  { %v940_v10 = vld [vmem:[%s1248_s0 + $0x40] ss:$16 sps:$4 sm:$0xff]   ;;  %v941_v11 = vld [vmem:[%s1248_s0 + $0x48] ss:$16 sps:$4 sm:$0xff]   ;;  %v942_v12 = vld [vmem:[%s1248_s0 + $0x64] ss:$16 sps:$4 sm:$0xff]  }
  0x1b   :  { %504 = vmatpush1.bf16.msra.mxu1 %v868_v26  ;;  %v944_v13 = vld [vmem:[%s1248_s0 + $0x6c] ss:$16 sps:$4 sm:$0xff]   ;;  %v946_v14 = vld [vmem:[%s1248_s0 + $0x60] ss:$16 sps:$4 sm:$0xff]   ;;  %v947_v15 = vld [vmem:[%s1248_s0 + $0x68] ss:$16 sps:$4 sm:$0xff]  }
  0x1c   :  { %577 = vmatpush1.bf16.msra.mxu0 %v869_v27  ;;  %505 = vmatprep.subr.bf16.mxu1 %v870_v28 }
  0x1d   :  { %578 = vmatprep.subr.bf16.mxu0 %v872_v29 }
  0x1f   :  { %506 = vmatpush1.bf16.msra.mxu1 %v874_v30 }
  0x20   :  { %579 = vmatpush1.bf16.msra.mxu0 %v875_v31  ;;  %507 = vmatprep.subr.bf16.mxu1 %v876_v32 }
  0x21   :  { %580 = vmatprep.subr.bf16.mxu0 %v878_v33 }
  0x23   :  { %508 = vmatpush1.bf16.msra.mxu1 %v880_v34 }
  0x24   :  { %581 = vmatpush1.bf16.msra.mxu0 %v881_v35  ;;  %509 = vmatprep.subr.bf16.mxu1 %v882_v36 }
  0x25   :  { %582 = vmatprep.subr.bf16.mxu0 %v884_v37 }
  0x27   :  { %510 = vmatpush1.bf16.msra.mxu1 %v886_v38 }
  0x28   :  { %583 = vmatpush1.bf16.msra.mxu0 %v887_v39  ;;  %511 = vmatprep.subr.bf16.mxu1 %v888_v40 }
  0x29   :  { %584 = vmatprep.subr.bf16.mxu0 %v890_v41 }
  0x2b   :  { %512 = vmatpush1.bf16.msra.mxu1 %v892_v42 }
  0x2c   :  { %585 = vmatpush1.bf16.msra.mxu0 %v893_v43  ;;  %513 = vmatprep.subr.bf16.mxu1 %v894_v44 }
  0x2d   :  { %586 = vmatprep.subr.bf16.mxu0 %v896_v45 }
  0x2f   :  { %514 = vmatpush1.bf16.msra.mxu1 %v898_v46 }
  0x30   :  { %587 = vmatpush1.bf16.msra.mxu0 %v899_v47  ;;  %515 = vmatprep.subr.bf16.mxu1 %v900_v48 }
  0x31   :  { %588 = vmatprep.subr.bf16.mxu0 %v902_v50 }
  0x33   :  { %516 = vmatpush1.bf16.msra.mxu1 %v904_v52 }
  0x34   :  { %589 = vmatpush1.bf16.msra.mxu0 %v905_v53  ;;  %517 = vmatprep.subr.bf16.mxu1 %v906_v54 }
  0x35   :  { %590 = vmatprep.subr.bf16.mxu0 %v908_v55 }
  0x37   :  { %518 = vmatpush1.bf16.msra.mxu1 %v910_v56 }
  0x38   :  { %591 = vmatpush1.bf16.msra.mxu0 %v911_v57  ;;  %519 = vmatprep.subr.bf16.mxu1 %v912_v58 }
  0x39   :  { %592 = vmatprep.subr.bf16.mxu0 %v914_v59 }
  0x3b   :  { %520 = vmatpush1.bf16.msra.mxu1 %v916_v60 }
  0x3c   :  { %593 = vmatpush1.bf16.msra.mxu0 %v917_v61  ;;  %521 = vmatprep.subr.bf16.mxu1 %v918_v62 }
  0x3d   :  { %594 = vmatprep.subr.bf16.mxu0 %v920_v63 }
  0x3f   :  { %522 = vmatpush1.bf16.msra.mxu1 %v922_v0 }
  0x40   :  { %595 = vmatpush1.bf16.msra.mxu0 %v923_v1 }
  0x42   :  { %524 = vmatmul.mubr.bf16.vlgmr.msra.gmra.mrb[0].mxu1 %v924_v2 }
  0x43   :  { %597 = vmatmul.mubr.bf16.vlgmr.msra.gmra.mrb[0].mxu0 %v927_v3  ;;  %533 = vmatprep.mubr.bf16.mxu1 %v930_v4 }
  0x44   :  { %606 = vmatprep.mubr.bf16.mxu0 %v932_v5 }
  0x4a   :  { %534 = vmatmul.mubr.bf16.gmra.mrb[4].mxu1 %v934_v6 }
  0x4b   :  { %607 = vmatmul.mubr.bf16.gmra.mrb[4].mxu0 %v935_v7  ;;  %543 = vmatprep.mubr.bf16.mxu1 %v936_v8 }
  0x4c   :  { %616 = vmatprep.mubr.bf16.mxu0 %v938_v9 }
  0x52   :  { %544 = vmatmul.mubr.bf16.gmra.mrb[8].mxu1 %v940_v10 }
  0x53   :  { %617 = vmatmul.mubr.bf16.gmra.mrb[8].mxu0 %v941_v11  ;;  %553 = vmatprep.mubr.bf16.mxu1 %v942_v12 }
  0x54   :  { %626 = vmatprep.mubr.bf16.mxu0 %v944_v13 }
  0x5a   :  { %554 = vmatmul.mubr.bf16.gmra.mrb[12].mxu1 %v946_v14 }
  0x5b   :  { %627 = vmatmul.mubr.bf16.gmra.mrb[12].mxu0 %v947_v15 }
 0x115   :  { %v525_v16 = vpop.f32.mrb[0].mxu1 }
 0x116   :  { %v598_v17 = vpop.f32.mrb[0].mxu0  ;;  %v527_v19 = vpop.f32.mrb[1].mxu1 }
 0x117   :  { %v599_v18 = vadd.f32 %v598_v17, %v525_v16  ;;  %v600_v20 = vpop.f32.mrb[1].mxu0  ;;  %v529_v22 = vpop.f32.mrb[2].mxu1 }
 0x118   :  { %v601_v21 = vadd.f32 %v600_v20, %v527_v19  ;;  %v602_v23 = vpop.f32.mrb[2].mxu0  ;;  %v531_v26 = vpop.f32.mrb[3].mxu1 }
 0x119   :  { %v637_v24 = vmax.f32 %v599_v18, 0.0  ;;  %v603_v25 = vadd.f32 %v602_v23, %v529_v22  ;;  %v604_v27 = vpop.f32.mrb[3].mxu0 }
 0x11a   :  { %v638_v28 = vmax.f32 %v601_v21, 0.0  ;;  %v605_v29 = vadd.f32 %v604_v27, %v531_v26 }
 0x11b   :  { %v639_v31 = vmax.f32 %v603_v25, 0.0 }
 0x11c   :  { %v804_v32 = vpack.c.bf16 %v638_v28, %v637_v24  ;;  %v640_v33 = vmax.f32 %v605_v29, 0.0 }
 0x11d   :  { %v535_v35 = vpop.f32.mrb[4].mxu1 }
 0x11e   :  { %704 = vst.msk [vmem:[%s1249_s2] sm:$0xff] %vm1203_vm2, %v804_v32  ;;  %v805_v34 = vpack.c.bf16 %v640_v33, %v639_v31  ;;  %v608_v36 = vpop.f32.mrb[4].mxu0  ;;  %v537_v38 = vpop.f32.mrb[5].mxu1 }
 0x11f   :  { %v609_v37 = vadd.f32 %v608_v36, %v535_v35  ;;  %v610_v39 = vpop.f32.mrb[5].mxu0  ;;  %v539_v41 = vpop.f32.mrb[6].mxu1 }
 0x120   :  { %705 = vst.msk [vmem:[%s1249_s2 + $0x8] sm:$0xff] %vm1203_vm2, %v805_v34  ;;  %v611_v40 = vadd.f32 %v610_v39, %v537_v38  ;;  %v612_v42 = vpop.f32.mrb[6].mxu0  ;;  %v541_v45 = vpop.f32.mrb[7].mxu1 }
 0x121   :  { %v641_v43 = vmax.f32 %v609_v37, 0.0  ;;  %v613_v44 = vadd.f32 %v612_v42, %v539_v41  ;;  %v614_v46 = vpop.f32.mrb[7].mxu0 }
 0x122   :  { %v642_v47 = vmax.f32 %v611_v40, 0.0  ;;  %v615_v48 = vadd.f32 %v614_v46, %v541_v45 }
 0x123   :  { %v643_v49 = vmax.f32 %v613_v44, 0.0 }
 0x124   :  { %v806_v50 = vpack.c.bf16 %v642_v47, %v641_v43  ;;  %v644_v51 = vmax.f32 %v615_v48, 0.0 }
 0x125   :  { %v545_v53 = vpop.f32.mrb[8].mxu1 }
 0x126   :  { %706 = vst.msk [vmem:[%s1249_s2 + $0x10] sm:$0xff] %vm1203_vm2, %v806_v50  ;;  %v807_v52 = vpack.c.bf16 %v644_v51, %v643_v49  ;;  %v618_v54 = vpop.f32.mrb[8].mxu0  ;;  %v547_v56 = vpop.f32.mrb[9].mxu1 }
 0x127   :  { %v619_v55 = vadd.f32 %v618_v54, %v545_v53  ;;  %v620_v57 = vpop.f32.mrb[9].mxu0  ;;  %v549_v59 = vpop.f32.mrb[10].mxu1 }
 0x128   :  { %707 = vst.msk [vmem:[%s1249_s2 + $0x18] sm:$0xff] %vm1203_vm2, %v807_v52  ;;  %v621_v58 = vadd.f32 %v620_v57, %v547_v56  ;;  %v622_v60 = vpop.f32.mrb[10].mxu0  ;;  %v551_v63 = vpop.f32.mrb[11].mxu1 }
 0x129   :  { %v645_v61 = vmax.f32 %v619_v55, 0.0  ;;  %v623_v62 = vadd.f32 %v622_v60, %v549_v59  ;;  %v624_v0 = vpop.f32.mrb[11].mxu0 }
 0x12a   :  { %v646_v1 = vmax.f32 %v621_v58, 0.0  ;;  %v625_v2 = vadd.f32 %v624_v0, %v551_v63 }
 0x12b   :  { %v647_v3 = vmax.f32 %v623_v62, 0.0 }
 0x12c   :  { %v808_v4 = vpack.c.bf16 %v646_v1, %v645_v61  ;;  %v648_v5 = vmax.f32 %v625_v2, 0.0 }
 0x12d   :  { %v555_v7 = vpop.f32.mrb[12].mxu1 }
 0x12e   :  { %708 = vst.msk [vmem:[%s1249_s2 + $0x20] sm:$0xff] %vm1203_vm2, %v808_v4  ;;  %v809_v6 = vpack.c.bf16 %v648_v5, %v647_v3  ;;  %v628_v8 = vpop.f32.mrb[12].mxu0  ;;  %v557_v10 = vpop.f32.mrb[13].mxu1 }
 0x12f   :  { %v629_v9 = vadd.f32 %v628_v8, %v555_v7  ;;  %v630_v11 = vpop.f32.mrb[13].mxu0  ;;  %v559_v13 = vpop.f32.mrb[14].mxu1 }
 0x130   :  { %709 = vst.msk [vmem:[%s1249_s2 + $0x28] sm:$0xff] %vm1203_vm2, %v809_v6  ;;  %v631_v12 = vadd.f32 %v630_v11, %v557_v10  ;;  %v632_v14 = vpop.f32.mrb[14].mxu0  ;;  %v561_v17 = vpop.f32.mrb[15].mxu1 }
 0x131   :  { %v649_v15 = vmax.f32 %v629_v9, 0.0  ;;  %v633_v16 = vadd.f32 %v632_v14, %v559_v13  ;;  %v634_v18 = vpop.f32.mrb[15].mxu0 }
 0x132   :  { %v650_v19 = vmax.f32 %v631_v12, 0.0  ;;  %v635_v20 = vadd.f32 %v634_v18, %v561_v17 }
 0x133   :  { %v651_v21 = vmax.f32 %v633_v16, 0.0 }
 0x134   :  { %v810_v22 = vpack.c.bf16 %v650_v19, %v649_v15  ;;  %v652_v23 = vmax.f32 %v635_v20, 0.0 }
 0x136   :  { %710 = vst.msk [vmem:[%s1249_s2 + $0x30] sm:$0xff] %vm1203_vm2, %v810_v22  ;;  %v811_v24 = vpack.c.bf16 %v652_v23, %v651_v21 }
 0x138   :  { %711 = vst.msk [vmem:[%s1249_s2 + $0x38] sm:$0xff] %vm1203_vm2, %v811_v24 }

// kernel: dqn_forward.6
= control target key start
LH: loop header
LB: loop body
LE: loop exit
PB: predicated region body
PF: predicated region fallthrough
CT: control target
= control target key end

     0   :  { %vm424_vm0 = vcmask 523264   ;;  %vm672_vm1 = vcmask 797696   ;;  %s1152_s1 = inlined_call_operand.vmem [shape: bf16[576,98], index: 1, kind: input, shape index: {}]   ;;  %s1153_s0 = inlined_call_operand.vmem [shape: bf16[64,576], index: 0, kind: input, shape index: {}]   ;;  %s1154_s2 = inlined_call_operand.vmem [shape: bf16[64,98], index: 2, kind: output, shape index: {}]  }
   0x1   :  { %v873_v0 = vld [vmem:[%s1152_s1 + $0x40] sm:$0xff]   ;;  %v877_v4 = vld [vmem:[%s1152_s1 + $0x48] sm:$0xff]   ;;  %v881_v8 = vld [vmem:[%s1152_s1 + $0x50] sm:$0xff]  }
   0x2   :  { %v874_v1 = vld [vmem:[%s1152_s1 + $0xc0] sm:$0xff]   ;;  %761 = vmatprep.subr.bf16.mxu0 %v873_v0  ;;  %v878_v5 = vld [vmem:[%s1152_s1 + $0xc8] sm:$0xff]   ;;  %v882_v9 = vld [vmem:[%s1152_s1 + $0xd0] sm:$0xff]  }
   0x3   :  { %v875_v2 = vld [vmem:[%s1152_s1] sm:$0xff]   ;;  %801 = vmatprep.subr.bf16.mxu1 %v874_v1  ;;  %v879_v6 = vld [vmem:[%s1152_s1 + $0x8] sm:$0xff]   ;;  %v883_v10 = vld [vmem:[%s1152_s1 + $0x10] sm:$0xff]  }
   0x4   :  { %v876_v3 = vld [vmem:[%s1152_s1 + $0x80] sm:$0xff]   ;;  %762 = vmatpush3.bf16.msra.mxu0 %v875_v2  ;;  %v880_v7 = vld [vmem:[%s1152_s1 + $0x88] sm:$0xff]   ;;  %v884_v11 = vld [vmem:[%s1152_s1 + $0x90] sm:$0xff]  }
   0x5   :  { %802 = vmatpush3.bf16.msra.mxu1 %v876_v3  ;;  %763 = vmatprep.subr.bf16.mxu0 %v877_v4  ;;  %v885_v12 = vld [vmem:[%s1152_s1 + $0x58] sm:$0xff]   ;;  %v889_v16 = vld [vmem:[%s1152_s1 + $0x60] sm:$0xff]   ;;  %v893_v20 = vld [vmem:[%s1152_s1 + $0x68] sm:$0xff]  }
   0x6   :  { %803 = vmatprep.subr.bf16.mxu1 %v878_v5  ;;  %v886_v13 = vld [vmem:[%s1152_s1 + $0xd8] sm:$0xff]   ;;  %v890_v17 = vld [vmem:[%s1152_s1 + $0xe0] sm:$0xff]   ;;  %v894_v21 = vld [vmem:[%s1152_s1 + $0xe8] sm:$0xff]  }
   0x7   :  { %v887_v14 = vld [vmem:[%s1152_s1 + $0x18] sm:$0xff]   ;;  %v891_v18 = vld [vmem:[%s1152_s1 + $0x20] sm:$0xff]   ;;  %v895_v22 = vld [vmem:[%s1152_s1 + $0x28] sm:$0xff]  }
   0x8   :  { %764 = vmatpush3.bf16.msra.mxu0 %v879_v6  ;;  %v888_v15 = vld [vmem:[%s1152_s1 + $0x98] sm:$0xff]   ;;  %v892_v19 = vld [vmem:[%s1152_s1 + $0xa0] sm:$0xff]   ;;  %v896_v23 = vld [vmem:[%s1152_s1 + $0xa8] sm:$0xff]  }
   0x9   :  { %804 = vmatpush3.bf16.msra.mxu1 %v880_v7  ;;  %765 = vmatprep.subr.bf16.mxu0 %v881_v8  ;;  %v897_v24 = vld [vmem:[%s1152_s1 + $0x70] sm:$0xff]   ;;  %v901_v28 = vld [vmem:[%s1152_s1 + $0x78] sm:$0xff]   ;;  %v910_v35 = vld [vmem:[%s1153_s0 + $0xc] ss:$20 sps:$4 sm:$0xff]  }
   0xa   :  { %805 = vmatprep.subr.bf16.mxu1 %v882_v9  ;;  %v898_v25 = vld [vmem:[%s1152_s1 + $0xf0] sm:$0xff]   ;;  %v902_v29 = vld [vmem:[%s1152_s1 + $0xf8] sm:$0xff]   ;;  %v911_v36 = vld [vmem:[%s1152_s1 + $0x100] sm:$0xff]   ;;  %534 = vmatprep.mubr.bf16.mxu1 %v910_v35 }
   0xb   :  { %v899_v26 = vld [vmem:[%s1152_s1 + $0x30] sm:$0xff]   ;;  %v903_v30 = vld [vmem:[%s1152_s1 + $0x38] sm:$0xff]   ;;  %v912_v37 = vld [vmem:[%s1153_s0 + $0x2c] ss:$20 sps:$4 sm:$0xff]  }
   0xc   :  { %766 = vmatpush3.bf16.msra.mxu0 %v883_v10  ;;  %v900_v27 = vld [vmem:[%s1152_s1 + $0xb0] sm:$0xff]   ;;  %v904_v31 = vld [vmem:[%s1152_s1 + $0xb8] sm:$0xff]   ;;  %v918_v39 = vld [vmem:[%s1152_s1 + $0x108] sm:$0xff]  }
   0xd   :  { %806 = vmatpush3.bf16.msra.mxu1 %v884_v11  ;;  %767 = vmatprep.subr.bf16.mxu0 %v885_v12  ;;  %v905_v32 = vld [vmem:[%s1153_s0] ss:$20 sps:$4 sm:$0xff]   ;;  %v907_v33 = vld [vmem:[%s1153_s0 + $0x4] ss:$20 sps:$4 sm:$0xff]   ;;  %v908_v34 = vld [vmem:[%s1153_s0 + $0x8] ss:$20 sps:$4 sm:$0xff]  }
   0xe   :  { %807 = vmatprep.subr.bf16.mxu1 %v886_v13  ;;  %469 = vmatprep.mubr.bf16.mxu0 %v907_v33  ;;  %v914_v38 = vld [vmem:[%s1153_s0 + $0x34] ss:$20 sps:$4 sm:$0xff]   ;;  %v917_v41 = vld [vmem:[%s1153_s0 + $0x30] ss:$20 sps:$4 sm:$0xff]   ;;  %v932_v45 = vld [vmem:[%s1152_s1 + $0x118] sm:$0xff]  }
   0xf   :  { %v916_v40 = vld [vmem:[%s1153_s0 + $0x28] ss:$20 sps:$4 sm:$0xff]   ;;  %v925_v44 = vld [vmem:[%s1152_s1 + $0x110] sm:$0xff]   ;;  %v924_v47 = vld [vmem:[%s1153_s0 + $0x58] ss:$20 sps:$4 sm:$0xff]  }
  0x10   :  { %768 = vmatpush3.bf16.msra.mxu0 %v887_v14  ;;  %v919_v42 = vld [vmem:[%s1153_s0 + $0x54] ss:$20 sps:$4 sm:$0xff]   ;;  %v921_v43 = vld [vmem:[%s1153_s0 + $0x5c] ss:$20 sps:$4 sm:$0xff]   ;;  %v928_v49 = vld [vmem:[%s1153_s0 + $0x84] ss:$20 sps:$4 sm:$0xff]  }
  0x11   :  { %808 = vmatpush3.bf16.msra.mxu1 %v888_v15  ;;  %769 = vmatprep.subr.bf16.mxu0 %v889_v16  ;;  %v923_v46 = vld [vmem:[%s1153_s0 + $0x50] ss:$20 sps:$4 sm:$0xff]   ;;  %v930_v50 = vld [vmem:[%s1153_s0 + $0x78] ss:$20 sps:$4 sm:$0xff]   ;;  %v931_v51 = vld [vmem:[%s1153_s0 + $0x80] ss:$20 sps:$4 sm:$0xff]  }
  0x12   :  { %809 = vmatprep.subr.bf16.mxu1 %v890_v17  ;;  %v926_v48 = vld [vmem:[%s1153_s0 + $0x7c] ss:$20 sps:$4 sm:$0xff]   ;;  %v934_v53 = vld [vmem:[%s1153_s0 + $0x60] ss:$20 sps:$4 sm:$0xff]   ;;  %v935_v54 = vld [vmem:[%s1153_s0 + $0x38] ss:$20 sps:$4 sm:$0xff]  }
  0x13   :  { %v933_v52 = vld [vmem:[%s1153_s0 + $0x10] ss:$20 sps:$4 sm:$0xff]   ;;  %v936_v55 = vld [vmem:[%s1153_s0 + $0x88] ss:$20 sps:$4 sm:$0xff]  }
  0x14   :  { %770 = vmatpush3.bf16.msra.mxu0 %v891_v18 }
  0x15   :  { %810 = vmatpush3.bf16.msra.mxu1 %v892_v19  ;;  %771 = vmatprep.subr.bf16.mxu0 %v893_v20 }
  0x16   :  { %811 = vmatprep.subr.bf16.mxu1 %v894_v21 }
  0x18   :  { %772 = vmatpush3.bf16.msra.mxu0 %v895_v22 }
  0x19   :  { %812 = vmatpush3.bf16.msra.mxu1 %v896_v23  ;;  %773 = vmatprep.subr.bf16.mxu0 %v897_v24 }
  0x1a   :  { %813 = vmatprep.subr.bf16.mxu1 %v898_v25 }
  0x1c   :  { %774 = vmatpush3.bf16.msra.mxu0 %v899_v26 }
  0x1d   :  { %814 = vmatpush3.bf16.msra.mxu1 %v900_v27  ;;  %775 = vmatprep.subr.bf16.mxu0 %v901_v28 }
  0x1e   :  { %815 = vmatprep.subr.bf16.mxu1 %v902_v29 }
  0x20   :  { %776 = vmatpush3.bf16.msra.mxu0 %v903_v30 }
  0x21   :  { %816 = vmatpush3.bf16.msra.mxu1 %v904_v31  ;;  %849 = vmatprep.subr.bf16.mxu0 %v911_v36 }
  0x22   :  { %865 = vmatprep.subr.bf16.mxu1 %v911_v36 }
  0x23   :  { %470 = vmatmul.mubr.bf16.vlgmr.msra.gmra.mrb[0].mxu0 %v905_v32 }
  0x24   :  { %535 = vmatmul.mubr.bf16.vlgmr.msra.gmra.mrb[0].mxu1 %v908_v34  ;;  %850 = vmatpush3.bf16.msra.mxu0 %v911_v36 }
  0x25   :  { %869 = vmatpush3.bf16.msra.mxu1 %v911_v36  ;;  %477 = vmatprep.mubr.bf16.mxu0 %v912_v37 }
  0x26   :  { %542 = vmatprep.mubr.bf16.mxu1 %v914_v38  ;;  %851 = vmatprep.subr.bf16.mxu0 %v918_v39 }
  0x27   :  { %866 = vmatprep.subr.bf16.mxu1 %v918_v39 }
  0x28   :  { %852 = vmatpush3.bf16.msra.mxu0 %v918_v39 }
  0x29   :  { %870 = vmatpush3.bf16.msra.mxu1 %v918_v39  ;;  %853 = vmatprep.subr.bf16.mxu0 %v925_v44 }
  0x2a   :  { %867 = vmatprep.subr.bf16.mxu1 %v925_v44 }
  0x2b   :  { %478 = vmatmul.mubr.bf16.gmra.mrb[4].mxu0 %v916_v40 }
  0x2c   :  { %543 = vmatmul.mubr.bf16.gmra.mrb[4].mxu1 %v917_v41  ;;  %485 = vmatprep.mubr.bf16.mxu0 %v919_v42 }
  0x2d   :  { %550 = vmatprep.mubr.bf16.mxu1 %v921_v43  ;;  %854 = vmatpush3.bf16.msra.mxu0 %v925_v44 }
  0x2e   :  { %871 = vmatpush3.bf16.msra.mxu1 %v925_v44  ;;  %855 = vmatprep.subr.bf16.mxu0 %v932_v45 }
  0x2f   :  { %868 = vmatprep.subr.bf16.mxu1 %v932_v45 }
  0x31   :  { %856 = vmatpush3.bf16.msra.mxu0 %v932_v45 }
  0x32   :  { %872 = vmatpush3.bf16.msra.mxu1 %v932_v45 }
  0x33   :  { %486 = vmatmul.mubr.bf16.gmra.mrb[8].mxu0 %v923_v46 }
  0x34   :  { %551 = vmatmul.mubr.bf16.gmra.mrb[8].mxu1 %v924_v47  ;;  %493 = vmatprep.mubr.bf16.mxu0 %v926_v48 }
  0x35   :  { %558 = vmatprep.mubr.bf16.mxu1 %v928_v49 }
  0x3b   :  { %494 = vmatmul.mubr.bf16.gmra.mrb[12].mxu0 %v930_v50 }
  0x3c   :  { %559 = vmatmul.mubr.bf16.gmra.mrb[12].mxu1 %v931_v51  ;;  %857 = vmatprep.mubr.msk.bf16.mxu0 %vm424_vm0, %v933_v52 }
  0x3d   :  { %861 = vmatprep.mubr.msk.bf16.mxu1 %vm424_vm0, %v934_v53 }
  0x43   :  { %858 = vmatmul.mubr.msk.bf16.vlgmr.msra.gmra.mrb[16].mxu0 %vm424_vm0, %v935_v54 }
  0x44   :  { %862 = vmatmul.mubr.msk.bf16.vlgmr.msra.gmra.mrb[16].mxu1 %vm424_vm0, %v936_v55 }
  0xf6   :  { %v777_v56 = vpop.f32.mrb[0].mxu0 }
  0xf7   :  { %v817_v57 = vpop.f32.mrb[0].mxu1  ;;  %v778_v58 = vpop.f32.mrb[1].mxu0 }
  0xf8   :  { %v779_v59 = vadd.f32 %v778_v58, %v777_v56  ;;  %v818_v60 = vpop.f32.mrb[1].mxu1  ;;  %v780_v61 = vpop.f32.mrb[2].mxu0 }
  0xf9   :  { %v819_v62 = vadd.f32 %v818_v60, %v817_v57  ;;  %v820_v63 = vpop.f32.mrb[2].mxu1  ;;  %v781_v0 = vpop.f32.mrb[3].mxu0 }
  0xfa   :  { %v782_v1 = vadd.f32 %v781_v0, %v780_v61  ;;  %v821_v2 = vpop.f32.mrb[3].mxu1 }
  0xfb   :  { %v822_v3 = vadd.f32 %v821_v2, %v820_v63  ;;  %v537_v4 = vadd.f32 %v819_v62, %v779_v59 }
  0xfd   :  { %v540_v5 = vadd.f32 %v822_v3, %v782_v1 }
  0xfe   :  { %v783_v6 = vpop.f32.mrb[4].mxu0 }
  0xff   :  { %v823_v7 = vpop.f32.mrb[4].mxu1  ;;  %v784_v8 = vpop.f32.mrb[5].mxu0 }
 0x100   :  { %v785_v9 = vadd.f32 %v784_v8, %v783_v6  ;;  %v824_v10 = vpop.f32.mrb[5].mxu1  ;;  %v786_v11 = vpop.f32.mrb[6].mxu0 }
 0x101   :  { %v825_v12 = vadd.f32 %v824_v10, %v823_v7  ;;  %v826_v13 = vpop.f32.mrb[6].mxu1  ;;  %v787_v14 = vpop.f32.mrb[7].mxu0 }
 0x102   :  { %v788_v15 = vadd.f32 %v787_v14, %v786_v11  ;;  %v827_v16 = vpop.f32.mrb[7].mxu1 }
 0x103   :  { %v828_v17 = vadd.f32 %v827_v16, %v826_v13  ;;  %v545_v18 = vadd.f32 %v825_v12, %v785_v9 }
 0x105   :  { %v548_v19 = vadd.f32 %v828_v17, %v788_v15 }
 0x106   :  { %v789_v20 = vpop.f32.mrb[8].mxu0 }
 0x107   :  { %v829_v21 = vpop.f32.mrb[8].mxu1  ;;  %v790_v22 = vpop.f32.mrb[9].mxu0 }
 0x108   :  { %v791_v23 = vadd.f32 %v790_v22, %v789_v20  ;;  %v830_v24 = vpop.f32.mrb[9].mxu1  ;;  %v792_v25 = vpop.f32.mrb[10].mxu0 }
 0x109   :  { %v831_v26 = vadd.f32 %v830_v24, %v829_v21  ;;  %v832_v27 = vpop.f32.mrb[10].mxu1  ;;  %v793_v28 = vpop.f32.mrb[11].mxu0 }
 0x10a   :  { %v794_v29 = vadd.f32 %v793_v28, %v792_v25  ;;  %v833_v30 = vpop.f32.mrb[11].mxu1 }
 0x10b   :  { %v834_v31 = vadd.f32 %v833_v30, %v832_v27  ;;  %v553_v32 = vadd.f32 %v831_v26, %v791_v23 }
 0x10d   :  { %v556_v33 = vadd.f32 %v834_v31, %v794_v29 }
 0x10e   :  { %v795_v34 = vpop.f32.mrb[12].mxu0 }
 0x10f   :  { %v835_v35 = vpop.f32.mrb[12].mxu1  ;;  %v796_v36 = vpop.f32.mrb[13].mxu0 }
 0x110   :  { %v797_v37 = vadd.f32 %v796_v36, %v795_v34  ;;  %v836_v38 = vpop.f32.mrb[13].mxu1  ;;  %v798_v39 = vpop.f32.mrb[14].mxu0 }
 0x111   :  { %v837_v40 = vadd.f32 %v836_v38, %v835_v35  ;;  %v838_v41 = vpop.f32.mrb[14].mxu1  ;;  %v799_v42 = vpop.f32.mrb[15].mxu0 }
 0x112   :  { %v800_v43 = vadd.f32 %v799_v42, %v798_v39  ;;  %v839_v44 = vpop.f32.mrb[15].mxu1 }
 0x113   :  { %v840_v45 = vadd.f32 %v839_v44, %v838_v41  ;;  %v561_v46 = vadd.f32 %v837_v40, %v797_v37 }
 0x115   :  { %v564_v47 = vadd.f32 %v840_v45, %v800_v43 }
 0x116   :  { %v859_v48 = vpop.f32.mrb[16].mxu0 }
 0x117   :  { %v610_v49 = vadd.f32 %v859_v48, %v545_v18  ;;  %v863_v50 = vpop.f32.mrb[16].mxu1  ;;  %v601_v51 = vpop.f32.mrb[17].mxu0 }
 0x118   :  { %v626_v52 = vadd.f32 %v863_v50, %v561_v46  ;;  %v602_v53 = vadd.f32 %v601_v51, %v537_v4  ;;  %v617_v54 = vpop.f32.mrb[17].mxu1  ;;  %v860_v55 = vpop.f32.mrb[18].mxu0 }
 0x119   :  { %v634_v56 = vmax.f32 %v610_v49, 0.0  ;;  %v618_v57 = vadd.f32 %v617_v54, %v553_v32  ;;  %v613_v58 = vadd.f32 %v860_v55, %v548_v19  ;;  %v864_v59 = vpop.f32.mrb[18].mxu1  ;;  %v604_v60 = vpop.f32.mrb[19].mxu0 }
 0x11a   :  { %v638_v61 = vmax.f32 %v626_v52, 0.0  ;;  %v632_v62 = vmax.f32 %v602_v53, 0.0  ;;  %v629_v63 = vadd.f32 %v864_v59, %v564_v47  ;;  %v605_v0 = vadd.f32 %v604_v60, %v540_v5  ;;  %v620_v1 = vpop.f32.mrb[19].mxu1 }
 0x11b   :  { %v755_v2 = vpack.c.bf16 %v634_v56, %v634_v56  ;;  %v636_v3 = vmax.f32 %v618_v57, 0.0  ;;  %v635_v6 = vmax.f32 %v613_v58, 0.0  ;;  %v621_v7 = vadd.f32 %v620_v1, %v556_v33 }
 0x11c   :  { %v759_v8 = vpack.c.bf16 %v638_v61, %v638_v61  ;;  %v753_v9 = vpack.c.bf16 %v632_v62, %v632_v62  ;;  %v639_v4 = vmax.f32 %v629_v63, 0.0  ;;  %v633_v10 = vmax.f32 %v605_v0, 0.0 }
 0x11d   :  { %675 = vst.msk [vmem:[%s1154_s2 + $0x8] sm:$0xf] %vm672_vm1, %v755_v2  ;;  %v757_v11 = vpack.c.bf16 %v636_v3, %v636_v3  ;;  %v756_v12 = vpack.c.bf16 %v635_v6, %v635_v6  ;;  %v637_v13 = vmax.f32 %v621_v7, 0.0 }
 0x11e   :  { %679 = vst.msk [vmem:[%s1154_s2 + $0x18] sm:$0xf] %vm672_vm1, %v759_v8  ;;  %673 = vst.msk [vmem:[%s1154_s2] sm:$0xf] %vm672_vm1, %v753_v9  ;;  %v760_v5 = vpack.c.bf16 %v639_v4, %v639_v4  ;;  %v754_v14 = vpack.c.bf16 %v633_v10, %v633_v10 }
 0x11f   :  { %677 = vst.msk [vmem:[%s1154_s2 + $0x10] sm:$0xf] %vm672_vm1, %v757_v11  ;;  %676 = vst.msk [vmem:[%s1154_s2 + $0xc] sm:$0xf] %vm672_vm1, %v756_v12  ;;  %v758_v15 = vpack.c.bf16 %v637_v13, %v637_v13 }
 0x120   :  { %680 = vst.msk [vmem:[%s1154_s2 + $0x1c] sm:$0xf] %vm672_vm1, %v760_v5  ;;  %674 = vst.msk [vmem:[%s1154_s2 + $0x4] sm:$0xf] %vm672_vm1, %v754_v14 }
 0x121   :  { %678 = vst.msk [vmem:[%s1154_s2 + $0x14] sm:$0xf] %vm672_vm1, %v758_v15 }

// kernel: dqn_forward.7
= control target key start
LH: loop header
LB: loop body
LE: loop exit
PB: predicated region body
PF: predicated region fallthrough
CT: control target
= control target key end

     0   :  { %12 = vsyncpa [#allocation4], 0  ;;  %s6823_s0 = inlined_call_operand.vmem [shape: bf16[2,3136], index: 0, kind: input, shape index: {}]   ;;  %s6824_s1 = inlined_call_operand.vmem [shape: bf16[3136,512], index: 1, kind: input, shape index: {}]   ;;  %s6825_s2 = inlined_call_operand.vmem [shape: f32[1,512], index: 2, kind: input, shape index: {}]   ;;  %s6826_s3 = inlined_call_operand.vmem [shape: f32[512,6], index: 3, kind: input, shape index: {}]   ;;  %s6827_s4 = inlined_call_operand.vmem [shape: f32[1,6], index: 4, kind: input, shape index: {}]   ;;  %s6828_s5 = inlined_call_operand.hbm [shape: f32[2,6], index: 5, kind: output, shape index: {0}]   ;;  %s6829_s6 = inlined_call_operand.hbm [shape: f32[2,512], index: 6, kind: output, shape index: {1}]  }
   0x1   :  { %13 = vsyncpa [#allocation6], 0  ;;  %s5479_s21 = smov 0   ;;  %s5481_s22 = smov 0  }
   0x2   :  { %s5483_s23 = smov 0  }
   0x3 LB: > { %s5495_s24 = sadd.s32 4294967295, %s5436_s23   ;;  %s5498_s25 = sadd.s32 1, %s5436_s23   ;;  %s5436_s23 = sphi %s5483_s23, %s6832_s23   ;;  %s5432_s22 = sphi %s5481_s22, %s6831_s22   ;;  %s5428_s21 = sphi %s5479_s21, %s6830_s21  }
   0x4   : > { %s44_s26 = ssub.s32 %s5436_s23, %s5498_s25  ;;  %s47_s27 = sadd.s32 1, %s5432_s22 }
   0x5   : > { %p45_p0 = scmp.eq.s32.totalorder %s44_s26, 0  ;;  %p54_p1 = scmp.ne.s32.totalorder %s5432_s22, %s5428_s21 }
   0x6   : > { %p55_p2 = scmp.eq.s32.totalorder %s5436_s23, 0  ;;  %p4483_p4 = scmp.ge.s32.totalorder %s5436_s23, 4 }
   0x7   : > { %s5507_s28 = scalar_select %p45_p0, %s5432_s22, %s47_s27  }
   0x8   : > { %p56_p3 = por %p55_p2, %p54_p1  ;;  %199 = sbr.rel (%p4483_p4) target bundleno = 280 (0x118), region = 28 }
   0xf   : > { %202 = sbr.rel (!%p56_p3) target bundleno = 280 (0x118), region = 32  ;;  %s204_s29 = sand.u32 (%p56_p3), 1, %s5432_s22  }
  0x10   : > { %s4484_s30 = sshll.u32 (%p56_p3), %s5436_s23, 2  ;;  %s5110_s7 = smul.u32 (%p56_p3), 1568, %s204_s29 }
  0x11   : > { %s5515_s10 = scalar_lea.vmem (%p56_p3), %s6824_s1, %s4484_s30 }
  0x12   : > { %v224_v0 = vld [vmem:[%s5515_s10] sm:$0xf] (%p56_p3)  ;;  %v226_v1 = vld [vmem:[%s5515_s10 + $0x10] sm:$0xf] (%p56_p3)  ;;  %s5522_s11 = scalar_lea.vmem (%p56_p3), [#allocation2], %s5110_s7 }
  0x13   : > { %v228_v2 = vld [vmem:[%s5515_s10 + $0x20] sm:$0xf] (%p56_p3)  ;;  %v230_v3 = vld [vmem:[%s5515_s10 + $0x30] sm:$0xf] (%p56_p3)  ;;  %225 = vst [vmem:[%s5522_s11] sm:$0xf] (%p56_p3), %v224_v0 }
  0x14   : > { %v232_v4 = vld [vmem:[%s5515_s10 + $0x40] sm:$0xf] (%p56_p3)  ;;  %227 = vst [vmem:[%s5522_s11 + $0x4] sm:$0xf] (%p56_p3), %v226_v1  ;;  %229 = vst [vmem:[%s5522_s11 + $0x8] sm:$0xf] (%p56_p3), %v228_v2 }
  0x15   : > { %231 = vst [vmem:[%s5522_s11 + $0xc] sm:$0xf] (%p56_p3), %v230_v3  ;;  %233 = vst [vmem:[%s5522_s11 + $0x10] sm:$0xf] (%p56_p3), %v232_v4  ;;  %v234_v5 = vld [vmem:[%s5515_s10 + $0x50] sm:$0xf] (%p56_p3) }
  0x16   : > { %v236_v6 = vld [vmem:[%s5515_s10 + $0x60] sm:$0xf]  ;;  %v238_v7 = vld [vmem:[%s5515_s10 + $0x70] sm:$0xf]  ;;  %235 = vst [vmem:[%s5522_s11 + $0x14] sm:$0xf] %v234_v5 }
  0x17   : > { %237 = vst [vmem:[%s5522_s11 + $0x18] sm:$0xf] %v236_v6  ;;  %239 = vst [vmem:[%s5522_s11 + $0x1c] sm:$0xf] %v238_v7  ;;  %v240_v8 = vld [vmem:[%s5515_s10 + $0x80] sm:$0xf] }
  0x18   : > { %v242_v9 = vld [vmem:[%s5515_s10 + $0x90] sm:$0xf]  ;;  %v244_v10 = vld [vmem:[%s5515_s10 + $0xa0] sm:$0xf]  ;;  %241 = vst [vmem:[%s5522_s11 + $0x20] sm:$0xf] %v240_v8 }
  0x19   : > { %243 = vst [vmem:[%s5522_s11 + $0x24] sm:$0xf] %v242_v9  ;;  %245 = vst [vmem:[%s5522_s11 + $0x28] sm:$0xf] %v244_v10  ;;  %v246_v11 = vld [vmem:[%s5515_s10 + $0xb0] sm:$0xf] }
  0x1a   : > { %v248_v12 = vld [vmem:[%s5515_s10 + $0xc0] sm:$0xf]  ;;  %v250_v13 = vld [vmem:[%s5515_s10 + $0xd0] sm:$0xf]  ;;  %247 = vst [vmem:[%s5522_s11 + $0x2c] sm:$0xf] %v246_v11 }
  0x1b   : > { %249 = vst [vmem:[%s5522_s11 + $0x30] sm:$0xf] %v248_v12  ;;  %251 = vst [vmem:[%s5522_s11 + $0x34] sm:$0xf] %v250_v13  ;;  %v252_v14 = vld [vmem:[%s5515_s10 + $0xe0] sm:$0xf] }
  0x1c   : > { %v254_v15 = vld [vmem:[%s5515_s10 + $0xf0] sm:$0xf]  ;;  %v256_v16 = vld [vmem:[%s5515_s10 + $0x100] sm:$0xf]  ;;  %253 = vst [vmem:[%s5522_s11 + $0x38] sm:$0xf] %v252_v14 }
  0x1d   : > { %255 = vst [vmem:[%s5522_s11 + $0x3c] sm:$0xf] %v254_v15  ;;  %257 = vst [vmem:[%s5522_s11 + $0x40] sm:$0xf] %v256_v16  ;;  %v258_v17 = vld [vmem:[%s5515_s10 + $0x110] sm:$0xf] }
  0x1e   : > { %v260_v18 = vld [vmem:[%s5515_s10 + $0x120] sm:$0xf]  ;;  %v262_v19 = vld [vmem:[%s5515_s10 + $0x130] sm:$0xf]  ;;  %259 = vst [vmem:[%s5522_s11 + $0x44] sm:$0xf] %v258_v17 }
  0x1f   : > { %261 = vst [vmem:[%s5522_s11 + $0x48] sm:$0xf] %v260_v18  ;;  %263 = vst [vmem:[%s5522_s11 + $0x4c] sm:$0xf] %v262_v19  ;;  %v264_v20 = vld [vmem:[%s5515_s10 + $0x140] sm:$0xf] }
  0x20   : > { %v266_v21 = vld [vmem:[%s5515_s10 + $0x150] sm:$0xf]  ;;  %v268_v22 = vld [vmem:[%s5515_s10 + $0x160] sm:$0xf]  ;;  %265 = vst [vmem:[%s5522_s11 + $0x50] sm:$0xf] %v264_v20 }
  0x21   : > { %267 = vst [vmem:[%s5522_s11 + $0x54] sm:$0xf] %v266_v21  ;;  %269 = vst [vmem:[%s5522_s11 + $0x58] sm:$0xf] %v268_v22  ;;  %v270_v23 = vld [vmem:[%s5515_s10 + $0x170] sm:$0xf] }
  0x22   : > { %v272_v24 = vld [vmem:[%s5515_s10 + $0x180] sm:$0xf]  ;;  %v274_v25 = vld [vmem:[%s5515_s10 + $0x190] sm:$0xf]  ;;  %271 = vst [vmem:[%s5522_s11 + $0x5c] sm:$0xf] %v270_v23 }
  0x23   : > { %273 = vst [vmem:[%s5522_s11 + $0x60] sm:$0xf] %v272_v24  ;;  %275 = vst [vmem:[%s5522_s11 + $0x64] sm:$0xf] %v274_v25  ;;  %v276_v26 = vld [vmem:[%s5515_s10 + $0x1a0] sm:$0xf] }
  0x24   : > { %v278_v27 = vld [vmem:[%s5515_s10 + $0x1b0] sm:$0xf]  ;;  %v280_v28 = vld [vmem:[%s5515_s10 + $0x1c0] sm:$0xf]  ;;  %277 = vst [vmem:[%s5522_s11 + $0x68] sm:$0xf] %v276_v26 }
  0x25   : > { %279 = vst [vmem:[%s5522_s11 + $0x6c] sm:$0xf] %v278_v27  ;;  %281 = vst [vmem:[%s5522_s11 + $0x70] sm:$0xf] %v280_v28  ;;  %v282_v29 = vld [vmem:[%s5515_s10 + $0x1d0] sm:$0xf] }
  0x26   : > { %v284_v30 = vld [vmem:[%s5515_s10 + $0x1e0] sm:$0xf]  ;;  %v286_v31 = vld [vmem:[%s5515_s10 + $0x1f0] sm:$0xf]  ;;  %283 = vst [vmem:[%s5522_s11 + $0x74] sm:$0xf] %v282_v29 }
  0x27   : > { %285 = vst [vmem:[%s5522_s11 + $0x78] sm:$0xf] %v284_v30  ;;  %287 = vst [vmem:[%s5522_s11 + $0x7c] sm:$0xf] %v286_v31  ;;  %v288_v32 = vld [vmem:[%s5515_s10 + $0x200] sm:$0xf] }
  0x28   : > { %v290_v33 = vld [vmem:[%s5515_s10 + $0x210] sm:$0xf]  ;;  %v292_v34 = vld [vmem:[%s5515_s10 + $0x220] sm:$0xf]  ;;  %289 = vst [vmem:[%s5522_s11 + $0x80] sm:$0xf] %v288_v32 }
  0x29   : > { %291 = vst [vmem:[%s5522_s11 + $0x84] sm:$0xf] %v290_v33  ;;  %293 = vst [vmem:[%s5522_s11 + $0x88] sm:$0xf] %v292_v34  ;;  %v294_v35 = vld [vmem:[%s5515_s10 + $0x230] sm:$0xf] }
  0x2a   : > { %v296_v36 = vld [vmem:[%s5515_s10 + $0x240] sm:$0xf]  ;;  %v298_v37 = vld [vmem:[%s5515_s10 + $0x250] sm:$0xf]  ;;  %295 = vst [vmem:[%s5522_s11 + $0x8c] sm:$0xf] %v294_v35 }
  0x2b   : > { %297 = vst [vmem:[%s5522_s11 + $0x90] sm:$0xf] %v296_v36  ;;  %299 = vst [vmem:[%s5522_s11 + $0x94] sm:$0xf] %v298_v37  ;;  %v300_v38 = vld [vmem:[%s5515_s10 + $0x260] sm:$0xf] }
  0x2c   : > { %v302_v39 = vld [vmem:[%s5515_s10 + $0x270] sm:$0xf]  ;;  %v304_v40 = vld [vmem:[%s5515_s10 + $0x280] sm:$0xf]  ;;  %301 = vst [vmem:[%s5522_s11 + $0x98] sm:$0xf] %v300_v38 }
  0x2d   : > { %303 = vst [vmem:[%s5522_s11 + $0x9c] sm:$0xf] %v302_v39  ;;  %305 = vst [vmem:[%s5522_s11 + $0xa0] sm:$0xf] %v304_v40  ;;  %v306_v41 = vld [vmem:[%s5515_s10 + $0x290] sm:$0xf] }
  0x2e   : > { %v308_v42 = vld [vmem:[%s5515_s10 + $0x2a0] sm:$0xf]  ;;  %v310_v43 = vld [vmem:[%s5515_s10 + $0x2b0] sm:$0xf]  ;;  %307 = vst [vmem:[%s5522_s11 + $0xa4] sm:$0xf] %v306_v41 }
  0x2f   : > { %309 = vst [vmem:[%s5522_s11 + $0xa8] sm:$0xf] %v308_v42  ;;  %311 = vst [vmem:[%s5522_s11 + $0xac] sm:$0xf] %v310_v43  ;;  %v312_v44 = vld [vmem:[%s5515_s10 + $0x2c0] sm:$0xf] }
  0x30   : > { %v314_v45 = vld [vmem:[%s5515_s10 + $0x2d0] sm:$0xf]  ;;  %v316_v46 = vld [vmem:[%s5515_s10 + $0x2e0] sm:$0xf]  ;;  %313 = vst [vmem:[%s5522_s11 + $0xb0] sm:$0xf] %v312_v44 }
  0x31   : > { %315 = vst [vmem:[%s5522_s11 + $0xb4] sm:$0xf] %v314_v45  ;;  %317 = vst [vmem:[%s5522_s11 + $0xb8] sm:$0xf] %v316_v46  ;;  %v318_v47 = vld [vmem:[%s5515_s10 + $0x2f0] sm:$0xf] }
  0x32   : > { %v320_v48 = vld [vmem:[%s5515_s10 + $0x300] sm:$0xf]  ;;  %v322_v49 = vld [vmem:[%s5515_s10 + $0x310] sm:$0xf]  ;;  %319 = vst [vmem:[%s5522_s11 + $0xbc] sm:$0xf] %v318_v47 }
  0x33   : > { %321 = vst [vmem:[%s5522_s11 + $0xc0] sm:$0xf] %v320_v48  ;;  %323 = vst [vmem:[%s5522_s11 + $0xc4] sm:$0xf] %v322_v49  ;;  %v324_v50 = vld [vmem:[%s5515_s10 + $0x320] sm:$0xf] }
  0x34   : > { %v326_v51 = vld [vmem:[%s5515_s10 + $0x330] sm:$0xf]  ;;  %v328_v52 = vld [vmem:[%s5515_s10 + $0x340] sm:$0xf]  ;;  %325 = vst [vmem:[%s5522_s11 + $0xc8] sm:$0xf] %v324_v50 }
  0x35   : > { %327 = vst [vmem:[%s5522_s11 + $0xcc] sm:$0xf] %v326_v51  ;;  %329 = vst [vmem:[%s5522_s11 + $0xd0] sm:$0xf] %v328_v52  ;;  %v330_v53 = vld [vmem:[%s5515_s10 + $0x350] sm:$0xf] }
  0x36   : > { %v332_v54 = vld [vmem:[%s5515_s10 + $0x360] sm:$0xf]  ;;  %v334_v55 = vld [vmem:[%s5515_s10 + $0x370] sm:$0xf]  ;;  %331 = vst [vmem:[%s5522_s11 + $0xd4] sm:$0xf] %v330_v53 }
  0x37   : > { %333 = vst [vmem:[%s5522_s11 + $0xd8] sm:$0xf] %v332_v54  ;;  %335 = vst [vmem:[%s5522_s11 + $0xdc] sm:$0xf] %v334_v55  ;;  %v336_v56 = vld [vmem:[%s5515_s10 + $0x380] sm:$0xf] }
  0x38   : > { %v338_v57 = vld [vmem:[%s5515_s10 + $0x390] sm:$0xf]  ;;  %v340_v58 = vld [vmem:[%s5515_s10 + $0x3a0] sm:$0xf]  ;;  %337 = vst [vmem:[%s5522_s11 + $0xe0] sm:$0xf] %v336_v56 }
  0x39   : > { %339 = vst [vmem:[%s5522_s11 + $0xe4] sm:$0xf] %v338_v57  ;;  %341 = vst [vmem:[%s5522_s11 + $0xe8] sm:$0xf] %v340_v58  ;;  %v342_v59 = vld [vmem:[%s5515_s10 + $0x3b0] sm:$0xf] }
  0x3a   : > { %v344_v60 = vld [vmem:[%s5515_s10 + $0x3c0] sm:$0xf]  ;;  %v346_v61 = vld [vmem:[%s5515_s10 + $0x3d0] sm:$0xf]  ;;  %343 = vst [vmem:[%s5522_s11 + $0xec] sm:$0xf] %v342_v59 }
  0x3b   : > { %345 = vst [vmem:[%s5522_s11 + $0xf0] sm:$0xf] %v344_v60  ;;  %347 = vst [vmem:[%s5522_s11 + $0xf4] sm:$0xf] %v346_v61  ;;  %v348_v62 = vld [vmem:[%s5515_s10 + $0x3e0] sm:$0xf] }
  0x3c   : > { %v350_v63 = vld [vmem:[%s5515_s10 + $0x3f0] sm:$0xf]  ;;  %v352_v0 = vld [vmem:[%s5515_s10 + $0x400] sm:$0xf]  ;;  %349 = vst [vmem:[%s5522_s11 + $0xf8] sm:$0xf] %v348_v62 }
  0x3d   : > { %351 = vst [vmem:[%s5522_s11 + $0xfc] sm:$0xf] %v350_v63  ;;  %353 = vst [vmem:[%s5522_s11 + $0x100] sm:$0xf] %v352_v0  ;;  %v354_v1 = vld [vmem:[%s5515_s10 + $0x410] sm:$0xf] }
  0x3e   : > { %v356_v2 = vld [vmem:[%s5515_s10 + $0x420] sm:$0xf]  ;;  %v358_v3 = vld [vmem:[%s5515_s10 + $0x430] sm:$0xf]  ;;  %355 = vst [vmem:[%s5522_s11 + $0x104] sm:$0xf] %v354_v1 }
  0x3f   : > { %357 = vst [vmem:[%s5522_s11 + $0x108] sm:$0xf] %v356_v2  ;;  %359 = vst [vmem:[%s5522_s11 + $0x10c] sm:$0xf] %v358_v3  ;;  %v360_v4 = vld [vmem:[%s5515_s10 + $0x440] sm:$0xf] }
  0x40   : > { %v362_v5 = vld [vmem:[%s5515_s10 + $0x450] sm:$0xf]  ;;  %v364_v6 = vld [vmem:[%s5515_s10 + $0x460] sm:$0xf]  ;;  %361 = vst [vmem:[%s5522_s11 + $0x110] sm:$0xf] %v360_v4 }
  0x41   : > { %363 = vst [vmem:[%s5522_s11 + $0x114] sm:$0xf] %v362_v5  ;;  %365 = vst [vmem:[%s5522_s11 + $0x118] sm:$0xf] %v364_v6  ;;  %v366_v7 = vld [vmem:[%s5515_s10 + $0x470] sm:$0xf] }
  0x42   : > { %v368_v8 = vld [vmem:[%s5515_s10 + $0x480] sm:$0xf]  ;;  %v370_v9 = vld [vmem:[%s5515_s10 + $0x490] sm:$0xf]  ;;  %367 = vst [vmem:[%s5522_s11 + $0x11c] sm:$0xf] %v366_v7 }
  0x43   : > { %369 = vst [vmem:[%s5522_s11 + $0x120] sm:$0xf] %v368_v8  ;;  %371 = vst [vmem:[%s5522_s11 + $0x124] sm:$0xf] %v370_v9  ;;  %v372_v10 = vld [vmem:[%s5515_s10 + $0x4a0] sm:$0xf] }
  0x44   : > { %v374_v11 = vld [vmem:[%s5515_s10 + $0x4b0] sm:$0xf]  ;;  %v376_v12 = vld [vmem:[%s5515_s10 + $0x4c0] sm:$0xf]  ;;  %373 = vst [vmem:[%s5522_s11 + $0x128] sm:$0xf] %v372_v10 }
  0x45   : > { %375 = vst [vmem:[%s5522_s11 + $0x12c] sm:$0xf] %v374_v11  ;;  %377 = vst [vmem:[%s5522_s11 + $0x130] sm:$0xf] %v376_v12  ;;  %v378_v13 = vld [vmem:[%s5515_s10 + $0x4d0] sm:$0xf] }
  0x46   : > { %v380_v14 = vld [vmem:[%s5515_s10 + $0x4e0] sm:$0xf]  ;;  %v382_v15 = vld [vmem:[%s5515_s10 + $0x4f0] sm:$0xf]  ;;  %379 = vst [vmem:[%s5522_s11 + $0x134] sm:$0xf] %v378_v13 }
  0x47   : > { %381 = vst [vmem:[%s5522_s11 + $0x138] sm:$0xf] %v380_v14  ;;  %383 = vst [vmem:[%s5522_s11 + $0x13c] sm:$0xf] %v382_v15  ;;  %v384_v16 = vld [vmem:[%s5515_s10 + $0x500] sm:$0xf] }
  0x48   : > { %v386_v17 = vld [vmem:[%s5515_s10 + $0x510] sm:$0xf]  ;;  %v388_v18 = vld [vmem:[%s5515_s10 + $0x520] sm:$0xf]  ;;  %385 = vst [vmem:[%s5522_s11 + $0x140] sm:$0xf] %v384_v16 }
  0x49   : > { %387 = vst [vmem:[%s5522_s11 + $0x144] sm:$0xf] %v386_v17  ;;  %389 = vst [vmem:[%s5522_s11 + $0x148] sm:$0xf] %v388_v18  ;;  %v390_v19 = vld [vmem:[%s5515_s10 + $0x530] sm:$0xf] }
  0x4a   : > { %v392_v20 = vld [vmem:[%s5515_s10 + $0x540] sm:$0xf]  ;;  %v394_v21 = vld [vmem:[%s5515_s10 + $0x550] sm:$0xf]  ;;  %391 = vst [vmem:[%s5522_s11 + $0x14c] sm:$0xf] %v390_v19 }
  0x4b   : > { %393 = vst [vmem:[%s5522_s11 + $0x150] sm:$0xf] %v392_v20  ;;  %395 = vst [vmem:[%s5522_s11 + $0x154] sm:$0xf] %v394_v21  ;;  %v396_v22 = vld [vmem:[%s5515_s10 + $0x560] sm:$0xf] }
  0x4c   : > { %v398_v23 = vld [vmem:[%s5515_s10 + $0x570] sm:$0xf]  ;;  %v400_v24 = vld [vmem:[%s5515_s10 + $0x580] sm:$0xf]  ;;  %397 = vst [vmem:[%s5522_s11 + $0x158] sm:$0xf] %v396_v22 }
  0x4d   : > { %399 = vst [vmem:[%s5522_s11 + $0x15c] sm:$0xf] %v398_v23  ;;  %401 = vst [vmem:[%s5522_s11 + $0x160] sm:$0xf] %v400_v24  ;;  %v402_v25 = vld [vmem:[%s5515_s10 + $0x590] sm:$0xf] }
  0x4e   : > { %v404_v26 = vld [vmem:[%s5515_s10 + $0x5a0] sm:$0xf]  ;;  %v406_v27 = vld [vmem:[%s5515_s10 + $0x5b0] sm:$0xf]  ;;  %403 = vst [vmem:[%s5522_s11 + $0x164] sm:$0xf] %v402_v25 }
  0x4f   : > { %405 = vst [vmem:[%s5522_s11 + $0x168] sm:$0xf] %v404_v26  ;;  %407 = vst [vmem:[%s5522_s11 + $0x16c] sm:$0xf] %v406_v27  ;;  %v408_v28 = vld [vmem:[%s5515_s10 + $0x5c0] sm:$0xf] }
  0x50   : > { %v410_v29 = vld [vmem:[%s5515_s10 + $0x5d0] sm:$0xf]  ;;  %v412_v30 = vld [vmem:[%s5515_s10 + $0x5e0] sm:$0xf]  ;;  %409 = vst [vmem:[%s5522_s11 + $0x170] sm:$0xf] %v408_v28 }
  0x51   : > { %411 = vst [vmem:[%s5522_s11 + $0x174] sm:$0xf] %v410_v29  ;;  %413 = vst [vmem:[%s5522_s11 + $0x178] sm:$0xf] %v412_v30  ;;  %v414_v31 = vld [vmem:[%s5515_s10 + $0x5f0] sm:$0xf] }
  0x52   : > { %v416_v32 = vld [vmem:[%s5515_s10 + $0x600] sm:$0xf]  ;;  %v418_v33 = vld [vmem:[%s5515_s10 + $0x610] sm:$0xf]  ;;  %415 = vst [vmem:[%s5522_s11 + $0x17c] sm:$0xf] %v414_v31 }
  0x53   : > { %417 = vst [vmem:[%s5522_s11 + $0x180] sm:$0xf] %v416_v32  ;;  %419 = vst [vmem:[%s5522_s11 + $0x184] sm:$0xf] %v418_v33  ;;  %v420_v34 = vld [vmem:[%s5515_s10 + $0x620] sm:$0xf] }
  0x54   : > { %v422_v35 = vld [vmem:[%s5515_s10 + $0x630] sm:$0xf]  ;;  %v424_v36 = vld [vmem:[%s5515_s10 + $0x640] sm:$0xf]  ;;  %421 = vst [vmem:[%s5522_s11 + $0x188] sm:$0xf] %v420_v34 }
  0x55   : > { %423 = vst [vmem:[%s5522_s11 + $0x18c] sm:$0xf] %v422_v35  ;;  %425 = vst [vmem:[%s5522_s11 + $0x190] sm:$0xf] %v424_v36  ;;  %v426_v37 = vld [vmem:[%s5515_s10 + $0x650] sm:$0xf] }
  0x56   : > { %v428_v38 = vld [vmem:[%s5515_s10 + $0x660] sm:$0xf]  ;;  %v430_v39 = vld [vmem:[%s5515_s10 + $0x670] sm:$0xf]  ;;  %427 = vst [vmem:[%s5522_s11 + $0x194] sm:$0xf] %v426_v37 }
  0x57   : > { %429 = vst [vmem:[%s5522_s11 + $0x198] sm:$0xf] %v428_v38  ;;  %431 = vst [vmem:[%s5522_s11 + $0x19c] sm:$0xf] %v430_v39  ;;  %v432_v40 = vld [vmem:[%s5515_s10 + $0x680] sm:$0xf] }
  0x58   : > { %v434_v41 = vld [vmem:[%s5515_s10 + $0x690] sm:$0xf]  ;;  %v436_v42 = vld [vmem:[%s5515_s10 + $0x6a0] sm:$0xf]  ;;  %433 = vst [vmem:[%s5522_s11 + $0x1a0] sm:$0xf] %v432_v40 }
  0x59   : > { %435 = vst [vmem:[%s5522_s11 + $0x1a4] sm:$0xf] %v434_v41  ;;  %437 = vst [vmem:[%s5522_s11 + $0x1a8] sm:$0xf] %v436_v42  ;;  %v438_v43 = vld [vmem:[%s5515_s10 + $0x6b0] sm:$0xf] }
  0x5a   : > { %v440_v44 = vld [vmem:[%s5515_s10 + $0x6c0] sm:$0xf]  ;;  %v442_v45 = vld [vmem:[%s5515_s10 + $0x6d0] sm:$0xf]  ;;  %439 = vst [vmem:[%s5522_s11 + $0x1ac] sm:$0xf] %v438_v43 }
  0x5b   : > { %441 = vst [vmem:[%s5522_s11 + $0x1b0] sm:$0xf] %v440_v44  ;;  %443 = vst [vmem:[%s5522_s11 + $0x1b4] sm:$0xf] %v442_v45  ;;  %v444_v46 = vld [vmem:[%s5515_s10 + $0x6e0] sm:$0xf] }
  0x5c   : > { %v446_v47 = vld [vmem:[%s5515_s10 + $0x6f0] sm:$0xf]  ;;  %v448_v48 = vld [vmem:[%s5515_s10 + $0x700] sm:$0xf]  ;;  %445 = vst [vmem:[%s5522_s11 + $0x1b8] sm:$0xf] %v444_v46 }
  0x5d   : > { %447 = vst [vmem:[%s5522_s11 + $0x1bc] sm:$0xf] %v446_v47  ;;  %449 = vst [vmem:[%s5522_s11 + $0x1c0] sm:$0xf] %v448_v48  ;;  %v450_v49 = vld [vmem:[%s5515_s10 + $0x710] sm:$0xf] }
  0x5e   : > { %v452_v50 = vld [vmem:[%s5515_s10 + $0x720] sm:$0xf]  ;;  %v454_v51 = vld [vmem:[%s5515_s10 + $0x730] sm:$0xf]  ;;  %451 = vst [vmem:[%s5522_s11 + $0x1c4] sm:$0xf] %v450_v49 }
  0x5f   : > { %453 = vst [vmem:[%s5522_s11 + $0x1c8] sm:$0xf] %v452_v50  ;;  %455 = vst [vmem:[%s5522_s11 + $0x1cc] sm:$0xf] %v454_v51  ;;  %v456_v52 = vld [vmem:[%s5515_s10 + $0x740] sm:$0xf] }
  0x60   : > { %v458_v53 = vld [vmem:[%s5515_s10 + $0x750] sm:$0xf]  ;;  %v460_v54 = vld [vmem:[%s5515_s10 + $0x760] sm:$0xf]  ;;  %457 = vst [vmem:[%s5522_s11 + $0x1d0] sm:$0xf] %v456_v52 }
  0x61   : > { %459 = vst [vmem:[%s5522_s11 + $0x1d4] sm:$0xf] %v458_v53  ;;  %461 = vst [vmem:[%s5522_s11 + $0x1d8] sm:$0xf] %v460_v54  ;;  %v462_v55 = vld [vmem:[%s5515_s10 + $0x770] sm:$0xf] }
  0x62   : > { %v464_v56 = vld [vmem:[%s5515_s10 + $0x780] sm:$0xf]  ;;  %v466_v57 = vld [vmem:[%s5515_s10 + $0x790] sm:$0xf]  ;;  %463 = vst [vmem:[%s5522_s11 + $0x1dc] sm:$0xf] %v462_v55 }
  0x63   : > { %465 = vst [vmem:[%s5522_s11 + $0x1e0] sm:$0xf] %v464_v56  ;;  %467 = vst [vmem:[%s5522_s11 + $0x1e4] sm:$0xf] %v466_v57  ;;  %v468_v58 = vld [vmem:[%s5515_s10 + $0x7a0] sm:$0xf] }
  0x64   : > { %v470_v59 = vld [vmem:[%s5515_s10 + $0x7b0] sm:$0xf]  ;;  %v472_v60 = vld [vmem:[%s5515_s10 + $0x7c0] sm:$0xf]  ;;  %469 = vst [vmem:[%s5522_s11 + $0x1e8] sm:$0xf] %v468_v58 }
  0x65   : > { %471 = vst [vmem:[%s5522_s11 + $0x1ec] sm:$0xf] %v470_v59  ;;  %473 = vst [vmem:[%s5522_s11 + $0x1f0] sm:$0xf] %v472_v60  ;;  %v474_v61 = vld [vmem:[%s5515_s10 + $0x7d0] sm:$0xf] }
  0x66   : > { %v476_v62 = vld [vmem:[%s5515_s10 + $0x7e0] sm:$0xf]  ;;  %v478_v63 = vld [vmem:[%s5515_s10 + $0x7f0] sm:$0xf]  ;;  %475 = vst [vmem:[%s5522_s11 + $0x1f4] sm:$0xf] %v474_v61 }
  0x67   : > { %477 = vst [vmem:[%s5522_s11 + $0x1f8] sm:$0xf] %v476_v62  ;;  %479 = vst [vmem:[%s5522_s11 + $0x1fc] sm:$0xf] %v478_v63  ;;  %v480_v0 = vld [vmem:[%s5515_s10 + $0x800] sm:$0xf] }
  0x68   : > { %v482_v1 = vld [vmem:[%s5515_s10 + $0x810] sm:$0xf]  ;;  %v484_v2 = vld [vmem:[%s5515_s10 + $0x820] sm:$0xf]  ;;  %481 = vst [vmem:[%s5522_s11 + $0x200] sm:$0xf] %v480_v0 }
  0x69   : > { %483 = vst [vmem:[%s5522_s11 + $0x204] sm:$0xf] %v482_v1  ;;  %485 = vst [vmem:[%s5522_s11 + $0x208] sm:$0xf] %v484_v2  ;;  %v486_v3 = vld [vmem:[%s5515_s10 + $0x830] sm:$0xf] }
  0x6a   : > { %v488_v4 = vld [vmem:[%s5515_s10 + $0x840] sm:$0xf]  ;;  %v490_v5 = vld [vmem:[%s5515_s10 + $0x850] sm:$0xf]  ;;  %487 = vst [vmem:[%s5522_s11 + $0x20c] sm:$0xf] %v486_v3 }
  0x6b   : > { %489 = vst [vmem:[%s5522_s11 + $0x210] sm:$0xf] %v488_v4  ;;  %491 = vst [vmem:[%s5522_s11 + $0x214] sm:$0xf] %v490_v5  ;;  %v492_v6 = vld [vmem:[%s5515_s10 + $0x860] sm:$0xf] }
  0x6c   : > { %v494_v7 = vld [vmem:[%s5515_s10 + $0x870] sm:$0xf]  ;;  %v496_v8 = vld [vmem:[%s5515_s10 + $0x880] sm:$0xf]  ;;  %493 = vst [vmem:[%s5522_s11 + $0x218] sm:$0xf] %v492_v6 }
  0x6d   : > { %495 = vst [vmem:[%s5522_s11 + $0x21c] sm:$0xf] %v494_v7  ;;  %497 = vst [vmem:[%s5522_s11 + $0x220] sm:$0xf] %v496_v8  ;;  %v498_v9 = vld [vmem:[%s5515_s10 + $0x890] sm:$0xf] }
  0x6e   : > { %v500_v10 = vld [vmem:[%s5515_s10 + $0x8a0] sm:$0xf]  ;;  %v502_v11 = vld [vmem:[%s5515_s10 + $0x8b0] sm:$0xf]  ;;  %499 = vst [vmem:[%s5522_s11 + $0x224] sm:$0xf] %v498_v9 }
  0x6f   : > { %501 = vst [vmem:[%s5522_s11 + $0x228] sm:$0xf] %v500_v10  ;;  %503 = vst [vmem:[%s5522_s11 + $0x22c] sm:$0xf] %v502_v11  ;;  %v504_v12 = vld [vmem:[%s5515_s10 + $0x8c0] sm:$0xf] }
  0x70   : > { %v506_v13 = vld [vmem:[%s5515_s10 + $0x8d0] sm:$0xf]  ;;  %v508_v14 = vld [vmem:[%s5515_s10 + $0x8e0] sm:$0xf]  ;;  %505 = vst [vmem:[%s5522_s11 + $0x230] sm:$0xf] %v504_v12 }
  0x71   : > { %507 = vst [vmem:[%s5522_s11 + $0x234] sm:$0xf] %v506_v13  ;;  %509 = vst [vmem:[%s5522_s11 + $0x238] sm:$0xf] %v508_v14  ;;  %v510_v15 = vld [vmem:[%s5515_s10 + $0x8f0] sm:$0xf] }
  0x72   : > { %v512_v16 = vld [vmem:[%s5515_s10 + $0x900] sm:$0xf]  ;;  %v514_v17 = vld [vmem:[%s5515_s10 + $0x910] sm:$0xf]  ;;  %511 = vst [vmem:[%s5522_s11 + $0x23c] sm:$0xf] %v510_v15 }
  0x73   : > { %513 = vst [vmem:[%s5522_s11 + $0x240] sm:$0xf] %v512_v16  ;;  %515 = vst [vmem:[%s5522_s11 + $0x244] sm:$0xf] %v514_v17  ;;  %v516_v18 = vld [vmem:[%s5515_s10 + $0x920] sm:$0xf] }
  0x74   : > { %v518_v19 = vld [vmem:[%s5515_s10 + $0x930] sm:$0xf]  ;;  %v520_v20 = vld [vmem:[%s5515_s10 + $0x940] sm:$0xf]  ;;  %517 = vst [vmem:[%s5522_s11 + $0x248] sm:$0xf] %v516_v18 }
  0x75   : > { %519 = vst [vmem:[%s5522_s11 + $0x24c] sm:$0xf] %v518_v19  ;;  %521 = vst [vmem:[%s5522_s11 + $0x250] sm:$0xf] %v520_v20  ;;  %v522_v21 = vld [vmem:[%s5515_s10 + $0x950] sm:$0xf] }
  0x76   : > { %v524_v22 = vld [vmem:[%s5515_s10 + $0x960] sm:$0xf]  ;;  %v526_v23 = vld [vmem:[%s5515_s10 + $0x970] sm:$0xf]  ;;  %523 = vst [vmem:[%s5522_s11 + $0x254] sm:$0xf] %v522_v21 }
  0x77   : > { %525 = vst [vmem:[%s5522_s11 + $0x258] sm:$0xf] %v524_v22  ;;  %527 = vst [vmem:[%s5522_s11 + $0x25c] sm:$0xf] %v526_v23  ;;  %v528_v24 = vld [vmem:[%s5515_s10 + $0x980] sm:$0xf] }
  0x78   : > { %v530_v25 = vld [vmem:[%s5515_s10 + $0x990] sm:$0xf]  ;;  %v532_v26 = vld [vmem:[%s5515_s10 + $0x9a0] sm:$0xf]  ;;  %529 = vst [vmem:[%s5522_s11 + $0x260] sm:$0xf] %v528_v24 }
  0x79   : > { %531 = vst [vmem:[%s5522_s11 + $0x264] sm:$0xf] %v530_v25  ;;  %533 = vst [vmem:[%s5522_s11 + $0x268] sm:$0xf] %v532_v26  ;;  %v534_v27 = vld [vmem:[%s5515_s10 + $0x9b0] sm:$0xf] }
  0x7a   : > { %v536_v28 = vld [vmem:[%s5515_s10 + $0x9c0] sm:$0xf]  ;;  %v538_v29 = vld [vmem:[%s5515_s10 + $0x9d0] sm:$0xf]  ;;  %535 = vst [vmem:[%s5522_s11 + $0x26c] sm:$0xf] %v534_v27 }
  0x7b   : > { %537 = vst [vmem:[%s5522_s11 + $0x270] sm:$0xf] %v536_v28  ;;  %539 = vst [vmem:[%s5522_s11 + $0x274] sm:$0xf] %v538_v29  ;;  %v540_v30 = vld [vmem:[%s5515_s10 + $0x9e0] sm:$0xf] }
  0x7c   : > { %v542_v31 = vld [vmem:[%s5515_s10 + $0x9f0] sm:$0xf]  ;;  %v544_v32 = vld [vmem:[%s5515_s10 + $0xa00] sm:$0xf]  ;;  %541 = vst [vmem:[%s5522_s11 + $0x278] sm:$0xf] %v540_v30 }
  0x7d   : > { %543 = vst [vmem:[%s5522_s11 + $0x27c] sm:$0xf] %v542_v31  ;;  %545 = vst [vmem:[%s5522_s11 + $0x280] sm:$0xf] %v544_v32  ;;  %v546_v33 = vld [vmem:[%s5515_s10 + $0xa10] sm:$0xf] }
  0x7e   : > { %v548_v34 = vld [vmem:[%s5515_s10 + $0xa20] sm:$0xf]  ;;  %v550_v35 = vld [vmem:[%s5515_s10 + $0xa30] sm:$0xf]  ;;  %547 = vst [vmem:[%s5522_s11 + $0x284] sm:$0xf] %v546_v33 }
  0x7f   : > { %549 = vst [vmem:[%s5522_s11 + $0x288] sm:$0xf] %v548_v34  ;;  %551 = vst [vmem:[%s5522_s11 + $0x28c] sm:$0xf] %v550_v35  ;;  %v552_v36 = vld [vmem:[%s5515_s10 + $0xa40] sm:$0xf] }
  0x80   : > { %v554_v37 = vld [vmem:[%s5515_s10 + $0xa50] sm:$0xf]  ;;  %v556_v38 = vld [vmem:[%s5515_s10 + $0xa60] sm:$0xf]  ;;  %553 = vst [vmem:[%s5522_s11 + $0x290] sm:$0xf] %v552_v36 }
  0x81   : > { %555 = vst [vmem:[%s5522_s11 + $0x294] sm:$0xf] %v554_v37  ;;  %557 = vst [vmem:[%s5522_s11 + $0x298] sm:$0xf] %v556_v38  ;;  %v558_v39 = vld [vmem:[%s5515_s10 + $0xa70] sm:$0xf] }
  0x82   : > { %v560_v40 = vld [vmem:[%s5515_s10 + $0xa80] sm:$0xf]  ;;  %v562_v41 = vld [vmem:[%s5515_s10 + $0xa90] sm:$0xf]  ;;  %559 = vst [vmem:[%s5522_s11 + $0x29c] sm:$0xf] %v558_v39 }
  0x83   : > { %561 = vst [vmem:[%s5522_s11 + $0x2a0] sm:$0xf] %v560_v40  ;;  %563 = vst [vmem:[%s5522_s11 + $0x2a4] sm:$0xf] %v562_v41  ;;  %v564_v42 = vld [vmem:[%s5515_s10 + $0xaa0] sm:$0xf] }
  0x84   : > { %v566_v43 = vld [vmem:[%s5515_s10 + $0xab0] sm:$0xf]  ;;  %v568_v44 = vld [vmem:[%s5515_s10 + $0xac0] sm:$0xf]  ;;  %565 = vst [vmem:[%s5522_s11 + $0x2a8] sm:$0xf] %v564_v42 }
  0x85   : > { %567 = vst [vmem:[%s5522_s11 + $0x2ac] sm:$0xf] %v566_v43  ;;  %569 = vst [vmem:[%s5522_s11 + $0x2b0] sm:$0xf] %v568_v44  ;;  %v570_v45 = vld [vmem:[%s5515_s10 + $0xad0] sm:$0xf] }
  0x86   : > { %v572_v46 = vld [vmem:[%s5515_s10 + $0xae0] sm:$0xf]  ;;  %v574_v47 = vld [vmem:[%s5515_s10 + $0xaf0] sm:$0xf]  ;;  %571 = vst [vmem:[%s5522_s11 + $0x2b4] sm:$0xf] %v570_v45 }
  0x87   : > { %573 = vst [vmem:[%s5522_s11 + $0x2b8] sm:$0xf] %v572_v46  ;;  %575 = vst [vmem:[%s5522_s11 + $0x2bc] sm:$0xf] %v574_v47  ;;  %v576_v48 = vld [vmem:[%s5515_s10 + $0xb00] sm:$0xf] }
  0x88   : > { %v578_v49 = vld [vmem:[%s5515_s10 + $0xb10] sm:$0xf]  ;;  %v580_v50 = vld [vmem:[%s5515_s10 + $0xb20] sm:$0xf]  ;;  %577 = vst [vmem:[%s5522_s11 + $0x2c0] sm:$0xf] %v576_v48 }
  0x89   : > { %579 = vst [vmem:[%s5522_s11 + $0x2c4] sm:$0xf] %v578_v49  ;;  %581 = vst [vmem:[%s5522_s11 + $0x2c8] sm:$0xf] %v580_v50  ;;  %v582_v51 = vld [vmem:[%s5515_s10 + $0xb30] sm:$0xf] }
  0x8a   : > { %v584_v52 = vld [vmem:[%s5515_s10 + $0xb40] sm:$0xf]  ;;  %v586_v53 = vld [vmem:[%s5515_s10 + $0xb50] sm:$0xf]  ;;  %583 = vst [vmem:[%s5522_s11 + $0x2cc] sm:$0xf] %v582_v51 }
  0x8b   : > { %585 = vst [vmem:[%s5522_s11 + $0x2d0] sm:$0xf] %v584_v52  ;;  %587 = vst [vmem:[%s5522_s11 + $0x2d4] sm:$0xf] %v586_v53  ;;  %v588_v54 = vld [vmem:[%s5515_s10 + $0xb60] sm:$0xf] }
  0x8c   : > { %v590_v55 = vld [vmem:[%s5515_s10 + $0xb70] sm:$0xf]  ;;  %v592_v56 = vld [vmem:[%s5515_s10 + $0xb80] sm:$0xf]  ;;  %589 = vst [vmem:[%s5522_s11 + $0x2d8] sm:$0xf] %v588_v54 }
  0x8d   : > { %591 = vst [vmem:[%s5522_s11 + $0x2dc] sm:$0xf] %v590_v55  ;;  %593 = vst [vmem:[%s5522_s11 + $0x2e0] sm:$0xf] %v592_v56  ;;  %v594_v57 = vld [vmem:[%s5515_s10 + $0xb90] sm:$0xf] }
  0x8e   : > { %v596_v58 = vld [vmem:[%s5515_s10 + $0xba0] sm:$0xf]  ;;  %v598_v59 = vld [vmem:[%s5515_s10 + $0xbb0] sm:$0xf]  ;;  %595 = vst [vmem:[%s5522_s11 + $0x2e4] sm:$0xf] %v594_v57 }
  0x8f   : > { %597 = vst [vmem:[%s5522_s11 + $0x2e8] sm:$0xf] %v596_v58  ;;  %599 = vst [vmem:[%s5522_s11 + $0x2ec] sm:$0xf] %v598_v59  ;;  %v600_v60 = vld [vmem:[%s5515_s10 + $0xbc0] sm:$0xf] }
  0x90   : > { %v602_v61 = vld [vmem:[%s5515_s10 + $0xbd0] sm:$0xf]  ;;  %v604_v62 = vld [vmem:[%s5515_s10 + $0xbe0] sm:$0xf]  ;;  %601 = vst [vmem:[%s5522_s11 + $0x2f0] sm:$0xf] %v600_v60 }
  0x91   : > { %603 = vst [vmem:[%s5522_s11 + $0x2f4] sm:$0xf] %v602_v61  ;;  %605 = vst [vmem:[%s5522_s11 + $0x2f8] sm:$0xf] %v604_v62  ;;  %v606_v63 = vld [vmem:[%s5515_s10 + $0xbf0] sm:$0xf] }
  0x92   : > { %v608_v0 = vld [vmem:[%s5515_s10 + $0xc00] sm:$0xf]  ;;  %v610_v1 = vld [vmem:[%s5515_s10 + $0xc10] sm:$0xf]  ;;  %607 = vst [vmem:[%s5522_s11 + $0x2fc] sm:$0xf] %v606_v63 }
  0x93   : > { %609 = vst [vmem:[%s5522_s11 + $0x300] sm:$0xf] %v608_v0  ;;  %611 = vst [vmem:[%s5522_s11 + $0x304] sm:$0xf] %v610_v1  ;;  %v612_v2 = vld [vmem:[%s5515_s10 + $0xc20] sm:$0xf] }
  0x94   : > { %v614_v3 = vld [vmem:[%s5515_s10 + $0xc30] sm:$0xf]  ;;  %v616_v4 = vld [vmem:[%s5515_s10 + $0xc40] sm:$0xf]  ;;  %613 = vst [vmem:[%s5522_s11 + $0x308] sm:$0xf] %v612_v2 }
  0x95   : > { %615 = vst [vmem:[%s5522_s11 + $0x30c] sm:$0xf] %v614_v3  ;;  %617 = vst [vmem:[%s5522_s11 + $0x310] sm:$0xf] %v616_v4  ;;  %v618_v5 = vld [vmem:[%s5515_s10 + $0xc50] sm:$0xf] }
  0x96   : > { %v620_v6 = vld [vmem:[%s5515_s10 + $0xc60] sm:$0xf]  ;;  %v622_v7 = vld [vmem:[%s5515_s10 + $0xc70] sm:$0xf]  ;;  %619 = vst [vmem:[%s5522_s11 + $0x314] sm:$0xf] %v618_v5 }
  0x97   : > { %621 = vst [vmem:[%s5522_s11 + $0x318] sm:$0xf] %v620_v6  ;;  %623 = vst [vmem:[%s5522_s11 + $0x31c] sm:$0xf] %v622_v7  ;;  %v624_v8 = vld [vmem:[%s5515_s10 + $0xc80] sm:$0xf] }
  0x98   : > { %v626_v9 = vld [vmem:[%s5515_s10 + $0xc90] sm:$0xf]  ;;  %v628_v10 = vld [vmem:[%s5515_s10 + $0xca0] sm:$0xf]  ;;  %625 = vst [vmem:[%s5522_s11 + $0x320] sm:$0xf] %v624_v8 }
  0x99   : > { %627 = vst [vmem:[%s5522_s11 + $0x324] sm:$0xf] %v626_v9  ;;  %629 = vst [vmem:[%s5522_s11 + $0x328] sm:$0xf] %v628_v10  ;;  %v630_v11 = vld [vmem:[%s5515_s10 + $0xcb0] sm:$0xf] }
  0x9a   : > { %v632_v12 = vld [vmem:[%s5515_s10 + $0xcc0] sm:$0xf]  ;;  %v634_v13 = vld [vmem:[%s5515_s10 + $0xcd0] sm:$0xf]  ;;  %631 = vst [vmem:[%s5522_s11 + $0x32c] sm:$0xf] %v630_v11 }
  0x9b   : > { %633 = vst [vmem:[%s5522_s11 + $0x330] sm:$0xf] %v632_v12  ;;  %635 = vst [vmem:[%s5522_s11 + $0x334] sm:$0xf] %v634_v13  ;;  %v636_v14 = vld [vmem:[%s5515_s10 + $0xce0] sm:$0xf] }
  0x9c   : > { %v638_v15 = vld [vmem:[%s5515_s10 + $0xcf0] sm:$0xf]  ;;  %v640_v16 = vld [vmem:[%s5515_s10 + $0xd00] sm:$0xf]  ;;  %637 = vst [vmem:[%s5522_s11 + $0x338] sm:$0xf] %v636_v14 }
  0x9d   : > { %639 = vst [vmem:[%s5522_s11 + $0x33c] sm:$0xf] %v638_v15  ;;  %641 = vst [vmem:[%s5522_s11 + $0x340] sm:$0xf] %v640_v16  ;;  %v642_v17 = vld [vmem:[%s5515_s10 + $0xd10] sm:$0xf] }
  0x9e   : > { %v644_v18 = vld [vmem:[%s5515_s10 + $0xd20] sm:$0xf]  ;;  %v646_v19 = vld [vmem:[%s5515_s10 + $0xd30] sm:$0xf]  ;;  %643 = vst [vmem:[%s5522_s11 + $0x344] sm:$0xf] %v642_v17 }
  0x9f   : > { %645 = vst [vmem:[%s5522_s11 + $0x348] sm:$0xf] %v644_v18  ;;  %647 = vst [vmem:[%s5522_s11 + $0x34c] sm:$0xf] %v646_v19  ;;  %v648_v20 = vld [vmem:[%s5515_s10 + $0xd40] sm:$0xf] }
  0xa0   : > { %v650_v21 = vld [vmem:[%s5515_s10 + $0xd50] sm:$0xf]  ;;  %v652_v22 = vld [vmem:[%s5515_s10 + $0xd60] sm:$0xf]  ;;  %649 = vst [vmem:[%s5522_s11 + $0x350] sm:$0xf] %v648_v20 }
  0xa1   : > { %651 = vst [vmem:[%s5522_s11 + $0x354] sm:$0xf] %v650_v21  ;;  %653 = vst [vmem:[%s5522_s11 + $0x358] sm:$0xf] %v652_v22  ;;  %v654_v23 = vld [vmem:[%s5515_s10 + $0xd70] sm:$0xf] }
  0xa2   : > { %v656_v24 = vld [vmem:[%s5515_s10 + $0xd80] sm:$0xf]  ;;  %v658_v25 = vld [vmem:[%s5515_s10 + $0xd90] sm:$0xf]  ;;  %655 = vst [vmem:[%s5522_s11 + $0x35c] sm:$0xf] %v654_v23 }
  0xa3   : > { %657 = vst [vmem:[%s5522_s11 + $0x360] sm:$0xf] %v656_v24  ;;  %659 = vst [vmem:[%s5522_s11 + $0x364] sm:$0xf] %v658_v25  ;;  %v660_v26 = vld [vmem:[%s5515_s10 + $0xda0] sm:$0xf] }
  0xa4   : > { %v662_v27 = vld [vmem:[%s5515_s10 + $0xdb0] sm:$0xf]  ;;  %v664_v28 = vld [vmem:[%s5515_s10 + $0xdc0] sm:$0xf]  ;;  %661 = vst [vmem:[%s5522_s11 + $0x368] sm:$0xf] %v660_v26 }
  0xa5   : > { %663 = vst [vmem:[%s5522_s11 + $0x36c] sm:$0xf] %v662_v27  ;;  %665 = vst [vmem:[%s5522_s11 + $0x370] sm:$0xf] %v664_v28  ;;  %v666_v29 = vld [vmem:[%s5515_s10 + $0xdd0] sm:$0xf] }
  0xa6   : > { %v668_v30 = vld [vmem:[%s5515_s10 + $0xde0] sm:$0xf]  ;;  %v670_v31 = vld [vmem:[%s5515_s10 + $0xdf0] sm:$0xf]  ;;  %667 = vst [vmem:[%s5522_s11 + $0x374] sm:$0xf] %v666_v29 }
  0xa7   : > { %669 = vst [vmem:[%s5522_s11 + $0x378] sm:$0xf] %v668_v30  ;;  %671 = vst [vmem:[%s5522_s11 + $0x37c] sm:$0xf] %v670_v31  ;;  %v672_v32 = vld [vmem:[%s5515_s10 + $0xe00] sm:$0xf] }
  0xa8   : > { %v674_v33 = vld [vmem:[%s5515_s10 + $0xe10] sm:$0xf]  ;;  %v676_v34 = vld [vmem:[%s5515_s10 + $0xe20] sm:$0xf]  ;;  %673 = vst [vmem:[%s5522_s11 + $0x380] sm:$0xf] %v672_v32 }
  0xa9   : > { %675 = vst [vmem:[%s5522_s11 + $0x384] sm:$0xf] %v674_v33  ;;  %677 = vst [vmem:[%s5522_s11 + $0x388] sm:$0xf] %v676_v34  ;;  %v678_v35 = vld [vmem:[%s5515_s10 + $0xe30] sm:$0xf] }
  0xaa   : > { %v680_v36 = vld [vmem:[%s5515_s10 + $0xe40] sm:$0xf]  ;;  %v682_v37 = vld [vmem:[%s5515_s10 + $0xe50] sm:$0xf]  ;;  %679 = vst [vmem:[%s5522_s11 + $0x38c] sm:$0xf] %v678_v35 }
  0xab   : > { %681 = vst [vmem:[%s5522_s11 + $0x390] sm:$0xf] %v680_v36  ;;  %683 = vst [vmem:[%s5522_s11 + $0x394] sm:$0xf] %v682_v37  ;;  %v684_v38 = vld [vmem:[%s5515_s10 + $0xe60] sm:$0xf] }
  0xac   : > { %v686_v39 = vld [vmem:[%s5515_s10 + $0xe70] sm:$0xf]  ;;  %v688_v40 = vld [vmem:[%s5515_s10 + $0xe80] sm:$0xf]  ;;  %685 = vst [vmem:[%s5522_s11 + $0x398] sm:$0xf] %v684_v38 }
  0xad   : > { %687 = vst [vmem:[%s5522_s11 + $0x39c] sm:$0xf] %v686_v39  ;;  %689 = vst [vmem:[%s5522_s11 + $0x3a0] sm:$0xf] %v688_v40  ;;  %v690_v41 = vld [vmem:[%s5515_s10 + $0xe90] sm:$0xf] }
  0xae   : > { %v692_v42 = vld [vmem:[%s5515_s10 + $0xea0] sm:$0xf]  ;;  %v694_v43 = vld [vmem:[%s5515_s10 + $0xeb0] sm:$0xf]  ;;  %691 = vst [vmem:[%s5522_s11 + $0x3a4] sm:$0xf] %v690_v41 }
  0xaf   : > { %693 = vst [vmem:[%s5522_s11 + $0x3a8] sm:$0xf] %v692_v42  ;;  %695 = vst [vmem:[%s5522_s11 + $0x3ac] sm:$0xf] %v694_v43  ;;  %v696_v44 = vld [vmem:[%s5515_s10 + $0xec0] sm:$0xf] }
  0xb0   : > { %v698_v45 = vld [vmem:[%s5515_s10 + $0xed0] sm:$0xf]  ;;  %v700_v46 = vld [vmem:[%s5515_s10 + $0xee0] sm:$0xf]  ;;  %697 = vst [vmem:[%s5522_s11 + $0x3b0] sm:$0xf] %v696_v44 }
  0xb1   : > { %699 = vst [vmem:[%s5522_s11 + $0x3b4] sm:$0xf] %v698_v45  ;;  %701 = vst [vmem:[%s5522_s11 + $0x3b8] sm:$0xf] %v700_v46  ;;  %v702_v47 = vld [vmem:[%s5515_s10 + $0xef0] sm:$0xf] }
  0xb2   : > { %v704_v48 = vld [vmem:[%s5515_s10 + $0xf00] sm:$0xf]  ;;  %v706_v49 = vld [vmem:[%s5515_s10 + $0xf10] sm:$0xf]  ;;  %703 = vst [vmem:[%s5522_s11 + $0x3bc] sm:$0xf] %v702_v47 }
  0xb3   : > { %705 = vst [vmem:[%s5522_s11 + $0x3c0] sm:$0xf] %v704_v48  ;;  %707 = vst [vmem:[%s5522_s11 + $0x3c4] sm:$0xf] %v706_v49  ;;  %v708_v50 = vld [vmem:[%s5515_s10 + $0xf20] sm:$0xf] }
  0xb4   : > { %v710_v51 = vld [vmem:[%s5515_s10 + $0xf30] sm:$0xf]  ;;  %v712_v52 = vld [vmem:[%s5515_s10 + $0xf40] sm:$0xf]  ;;  %709 = vst [vmem:[%s5522_s11 + $0x3c8] sm:$0xf] %v708_v50 }
  0xb5   : > { %711 = vst [vmem:[%s5522_s11 + $0x3cc] sm:$0xf] %v710_v51  ;;  %713 = vst [vmem:[%s5522_s11 + $0x3d0] sm:$0xf] %v712_v52  ;;  %v714_v53 = vld [vmem:[%s5515_s10 + $0xf50] sm:$0xf] }
  0xb6   : > { %v716_v54 = vld [vmem:[%s5515_s10 + $0xf60] sm:$0xf]  ;;  %v718_v55 = vld [vmem:[%s5515_s10 + $0xf70] sm:$0xf]  ;;  %715 = vst [vmem:[%s5522_s11 + $0x3d4] sm:$0xf] %v714_v53 }
  0xb7   : > { %717 = vst [vmem:[%s5522_s11 + $0x3d8] sm:$0xf] %v716_v54  ;;  %719 = vst [vmem:[%s5522_s11 + $0x3dc] sm:$0xf] %v718_v55  ;;  %v720_v56 = vld [vmem:[%s5515_s10 + $0xf80] sm:$0xf] }
  0xb8   : > { %v722_v57 = vld [vmem:[%s5515_s10 + $0xf90] sm:$0xf]  ;;  %v724_v58 = vld [vmem:[%s5515_s10 + $0xfa0] sm:$0xf]  ;;  %721 = vst [vmem:[%s5522_s11 + $0x3e0] sm:$0xf] %v720_v56 }
  0xb9   : > { %723 = vst [vmem:[%s5522_s11 + $0x3e4] sm:$0xf] %v722_v57  ;;  %725 = vst [vmem:[%s5522_s11 + $0x3e8] sm:$0xf] %v724_v58  ;;  %v726_v59 = vld [vmem:[%s5515_s10 + $0xfb0] sm:$0xf] }
  0xba   : > { %v728_v60 = vld [vmem:[%s5515_s10 + $0xfc0] sm:$0xf]  ;;  %v730_v61 = vld [vmem:[%s5515_s10 + $0xfd0] sm:$0xf]  ;;  %727 = vst [vmem:[%s5522_s11 + $0x3ec] sm:$0xf] %v726_v59 }
  0xbb   : > { %729 = vst [vmem:[%s5522_s11 + $0x3f0] sm:$0xf] %v728_v60  ;;  %731 = vst [vmem:[%s5522_s11 + $0x3f4] sm:$0xf] %v730_v61  ;;  %v732_v62 = vld [vmem:[%s5515_s10 + $0xfe0] sm:$0xf] }
  0xbc   : > { %v734_v63 = vld [vmem:[%s5515_s10 + $0xff0] sm:$0xf]  ;;  %v736_v0 = vld [vmem:[%s5515_s10 + $0x1000] sm:$0xf]  ;;  %733 = vst [vmem:[%s5522_s11 + $0x3f8] sm:$0xf] %v732_v62 }
  0xbd   : > { %735 = vst [vmem:[%s5522_s11 + $0x3fc] sm:$0xf] %v734_v63  ;;  %737 = vst [vmem:[%s5522_s11 + $0x400] sm:$0xf] %v736_v0  ;;  %v738_v1 = vld [vmem:[%s5515_s10 + $0x1010] sm:$0xf] }
  0xbe   : > { %v740_v2 = vld [vmem:[%s5515_s10 + $0x1020] sm:$0xf]  ;;  %v742_v3 = vld [vmem:[%s5515_s10 + $0x1030] sm:$0xf]  ;;  %739 = vst [vmem:[%s5522_s11 + $0x404] sm:$0xf] %v738_v1 }
  0xbf   : > { %741 = vst [vmem:[%s5522_s11 + $0x408] sm:$0xf] %v740_v2  ;;  %743 = vst [vmem:[%s5522_s11 + $0x40c] sm:$0xf] %v742_v3  ;;  %v744_v4 = vld [vmem:[%s5515_s10 + $0x1040] sm:$0xf] }
  0xc0   : > { %v746_v5 = vld [vmem:[%s5515_s10 + $0x1050] sm:$0xf]  ;;  %v748_v6 = vld [vmem:[%s5515_s10 + $0x1060] sm:$0xf]  ;;  %745 = vst [vmem:[%s5522_s11 + $0x410] sm:$0xf] %v744_v4 }
  0xc1   : > { %747 = vst [vmem:[%s5522_s11 + $0x414] sm:$0xf] %v746_v5  ;;  %749 = vst [vmem:[%s5522_s11 + $0x418] sm:$0xf] %v748_v6  ;;  %v750_v7 = vld [vmem:[%s5515_s10 + $0x1070] sm:$0xf] }
  0xc2   : > { %v752_v8 = vld [vmem:[%s5515_s10 + $0x1080] sm:$0xf]  ;;  %v754_v9 = vld [vmem:[%s5515_s10 + $0x1090] sm:$0xf]  ;;  %751 = vst [vmem:[%s5522_s11 + $0x41c] sm:$0xf] %v750_v7 }
  0xc3   : > { %753 = vst [vmem:[%s5522_s11 + $0x420] sm:$0xf] %v752_v8  ;;  %755 = vst [vmem:[%s5522_s11 + $0x424] sm:$0xf] %v754_v9  ;;  %v756_v10 = vld [vmem:[%s5515_s10 + $0x10a0] sm:$0xf] }
  0xc4   : > { %v758_v11 = vld [vmem:[%s5515_s10 + $0x10b0] sm:$0xf]  ;;  %v760_v12 = vld [vmem:[%s5515_s10 + $0x10c0] sm:$0xf]  ;;  %757 = vst [vmem:[%s5522_s11 + $0x428] sm:$0xf] %v756_v10 }
  0xc5   : > { %759 = vst [vmem:[%s5522_s11 + $0x42c] sm:$0xf] %v758_v11  ;;  %761 = vst [vmem:[%s5522_s11 + $0x430] sm:$0xf] %v760_v12  ;;  %v762_v13 = vld [vmem:[%s5515_s10 + $0x10d0] sm:$0xf] }
  0xc6   : > { %v764_v14 = vld [vmem:[%s5515_s10 + $0x10e0] sm:$0xf]  ;;  %v766_v15 = vld [vmem:[%s5515_s10 + $0x10f0] sm:$0xf]  ;;  %763 = vst [vmem:[%s5522_s11 + $0x434] sm:$0xf] %v762_v13 }
  0xc7   : > { %765 = vst [vmem:[%s5522_s11 + $0x438] sm:$0xf] %v764_v14  ;;  %767 = vst [vmem:[%s5522_s11 + $0x43c] sm:$0xf] %v766_v15  ;;  %v768_v16 = vld [vmem:[%s5515_s10 + $0x1100] sm:$0xf] }
  0xc8   : > { %v770_v17 = vld [vmem:[%s5515_s10 + $0x1110] sm:$0xf]  ;;  %v772_v18 = vld [vmem:[%s5515_s10 + $0x1120] sm:$0xf]  ;;  %769 = vst [vmem:[%s5522_s11 + $0x440] sm:$0xf] %v768_v16 }
  0xc9   : > { %771 = vst [vmem:[%s5522_s11 + $0x444] sm:$0xf] %v770_v17  ;;  %773 = vst [vmem:[%s5522_s11 + $0x448] sm:$0xf] %v772_v18  ;;  %v774_v19 = vld [vmem:[%s5515_s10 + $0x1130] sm:$0xf] }
  0xca   : > { %v776_v20 = vld [vmem:[%s5515_s10 + $0x1140] sm:$0xf]  ;;  %v778_v21 = vld [vmem:[%s5515_s10 + $0x1150] sm:$0xf]  ;;  %775 = vst [vmem:[%s5522_s11 + $0x44c] sm:$0xf] %v774_v19 }
  0xcb   : > { %777 = vst [vmem:[%s5522_s11 + $0x450] sm:$0xf] %v776_v20  ;;  %779 = vst [vmem:[%s5522_s11 + $0x454] sm:$0xf] %v778_v21  ;;  %v780_v22 = vld [vmem:[%s5515_s10 + $0x1160] sm:$0xf] }
  0xcc   : > { %v782_v23 = vld [vmem:[%s5515_s10 + $0x1170] sm:$0xf]  ;;  %v784_v24 = vld [vmem:[%s5515_s10 + $0x1180] sm:$0xf]  ;;  %781 = vst [vmem:[%s5522_s11 + $0x458] sm:$0xf] %v780_v22 }
  0xcd   : > { %783 = vst [vmem:[%s5522_s11 + $0x45c] sm:$0xf] %v782_v23  ;;  %785 = vst [vmem:[%s5522_s11 + $0x460] sm:$0xf] %v784_v24  ;;  %v786_v25 = vld [vmem:[%s5515_s10 + $0x1190] sm:$0xf] }
  0xce   : > { %v788_v26 = vld [vmem:[%s5515_s10 + $0x11a0] sm:$0xf]  ;;  %v790_v27 = vld [vmem:[%s5515_s10 + $0x11b0] sm:$0xf]  ;;  %787 = vst [vmem:[%s5522_s11 + $0x464] sm:$0xf] %v786_v25 }
  0xcf   : > { %789 = vst [vmem:[%s5522_s11 + $0x468] sm:$0xf] %v788_v26  ;;  %791 = vst [vmem:[%s5522_s11 + $0x46c] sm:$0xf] %v790_v27  ;;  %v792_v28 = vld [vmem:[%s5515_s10 + $0x11c0] sm:$0xf] }
  0xd0   : > { %v794_v29 = vld [vmem:[%s5515_s10 + $0x11d0] sm:$0xf]  ;;  %v796_v30 = vld [vmem:[%s5515_s10 + $0x11e0] sm:$0xf]  ;;  %793 = vst [vmem:[%s5522_s11 + $0x470] sm:$0xf] %v792_v28 }
  0xd1   : > { %795 = vst [vmem:[%s5522_s11 + $0x474] sm:$0xf] %v794_v29  ;;  %797 = vst [vmem:[%s5522_s11 + $0x478] sm:$0xf] %v796_v30  ;;  %v798_v31 = vld [vmem:[%s5515_s10 + $0x11f0] sm:$0xf] }
  0xd2   : > { %v800_v32 = vld [vmem:[%s5515_s10 + $0x1200] sm:$0xf]  ;;  %v802_v33 = vld [vmem:[%s5515_s10 + $0x1210] sm:$0xf]  ;;  %799 = vst [vmem:[%s5522_s11 + $0x47c] sm:$0xf] %v798_v31 }
  0xd3   : > { %801 = vst [vmem:[%s5522_s11 + $0x480] sm:$0xf] %v800_v32  ;;  %803 = vst [vmem:[%s5522_s11 + $0x484] sm:$0xf] %v802_v33  ;;  %v804_v34 = vld [vmem:[%s5515_s10 + $0x1220] sm:$0xf] }
  0xd4   : > { %v806_v35 = vld [vmem:[%s5515_s10 + $0x1230] sm:$0xf]  ;;  %v808_v36 = vld [vmem:[%s5515_s10 + $0x1240] sm:$0xf]  ;;  %805 = vst [vmem:[%s5522_s11 + $0x488] sm:$0xf] %v804_v34 }
  0xd5   : > { %807 = vst [vmem:[%s5522_s11 + $0x48c] sm:$0xf] %v806_v35  ;;  %809 = vst [vmem:[%s5522_s11 + $0x490] sm:$0xf] %v808_v36  ;;  %v810_v37 = vld [vmem:[%s5515_s10 + $0x1250] sm:$0xf] }
  0xd6   : > { %v812_v38 = vld [vmem:[%s5515_s10 + $0x1260] sm:$0xf]  ;;  %v814_v39 = vld [vmem:[%s5515_s10 + $0x1270] sm:$0xf]  ;;  %811 = vst [vmem:[%s5522_s11 + $0x494] sm:$0xf] %v810_v37 }
  0xd7   : > { %813 = vst [vmem:[%s5522_s11 + $0x498] sm:$0xf] %v812_v38  ;;  %815 = vst [vmem:[%s5522_s11 + $0x49c] sm:$0xf] %v814_v39  ;;  %v816_v40 = vld [vmem:[%s5515_s10 + $0x1280] sm:$0xf] }
  0xd8   : > { %v818_v41 = vld [vmem:[%s5515_s10 + $0x1290] sm:$0xf]  ;;  %v820_v42 = vld [vmem:[%s5515_s10 + $0x12a0] sm:$0xf]  ;;  %817 = vst [vmem:[%s5522_s11 + $0x4a0] sm:$0xf] %v816_v40 }
  0xd9   : > { %819 = vst [vmem:[%s5522_s11 + $0x4a4] sm:$0xf] %v818_v41  ;;  %821 = vst [vmem:[%s5522_s11 + $0x4a8] sm:$0xf] %v820_v42  ;;  %v822_v43 = vld [vmem:[%s5515_s10 + $0x12b0] sm:$0xf] }
  0xda   : > { %v824_v44 = vld [vmem:[%s5515_s10 + $0x12c0] sm:$0xf]  ;;  %v826_v45 = vld [vmem:[%s5515_s10 + $0x12d0] sm:$0xf]  ;;  %823 = vst [vmem:[%s5522_s11 + $0x4ac] sm:$0xf] %v822_v43 }
  0xdb   : > { %825 = vst [vmem:[%s5522_s11 + $0x4b0] sm:$0xf] %v824_v44  ;;  %827 = vst [vmem:[%s5522_s11 + $0x4b4] sm:$0xf] %v826_v45  ;;  %v828_v46 = vld [vmem:[%s5515_s10 + $0x12e0] sm:$0xf] }
  0xdc   : > { %v830_v47 = vld [vmem:[%s5515_s10 + $0x12f0] sm:$0xf]  ;;  %v832_v48 = vld [vmem:[%s5515_s10 + $0x1300] sm:$0xf]  ;;  %829 = vst [vmem:[%s5522_s11 + $0x4b8] sm:$0xf] %v828_v46 }
  0xdd   : > { %831 = vst [vmem:[%s5522_s11 + $0x4bc] sm:$0xf] %v830_v47  ;;  %833 = vst [vmem:[%s5522_s11 + $0x4c0] sm:$0xf] %v832_v48  ;;  %v834_v49 = vld [vmem:[%s5515_s10 + $0x1310] sm:$0xf] }
  0xde   : > { %v836_v50 = vld [vmem:[%s5515_s10 + $0x1320] sm:$0xf]  ;;  %v838_v51 = vld [vmem:[%s5515_s10 + $0x1330] sm:$0xf]  ;;  %835 = vst [vmem:[%s5522_s11 + $0x4c4] sm:$0xf] %v834_v49 }
  0xdf   : > { %837 = vst [vmem:[%s5522_s11 + $0x4c8] sm:$0xf] %v836_v50  ;;  %839 = vst [vmem:[%s5522_s11 + $0x4cc] sm:$0xf] %v838_v51  ;;  %v840_v52 = vld [vmem:[%s5515_s10 + $0x1340] sm:$0xf] }
  0xe0   : > { %v842_v53 = vld [vmem:[%s5515_s10 + $0x1350] sm:$0xf]  ;;  %v844_v54 = vld [vmem:[%s5515_s10 + $0x1360] sm:$0xf]  ;;  %841 = vst [vmem:[%s5522_s11 + $0x4d0] sm:$0xf] %v840_v52 }
  0xe1   : > { %843 = vst [vmem:[%s5522_s11 + $0x4d4] sm:$0xf] %v842_v53  ;;  %845 = vst [vmem:[%s5522_s11 + $0x4d8] sm:$0xf] %v844_v54  ;;  %v846_v55 = vld [vmem:[%s5515_s10 + $0x1370] sm:$0xf] }
  0xe2   : > { %v848_v56 = vld [vmem:[%s5515_s10 + $0x1380] sm:$0xf]  ;;  %v850_v57 = vld [vmem:[%s5515_s10 + $0x1390] sm:$0xf]  ;;  %847 = vst [vmem:[%s5522_s11 + $0x4dc] sm:$0xf] %v846_v55 }
  0xe3   : > { %849 = vst [vmem:[%s5522_s11 + $0x4e0] sm:$0xf] %v848_v56  ;;  %851 = vst [vmem:[%s5522_s11 + $0x4e4] sm:$0xf] %v850_v57  ;;  %v852_v58 = vld [vmem:[%s5515_s10 + $0x13a0] sm:$0xf] }
  0xe4   : > { %v854_v59 = vld [vmem:[%s5515_s10 + $0x13b0] sm:$0xf]  ;;  %v856_v60 = vld [vmem:[%s5515_s10 + $0x13c0] sm:$0xf]  ;;  %853 = vst [vmem:[%s5522_s11 + $0x4e8] sm:$0xf] %v852_v58 }
  0xe5   : > { %855 = vst [vmem:[%s5522_s11 + $0x4ec] sm:$0xf] %v854_v59  ;;  %857 = vst [vmem:[%s5522_s11 + $0x4f0] sm:$0xf] %v856_v60  ;;  %v858_v61 = vld [vmem:[%s5515_s10 + $0x13d0] sm:$0xf] }
  0xe6   : > { %v860_v62 = vld [vmem:[%s5515_s10 + $0x13e0] sm:$0xf]  ;;  %v862_v63 = vld [vmem:[%s5515_s10 + $0x13f0] sm:$0xf]  ;;  %859 = vst [vmem:[%s5522_s11 + $0x4f4] sm:$0xf] %v858_v61 }
  0xe7   : > { %861 = vst [vmem:[%s5522_s11 + $0x4f8] sm:$0xf] %v860_v62  ;;  %863 = vst [vmem:[%s5522_s11 + $0x4fc] sm:$0xf] %v862_v63  ;;  %v864_v0 = vld [vmem:[%s5515_s10 + $0x1400] sm:$0xf] }
  0xe8   : > { %v866_v1 = vld [vmem:[%s5515_s10 + $0x1410] sm:$0xf]  ;;  %v868_v2 = vld [vmem:[%s5515_s10 + $0x1420] sm:$0xf]  ;;  %865 = vst [vmem:[%s5522_s11 + $0x500] sm:$0xf] %v864_v0 }
  0xe9   : > { %867 = vst [vmem:[%s5522_s11 + $0x504] sm:$0xf] %v866_v1  ;;  %869 = vst [vmem:[%s5522_s11 + $0x508] sm:$0xf] %v868_v2  ;;  %v870_v3 = vld [vmem:[%s5515_s10 + $0x1430] sm:$0xf] }
  0xea   : > { %v872_v4 = vld [vmem:[%s5515_s10 + $0x1440] sm:$0xf]  ;;  %v874_v5 = vld [vmem:[%s5515_s10 + $0x1450] sm:$0xf]  ;;  %871 = vst [vmem:[%s5522_s11 + $0x50c] sm:$0xf] %v870_v3 }
  0xeb   : > { %873 = vst [vmem:[%s5522_s11 + $0x510] sm:$0xf] %v872_v4  ;;  %875 = vst [vmem:[%s5522_s11 + $0x514] sm:$0xf] %v874_v5  ;;  %v876_v6 = vld [vmem:[%s5515_s10 + $0x1460] sm:$0xf] }
  0xec   : > { %v878_v7 = vld [vmem:[%s5515_s10 + $0x1470] sm:$0xf]  ;;  %v880_v8 = vld [vmem:[%s5515_s10 + $0x1480] sm:$0xf]  ;;  %877 = vst [vmem:[%s5522_s11 + $0x518] sm:$0xf] %v876_v6 }
  0xed   : > { %879 = vst [vmem:[%s5522_s11 + $0x51c] sm:$0xf] %v878_v7  ;;  %881 = vst [vmem:[%s5522_s11 + $0x520] sm:$0xf] %v880_v8  ;;  %v882_v9 = vld [vmem:[%s5515_s10 + $0x1490] sm:$0xf] }
  0xee   : > { %v884_v10 = vld [vmem:[%s5515_s10 + $0x14a0] sm:$0xf]  ;;  %v886_v11 = vld [vmem:[%s5515_s10 + $0x14b0] sm:$0xf]  ;;  %883 = vst [vmem:[%s5522_s11 + $0x524] sm:$0xf] %v882_v9 }
  0xef   : > { %885 = vst [vmem:[%s5522_s11 + $0x528] sm:$0xf] %v884_v10  ;;  %887 = vst [vmem:[%s5522_s11 + $0x52c] sm:$0xf] %v886_v11  ;;  %v888_v12 = vld [vmem:[%s5515_s10 + $0x14c0] sm:$0xf] }
  0xf0   : > { %v890_v13 = vld [vmem:[%s5515_s10 + $0x14d0] sm:$0xf]  ;;  %v892_v14 = vld [vmem:[%s5515_s10 + $0x14e0] sm:$0xf]  ;;  %889 = vst [vmem:[%s5522_s11 + $0x530] sm:$0xf] %v888_v12 }
  0xf1   : > { %891 = vst [vmem:[%s5522_s11 + $0x534] sm:$0xf] %v890_v13  ;;  %893 = vst [vmem:[%s5522_s11 + $0x538] sm:$0xf] %v892_v14  ;;  %v894_v15 = vld [vmem:[%s5515_s10 + $0x14f0] sm:$0xf] }
  0xf2   : > { %v896_v16 = vld [vmem:[%s5515_s10 + $0x1500] sm:$0xf]  ;;  %v898_v17 = vld [vmem:[%s5515_s10 + $0x1510] sm:$0xf]  ;;  %895 = vst [vmem:[%s5522_s11 + $0x53c] sm:$0xf] %v894_v15 }
  0xf3   : > { %897 = vst [vmem:[%s5522_s11 + $0x540] sm:$0xf] %v896_v16  ;;  %899 = vst [vmem:[%s5522_s11 + $0x544] sm:$0xf] %v898_v17  ;;  %v900_v18 = vld [vmem:[%s5515_s10 + $0x1520] sm:$0xf] }
  0xf4   : > { %v902_v19 = vld [vmem:[%s5515_s10 + $0x1530] sm:$0xf]  ;;  %v904_v20 = vld [vmem:[%s5515_s10 + $0x1540] sm:$0xf]  ;;  %901 = vst [vmem:[%s5522_s11 + $0x548] sm:$0xf] %v900_v18 }
  0xf5   : > { %903 = vst [vmem:[%s5522_s11 + $0x54c] sm:$0xf] %v902_v19  ;;  %905 = vst [vmem:[%s5522_s11 + $0x550] sm:$0xf] %v904_v20  ;;  %v906_v21 = vld [vmem:[%s5515_s10 + $0x1550] sm:$0xf] }
  0xf6   : > { %v908_v22 = vld [vmem:[%s5515_s10 + $0x1560] sm:$0xf]  ;;  %v910_v23 = vld [vmem:[%s5515_s10 + $0x1570] sm:$0xf]  ;;  %907 = vst [vmem:[%s5522_s11 + $0x554] sm:$0xf] %v906_v21 }
  0xf7   : > { %909 = vst [vmem:[%s5522_s11 + $0x558] sm:$0xf] %v908_v22  ;;  %911 = vst [vmem:[%s5522_s11 + $0x55c] sm:$0xf] %v910_v23  ;;  %v912_v24 = vld [vmem:[%s5515_s10 + $0x1580] sm:$0xf] }
  0xf8   : > { %v914_v25 = vld [vmem:[%s5515_s10 + $0x1590] sm:$0xf]  ;;  %v916_v26 = vld [vmem:[%s5515_s10 + $0x15a0] sm:$0xf]  ;;  %913 = vst [vmem:[%s5522_s11 + $0x560] sm:$0xf] %v912_v24 }
  0xf9   : > { %915 = vst [vmem:[%s5522_s11 + $0x564] sm:$0xf] %v914_v25  ;;  %917 = vst [vmem:[%s5522_s11 + $0x568] sm:$0xf] %v916_v26  ;;  %v918_v27 = vld [vmem:[%s5515_s10 + $0x15b0] sm:$0xf] }
  0xfa   : > { %v920_v28 = vld [vmem:[%s5515_s10 + $0x15c0] sm:$0xf]  ;;  %v922_v29 = vld [vmem:[%s5515_s10 + $0x15d0] sm:$0xf]  ;;  %919 = vst [vmem:[%s5522_s11 + $0x56c] sm:$0xf] %v918_v27 }
  0xfb   : > { %921 = vst [vmem:[%s5522_s11 + $0x570] sm:$0xf] %v920_v28  ;;  %923 = vst [vmem:[%s5522_s11 + $0x574] sm:$0xf] %v922_v29  ;;  %v924_v30 = vld [vmem:[%s5515_s10 + $0x15e0] sm:$0xf] }
  0xfc   : > { %v926_v31 = vld [vmem:[%s5515_s10 + $0x15f0] sm:$0xf]  ;;  %v928_v32 = vld [vmem:[%s5515_s10 + $0x1600] sm:$0xf]  ;;  %925 = vst [vmem:[%s5522_s11 + $0x578] sm:$0xf] %v924_v30 }
  0xfd   : > { %927 = vst [vmem:[%s5522_s11 + $0x57c] sm:$0xf] %v926_v31  ;;  %929 = vst [vmem:[%s5522_s11 + $0x580] sm:$0xf] %v928_v32  ;;  %v930_v33 = vld [vmem:[%s5515_s10 + $0x1610] sm:$0xf] }
  0xfe   : > { %v932_v34 = vld [vmem:[%s5515_s10 + $0x1620] sm:$0xf]  ;;  %v934_v35 = vld [vmem:[%s5515_s10 + $0x1630] sm:$0xf]  ;;  %931 = vst [vmem:[%s5522_s11 + $0x584] sm:$0xf] %v930_v33 }
  0xff   : > { %933 = vst [vmem:[%s5522_s11 + $0x588] sm:$0xf] %v932_v34  ;;  %935 = vst [vmem:[%s5522_s11 + $0x58c] sm:$0xf] %v934_v35  ;;  %v936_v36 = vld [vmem:[%s5515_s10 + $0x1640] sm:$0xf] }
 0x100   : > { %v938_v37 = vld [vmem:[%s5515_s10 + $0x1650] sm:$0xf]  ;;  %v940_v38 = vld [vmem:[%s5515_s10 + $0x1660] sm:$0xf]  ;;  %937 = vst [vmem:[%s5522_s11 + $0x590] sm:$0xf] %v936_v36 }
 0x101   : > { %939 = vst [vmem:[%s5522_s11 + $0x594] sm:$0xf] %v938_v37  ;;  %941 = vst [vmem:[%s5522_s11 + $0x598] sm:$0xf] %v940_v38  ;;  %v942_v39 = vld [vmem:[%s5515_s10 + $0x1670] sm:$0xf] }
 0x102   : > { %v944_v40 = vld [vmem:[%s5515_s10 + $0x1680] sm:$0xf]  ;;  %v946_v41 = vld [vmem:[%s5515_s10 + $0x1690] sm:$0xf]  ;;  %943 = vst [vmem:[%s5522_s11 + $0x59c] sm:$0xf] %v942_v39 }
 0x103   : > { %945 = vst [vmem:[%s5522_s11 + $0x5a0] sm:$0xf] %v944_v40  ;;  %947 = vst [vmem:[%s5522_s11 + $0x5a4] sm:$0xf] %v946_v41  ;;  %v948_v42 = vld [vmem:[%s5515_s10 + $0x16a0] sm:$0xf] }
 0x104   : > { %v950_v43 = vld [vmem:[%s5515_s10 + $0x16b0] sm:$0xf]  ;;  %v952_v44 = vld [vmem:[%s5515_s10 + $0x16c0] sm:$0xf]  ;;  %949 = vst [vmem:[%s5522_s11 + $0x5a8] sm:$0xf] %v948_v42 }
 0x105   : > { %951 = vst [vmem:[%s5522_s11 + $0x5ac] sm:$0xf] %v950_v43  ;;  %953 = vst [vmem:[%s5522_s11 + $0x5b0] sm:$0xf] %v952_v44  ;;  %v954_v45 = vld [vmem:[%s5515_s10 + $0x16d0] sm:$0xf] }
 0x106   : > { %v956_v46 = vld [vmem:[%s5515_s10 + $0x16e0] sm:$0xf]  ;;  %v958_v47 = vld [vmem:[%s5515_s10 + $0x16f0] sm:$0xf]  ;;  %955 = vst [vmem:[%s5522_s11 + $0x5b4] sm:$0xf] %v954_v45 }
 0x107   : > { %957 = vst [vmem:[%s5522_s11 + $0x5b8] sm:$0xf] %v956_v46  ;;  %959 = vst [vmem:[%s5522_s11 + $0x5bc] sm:$0xf] %v958_v47  ;;  %v960_v48 = vld [vmem:[%s5515_s10 + $0x1700] sm:$0xf] }
 0x108   : > { %v962_v49 = vld [vmem:[%s5515_s10 + $0x1710] sm:$0xf]  ;;  %v964_v50 = vld [vmem:[%s5515_s10 + $0x1720] sm:$0xf]  ;;  %961 = vst [vmem:[%s5522_s11 + $0x5c0] sm:$0xf] %v960_v48 }
 0x109   : > { %963 = vst [vmem:[%s5522_s11 + $0x5c4] sm:$0xf] %v962_v49  ;;  %965 = vst [vmem:[%s5522_s11 + $0x5c8] sm:$0xf] %v964_v50  ;;  %v966_v51 = vld [vmem:[%s5515_s10 + $0x1730] sm:$0xf] }
 0x10a   : > { %v968_v52 = vld [vmem:[%s5515_s10 + $0x1740] sm:$0xf]  ;;  %v970_v53 = vld [vmem:[%s5515_s10 + $0x1750] sm:$0xf]  ;;  %967 = vst [vmem:[%s5522_s11 + $0x5cc] sm:$0xf] %v966_v51 }
 0x10b   : > { %969 = vst [vmem:[%s5522_s11 + $0x5d0] sm:$0xf] %v968_v52  ;;  %971 = vst [vmem:[%s5522_s11 + $0x5d4] sm:$0xf] %v970_v53  ;;  %v972_v54 = vld [vmem:[%s5515_s10 + $0x1760] sm:$0xf] }
 0x10c   : > { %v974_v55 = vld [vmem:[%s5515_s10 + $0x1770] sm:$0xf]  ;;  %v976_v56 = vld [vmem:[%s5515_s10 + $0x1780] sm:$0xf]  ;;  %973 = vst [vmem:[%s5522_s11 + $0x5d8] sm:$0xf] %v972_v54 }
 0x10d   : > { %975 = vst [vmem:[%s5522_s11 + $0x5dc] sm:$0xf] %v974_v55  ;;  %977 = vst [vmem:[%s5522_s11 + $0x5e0] sm:$0xf] %v976_v56  ;;  %v978_v57 = vld [vmem:[%s5515_s10 + $0x1790] sm:$0xf] }
 0x10e   : > { %v980_v58 = vld [vmem:[%s5515_s10 + $0x17a0] sm:$0xf]  ;;  %v982_v59 = vld [vmem:[%s5515_s10 + $0x17b0] sm:$0xf]  ;;  %979 = vst [vmem:[%s5522_s11 + $0x5e4] sm:$0xf] %v978_v57 }
 0x10f   : > { %981 = vst [vmem:[%s5522_s11 + $0x5e8] sm:$0xf] %v980_v58  ;;  %983 = vst [vmem:[%s5522_s11 + $0x5ec] sm:$0xf] %v982_v59  ;;  %v984_v60 = vld [vmem:[%s5515_s10 + $0x17c0] sm:$0xf] }
 0x110   : > { %v986_v61 = vld [vmem:[%s5515_s10 + $0x17d0] sm:$0xf]  ;;  %v988_v62 = vld [vmem:[%s5515_s10 + $0x17e0] sm:$0xf]  ;;  %985 = vst [vmem:[%s5522_s11 + $0x5f0] sm:$0xf] %v984_v60 }
 0x111   : > { %987 = vst [vmem:[%s5522_s11 + $0x5f4] sm:$0xf] %v986_v61  ;;  %989 = vst [vmem:[%s5522_s11 + $0x5f8] sm:$0xf] %v988_v62  ;;  %v990_v63 = vld [vmem:[%s5515_s10 + $0x17f0] sm:$0xf] }
 0x112   : > { %v992_v0 = vld [vmem:[%s5515_s10 + $0x1800] sm:$0xf]  ;;  %v994_v1 = vld [vmem:[%s5515_s10 + $0x1810] sm:$0xf]  ;;  %991 = vst [vmem:[%s5522_s11 + $0x5fc] sm:$0xf] %v990_v63 }
 0x113   : > { %993 = vst [vmem:[%s5522_s11 + $0x600] sm:$0xf] %v992_v0  ;;  %995 = vst [vmem:[%s5522_s11 + $0x604] sm:$0xf] %v994_v1  ;;  %v996_v2 = vld [vmem:[%s5515_s10 + $0x1820] sm:$0xf] }
 0x114   : > { %v998_v3 = vld [vmem:[%s5515_s10 + $0x1830] sm:$0xf]  ;;  %v1000_v4 = vld [vmem:[%s5515_s10 + $0x1840] sm:$0xf]  ;;  %997 = vst [vmem:[%s5522_s11 + $0x608] sm:$0xf] %v996_v2 }
 0x115   : > { %999 = vst [vmem:[%s5522_s11 + $0x60c] sm:$0xf] %v998_v3  ;;  %1001 = vst [vmem:[%s5522_s11 + $0x610] sm:$0xf] %v1000_v4  ;;  %v1002_v5 = vld [vmem:[%s5515_s10 + $0x1850] sm:$0xf] }
 0x116   : > { %v1004_v6 = vld [vmem:[%s5515_s10 + $0x1860] sm:$0xf]  ;;  %v1006_v7 = vld [vmem:[%s5515_s10 + $0x1870] sm:$0xf]  ;;  %1003 = vst [vmem:[%s5522_s11 + $0x614] sm:$0xf] %v1002_v5 }
 0x117   : > { %1005 = vst [vmem:[%s5522_s11 + $0x618] sm:$0xf] %v1004_v6  ;;  %1007 = vst [vmem:[%s5522_s11 + $0x61c] sm:$0xf] %v1006_v7 }
 0x118 PF: > { %p4485_p5 = scmp.ge.s32.totalorder %s5436_s23, 1  ;;  %p1819_p6 = scmp.lt.s32.totalorder %s5436_s23, 5 }
 0x11a   : > { %p1820_p7 = pnand %p4485_p5, %p1819_p6 }
 0x11b   : > { %s1826_s12 = sand.u32 (!%p1820_p7), 1, %s5428_s21   ;;  %v2268_v8 = vlaneseq (!%p1820_p7)  ;;  %v5438_v9 = vmov (!%p1820_p7), 1966171168   ;;  %v1857_v12 = vld [vmem:[%s6823_s0] sm:$0xff] (!%p1820_p7)  ;;  %vm5440_vm0 = vmmov (!%p1820_p7), 0   ;;  %vm3625_vm1 = vcmask (!%p1820_p7), 523264  }
 0x11c   : > { %1823 = sbr.rel (%p1820_p7) target bundleno = 996 (0x3e4), region = 77  ;;  %v2266_v10 = vunpack.c.l.s4 (!%p1820_p7), %v5438_v9  ;;  %v2264_v37 = vcombine.high (!%p1820_p7), %v1857_v12, %v1857_v12  ;;  %p1853_p8 = scmp.lt.s32.totalorder (!%p1820_p7), %s5495_s24, 3 }
 0x11d   : > { %s5111_s13 = smul.u32 (!%p1820_p7), 1568, %s1826_s12  ;;  %v6306_v11 = vshrl.u32 (!%p1820_p7), %v2268_v8, 7  ;;  %s4685_s7 = sshll.u32 (!%p1820_p7), %s5495_s24, 7 }
 0x11e   : > { %v2267_v13 = vunpack.c.0.s8 (!%p1820_p7), %v2266_v10  ;;  %s4151_s8 = sshra.s32 (!%p1820_p7), %s4685_s7, 7  ;;  %p4687_p9 = scmp.ne.s32.totalorder (!%p1820_p7), %s5495_s24, 3 }
 0x11f   : > { %s6311_s16 = scalar_lea.vmem (!%p1820_p7), [#allocation2], %s5111_s13  ;;  %s4686_s9 = sshll.u32 (!%p1820_p7), %s4151_s8, 1 }
 0x120   : > { %v5154_v14 = vld [vmem:[%s6311_s16 + $0x40] sm:$0xff] (!%p1820_p7)   ;;  %v6316_v16 = vsub.s32 (!%p1820_p7), %v2267_v13, %v6306_v11  ;;  %v5158_v20 = vld [vmem:[%s6311_s16 + $0x48] sm:$0xff] (!%p1820_p7)   ;;  %v5162_v26 = vld [vmem:[%s6311_s16 + $0x50] sm:$0xff] (!%p1820_p7)   ;;  %s4154_s10 = scalar_lea.vmem (!%p1820_p7), [#allocation5], %s4686_s9 }
 0x121   : > { %v5155_v15 = vld [vmem:[%s6311_s16] sm:$0xff] (!%p1820_p7)   ;;  %4695 = vmatprep.subr.bf16.mxu0 (!%p1820_p7), %v5154_v14  ;;  %v5159_v21 = vld [vmem:[%s6311_s16 + $0x8] sm:$0xff] (!%p1820_p7)   ;;  %v5163_v27 = vld [vmem:[%s6311_s16 + $0x10] sm:$0xff] (!%p1820_p7)  }
 0x122   : > { %v5156_v17 = vld [vmem:[%s6311_s16 + $0xc0] sm:$0xff] (!%p1820_p7)   ;;  %4696 = vmatpush3.bf16.msra.mxu0 (!%p1820_p7), %v5155_v15  ;;  %v2271_v19 = vrot.slane (!%p1820_p7), %v1857_v12, %v6316_v16  ;;  %v5160_v23 = vld [vmem:[%s6311_s16 + $0xc8] sm:$0xff] (!%p1820_p7)   ;;  %v5164_v29 = vld [vmem:[%s6311_s16 + $0xd0] sm:$0xff] (!%p1820_p7)   ;;  %v6341_v42 = vrot.slane (!%p1820_p7), %v2264_v37, %v6316_v16 }
 0x123   : > { %v5157_v18 = vld [vmem:[%s6311_s16 + $0x80] sm:$0xff]   ;;  %4717 = vmatprep.subr.bf16.mxu1 %v5156_v17  ;;  %4697 = vmatprep.subr.bf16.mxu0 %v5158_v20  ;;  %v5161_v24 = vld [vmem:[%s6311_s16 + $0x88] sm:$0xff]   ;;  %v5165_v30 = vld [vmem:[%s6311_s16 + $0x90] sm:$0xff]   ;;  %s1854_s26 = scalar_select %p1853_p8, %s5495_s24, 3 }
 0x124   : > { %4718 = vmatpush3.bf16.msra.mxu1 %v5157_v18  ;;  %v2279_v22 = vcombine.high %v2271_v19, %v2271_v19  ;;  %v5166_v31 = vld [vmem:[%s6311_s16 + $0x58] sm:$0xff]   ;;  %v5170_v35 = vld [vmem:[%s6311_s16 + $0x60] sm:$0xff]   ;;  %v5174_v40 = vld [vmem:[%s6311_s16 + $0x68] sm:$0xff]   ;;  %v2280_v47 = vcombine.high %v6341_v42, %v6341_v42  ;;  %v2287_v51 = vrot.slane %v2271_v19, %v6316_v16  ;;  %vm4394_vm2 = vcmask (!%p4687_p9), 41984  }
 0x125   : > { %4719 = vmatprep.subr.bf16.mxu1 %v5160_v23  ;;  %v5167_v32 = vld [vmem:[%s6311_s16 + $0x18] sm:$0xff]   ;;  %v5171_v36 = vld [vmem:[%s6311_s16 + $0x20] sm:$0xff]   ;;  %v5175_v41 = vld [vmem:[%s6311_s16 + $0x28] sm:$0xff]   ;;  %s1855_s30 = scalar_lea.vmem %s6825_s2, %s1854_s26 }
 0x126   : > { %4698 = vmatpush3.bf16.msra.mxu0 %v5159_v21  ;;  %v2301_v25 = vrot.slane %v2279_v22, %v6316_v16  ;;  %v5168_v33 = vld [vmem:[%s6311_s16 + $0xd8] sm:$0xff]   ;;  %v5172_v38 = vld [vmem:[%s6311_s16 + $0xe0] sm:$0xff]   ;;  %v5176_v43 = vld [vmem:[%s6311_s16 + $0xe8] sm:$0xff]   ;;  %v2308_v53 = vrot.slane %v2280_v47, %v6316_v16  ;;  %v2309_v57 = vcombine.high %v2287_v51, %v2287_v51 }
 0x127   : > { %4699 = vmatprep.subr.bf16.mxu0 %v5162_v26  ;;  %v5169_v34 = vld [vmem:[%s6311_s16 + $0x98] sm:$0xff]   ;;  %v5173_v39 = vld [vmem:[%s6311_s16 + $0xa0] sm:$0xff]   ;;  %v5177_v44 = vld [vmem:[%s6311_s16 + $0xa8] sm:$0xff]  }
 0x128   : > { %4720 = vmatpush3.bf16.msra.mxu1 %v5161_v24  ;;  %3661 = vmatprep.mubr.bf16.mxu0 %v2301_v25  ;;  %v2311_v28 = vcombine.high %v2301_v25, %v2301_v25  ;;  %v5178_v45 = vld [vmem:[%s6311_s16 + $0x70] sm:$0xff]   ;;  %v5182_v50 = vld [vmem:[%s6311_s16 + $0x78] sm:$0xff]   ;;  %v5187_v56 = vld [vmem:[%s6311_s16 + $0x140] sm:$0xff]   ;;  %v2312_v59 = vcombine.high %v2308_v53, %v2308_v53 }
 0x129   : > { %4721 = vmatprep.subr.bf16.mxu1 %v5164_v29  ;;  %v5179_v46 = vld [vmem:[%s6311_s16 + $0x30] sm:$0xff]   ;;  %v5183_v52 = vld [vmem:[%s6311_s16 + $0x38] sm:$0xff]   ;;  %v5188_v58 = vld [vmem:[%s6311_s16 + $0x100] sm:$0xff]  }
 0x12a   : > { %4700 = vmatpush3.bf16.msra.mxu0 %v5163_v27  ;;  %3701 = vmatprep.mubr.bf16.mxu1 %v2311_v28  ;;  %v5180_v48 = vld [vmem:[%s6311_s16 + $0xf0] sm:$0xff]   ;;  %v5184_v54 = vld [vmem:[%s6311_s16 + $0xf8] sm:$0xff]   ;;  %v5189_v60 = vld [vmem:[%s6311_s16 + $0x1c0] sm:$0xff]   ;;  %v2294_v28 = vrot.slane %v6341_v42, %v6316_v16 }
 0x12b   : > { %4701 = vmatprep.subr.bf16.mxu0 %v5166_v31  ;;  %v5181_v49 = vld [vmem:[%s6311_s16 + $0xb0] sm:$0xff]   ;;  %v5186_v55 = vld [vmem:[%s6311_s16 + $0xb8] sm:$0xff]   ;;  %v5190_v61 = vld [vmem:[%s6311_s16 + $0x180] sm:$0xff]  }
 0x12c   : > { %4722 = vmatpush3.bf16.msra.mxu1 %v5165_v30  ;;  %v5191_v62 = vld [vmem:[%s6311_s16 + $0x148] sm:$0xff]   ;;  %v5195_v2 = vld [vmem:[%s6311_s16 + $0x150] sm:$0xff]   ;;  %v5199_v6 = vld [vmem:[%s6311_s16 + $0x158] sm:$0xff]  }
 0x12d   : > { %4723 = vmatprep.subr.bf16.mxu1 %v5168_v33  ;;  %v5192_v63 = vld [vmem:[%s6311_s16 + $0x108] sm:$0xff]   ;;  %v5196_v3 = vld [vmem:[%s6311_s16 + $0x110] sm:$0xff]   ;;  %v5200_v7 = vld [vmem:[%s6311_s16 + $0x118] sm:$0xff]  }
 0x12e   : > { %4702 = vmatpush3.bf16.msra.mxu0 %v5167_v32  ;;  %v5193_v0 = vld [vmem:[%s6311_s16 + $0x1c8] sm:$0xff]   ;;  %v5197_v4 = vld [vmem:[%s6311_s16 + $0x1d0] sm:$0xff]   ;;  %v5201_v8 = vld [vmem:[%s6311_s16 + $0x1d8] sm:$0xff]  }
 0x12f   : > { %4703 = vmatprep.subr.bf16.mxu0 %v5170_v35  ;;  %v5194_v1 = vld [vmem:[%s6311_s16 + $0x188] sm:$0xff]   ;;  %v5198_v5 = vld [vmem:[%s6311_s16 + $0x190] sm:$0xff]   ;;  %v5202_v9 = vld [vmem:[%s6311_s16 + $0x198] sm:$0xff]  }
 0x130   : > { %4724 = vmatpush3.bf16.msra.mxu1 %v5169_v34  ;;  %v5203_v10 = vld [vmem:[%s6311_s16 + $0x160] sm:$0xff]   ;;  %v6377_v12 = vld [vmem:[%s6823_s0 + $0x8] sm:$0xff]  ;;  %v5211_v22 = vld [vmem:[%s6311_s16 + $0x170] sm:$0xff]   ;;  %v2310_v34 = vcombine.high %v2294_v28, %v2294_v28 }
 0x131   : > { %4725 = vmatprep.subr.bf16.mxu1 %v5172_v38  ;;  %v5204_v13 = vld [vmem:[%s6311_s16 + $0x120] sm:$0xff]   ;;  %v5207_v17 = vld [vmem:[%s6311_s16 + $0x168] sm:$0xff]   ;;  %v6386_v19 = vrot.slane %v6377_v12, %v6316_v16  ;;  %v5212_v23 = vld [vmem:[%s6311_s16 + $0x130] sm:$0xff]  }
 0x132   : > { %4704 = vmatpush3.bf16.msra.mxu0 %v5171_v36  ;;  %v5205_v14 = vld [vmem:[%s6311_s16 + $0x1e0] sm:$0xff]   ;;  %v5208_v18 = vld [vmem:[%s6311_s16 + $0x128] sm:$0xff]   ;;  %v5213_v25 = vld [vmem:[%s6311_s16 + $0x1f0] sm:$0xff]  }
 0x133   : > { %4705 = vmatprep.subr.bf16.mxu0 %v5174_v40  ;;  %v5206_v15 = vld [vmem:[%s6311_s16 + $0x1a0] sm:$0xff]   ;;  %v5209_v20 = vld [vmem:[%s6311_s16 + $0x1e8] sm:$0xff]   ;;  %v2328_v24 = vcombine.high %v6386_v19, %v6386_v19  ;;  %v5214_v26 = vld [vmem:[%s6311_s16 + $0x1b0] sm:$0xff]  }
 0x134   : > { %4726 = vmatpush3.bf16.msra.mxu1 %v5173_v39  ;;  %v5210_v21 = vld [vmem:[%s6311_s16 + $0x1a8] sm:$0xff]   ;;  %v5215_v27 = vld [vmem:[%s6311_s16 + $0x178] sm:$0xff]   ;;  %v5219_v33 = vld [vmem:[%s6311_s16 + $0x240] sm:$0xff]  }
 0x135   : > { %4727 = vmatprep.subr.bf16.mxu1 %v5176_v43  ;;  %v5216_v29 = vld [vmem:[%s6311_s16 + $0x138] sm:$0xff]   ;;  %v2350_v30 = vrot.slane %v2328_v24, %v6316_v16  ;;  %v5220_v35 = vld [vmem:[%s6311_s16 + $0x200] sm:$0xff]   ;;  %v5223_v39 = vld [vmem:[%s6311_s16 + $0x248] sm:$0xff]  }
 0x136   : > { %4706 = vmatpush3.bf16.msra.mxu0 %v5175_v41  ;;  %v5217_v31 = vld [vmem:[%s6311_s16 + $0x1f8] sm:$0xff]   ;;  %v5221_v37 = vld [vmem:[%s6311_s16 + $0x2c0] sm:$0xff]   ;;  %v5224_v40 = vld [vmem:[%s6311_s16 + $0x208] sm:$0xff]  }
 0x137   : > { %4707 = vmatprep.subr.bf16.mxu0 %v5178_v45  ;;  %v5218_v32 = vld [vmem:[%s6311_s16 + $0x1b8] sm:$0xff]   ;;  %v2360_v36 = vcombine.high %v2350_v30, %v2350_v30  ;;  %v5222_v38 = vld [vmem:[%s6311_s16 + $0x280] sm:$0xff]   ;;  %v5225_v41 = vld [vmem:[%s6311_s16 + $0x2c8] sm:$0xff]  }
 0x138   : > { %4728 = vmatpush3.bf16.msra.mxu1 %v5177_v44  ;;  %v5226_v42 = vld [vmem:[%s6311_s16 + $0x288] sm:$0xff]   ;;  %v5227_v43 = vld [vmem:[%s6311_s16 + $0x250] sm:$0xff]   ;;  %v5231_v47 = vld [vmem:[%s6311_s16 + $0x258] sm:$0xff]  }
 0x139   : > { %4729 = vmatprep.subr.bf16.mxu1 %v5180_v48  ;;  %v5228_v44 = vld [vmem:[%s6311_s16 + $0x210] sm:$0xff]   ;;  %v5232_v48 = vld [vmem:[%s6311_s16 + $0x218] sm:$0xff]  }
 0x13a   : > { %4708 = vmatpush3.bf16.msra.mxu0 %v5179_v46  ;;  %v5229_v45 = vld [vmem:[%s6311_s16 + $0x2d0] sm:$0xff]   ;;  %v5263_v24 = vld [vmem:[%s6311_s16 + $0x358] sm:$0xff]  }
 0x13b   : > { %4709 = vmatprep.subr.bf16.mxu0 %v5182_v50  ;;  %v5230_v46 = vld [vmem:[%s6311_s16 + $0x290] sm:$0xff]   ;;  %v5234_v50 = vld [vmem:[%s6311_s16 + $0x298] sm:$0xff]  }
 0x13c   : > { %4730 = vmatpush3.bf16.msra.mxu1 %v5181_v49  ;;  %v5233_v49 = vld [vmem:[%s6311_s16 + $0x2d8] sm:$0xff]  }
 0x13d   : > { %4731 = vmatprep.subr.bf16.mxu1 %v5184_v54  ;;  %v5237_v54 = vld [vmem:[%s6311_s16 + $0x2e0] sm:$0xff]  }
 0x13e   : > { %4710 = vmatpush3.bf16.msra.mxu0 %v5183_v52  ;;  %v5236_v52 = vld [vmem:[%s6311_s16 + $0x220] sm:$0xff]  }
 0x13f   : > { %4739 = vmatprep.subr.bf16.mxu0 %v5187_v56  ;;  %v5239_v56 = vld [vmem:[%s6311_s16 + $0x268] sm:$0xff]  }
 0x140   : > { %4732 = vmatpush3.bf16.msra.mxu1 %v5186_v55  ;;  %v5238_v55 = vld [vmem:[%s6311_s16 + $0x2a0] sm:$0xff]  }
 0x141   : > { %3662 = vmatmul.mubr.bf16.vlgmr.msra.gmra.mrb[0].mxu0 %v2287_v51  ;;  %4761 = vmatprep.subr.bf16.mxu1 %v5189_v60  ;;  %v5235_v51 = vld [vmem:[%s6311_s16 + $0x260] sm:$0xff]   ;;  %v5242_v60 = vld [vmem:[%s6311_s16 + $0x2a8] sm:$0xff]  }
 0x142   : > { %4740 = vmatpush3.bf16.msra.mxu0 %v5188_v58  ;;  %3741 = vmatprep.mubr.bf16.mxu0 %v2308_v53  ;;  %v2313_v53 = vcombine.high %v6377_v12, %v6377_v12 }
 0x143   : > { %3702 = vmatmul.mubr.bf16.vlgmr.msra.gmra.mrb[0].mxu1 %v2309_v57  ;;  %4741 = vmatprep.subr.bf16.mxu0 %v5191_v62  ;;  %v5240_v57 = vld [vmem:[%s6311_s16 + $0x228] sm:$0xff]   ;;  %v5244_v62 = vld [vmem:[%s6311_s16 + $0x230] sm:$0xff]  }
 0x144   : > { %4762 = vmatpush3.bf16.msra.mxu1 %v5190_v61  ;;  %3781 = vmatprep.mubr.bf16.mxu1 %v2312_v59  ;;  %v6428_v58 = vrot.slane %v2313_v53, %v6316_v16  ;;  %v5241_v59 = vld [vmem:[%s6311_s16 + $0x2e8] sm:$0xff]   ;;  %v5243_v61 = vld [vmem:[%s6311_s16 + $0x270] sm:$0xff]  }
 0x145   : > { %4763 = vmatprep.subr.bf16.mxu1 %v5193_v0  ;;  %v5245_v0 = vld [vmem:[%s6311_s16 + $0x2f0] sm:$0xff]   ;;  %v5291_v53 = vld [vmem:[%s6311_s16 + $0x488] sm:$0xff]  }
 0x146   : > { %4742 = vmatpush3.bf16.msra.mxu0 %v5192_v63  ;;  %v2329_v63 = vcombine.high %v6428_v58, %v6428_v58 }
 0x147   : > { %4743 = vmatprep.subr.bf16.mxu0 %v5195_v2  ;;  %v5247_v2 = vld [vmem:[%s6311_s16 + $0x278] sm:$0xff]  }
 0x148   : > { %4764 = vmatpush3.bf16.msra.mxu1 %v5194_v1  ;;  %v5246_v1 = vld [vmem:[%s6311_s16 + $0x2b0] sm:$0xff]  }
 0x149   : > { %4765 = vmatprep.subr.bf16.mxu1 %v5197_v4  ;;  %v5248_v4 = vld [vmem:[%s6311_s16 + $0x238] sm:$0xff]  }
 0x14a   : > { %4744 = vmatpush3.bf16.msra.mxu0 %v5196_v3  ;;  %v2336_v3 = vrot.slane %v6386_v19, %v6316_v16  ;;  %v5258_v19 = vld [vmem:[%s6311_s16 + $0x388] sm:$0xff]  }
 0x14b   : > { %4745 = vmatprep.subr.bf16.mxu0 %v5199_v6  ;;  %v5249_v6 = vld [vmem:[%s6311_s16 + $0x2f8] sm:$0xff]  }
 0x14c   : > { %4766 = vmatpush3.bf16.msra.mxu1 %v5198_v5  ;;  %v2357_v5 = vrot.slane %v2329_v63, %v6316_v16  ;;  %v5301_v63 = vld [vmem:[%s6311_s16 + $0x420] sm:$0xff]  }
 0x14d   : > { %4767 = vmatprep.subr.bf16.mxu1 %v5201_v8  ;;  %v5251_v8 = vld [vmem:[%s6311_s16 + $0x340] sm:$0xff]  }
 0x14e   : > { %4746 = vmatpush3.bf16.msra.mxu0 %v5200_v7  ;;  %v5250_v7 = vld [vmem:[%s6311_s16 + $0x2b8] sm:$0xff]   ;;  %v2361_v12 = vcombine.high %v2357_v5, %v2357_v5 }
 0x14f   : > { %4747 = vmatprep.subr.bf16.mxu0 %v5203_v10  ;;  %v5252_v10 = vld [vmem:[%s6311_s16 + $0x300] sm:$0xff]  }
 0x150   : > { %4768 = vmatpush3.bf16.msra.mxu1 %v5202_v9  ;;  %v2358_v9 = vcombine.high %v2336_v3, %v2336_v3 }
 0x151   : > { %4769 = vmatprep.subr.bf16.mxu1 %v5205_v14  ;;  %v5254_v14 = vld [vmem:[%s6311_s16 + $0x380] sm:$0xff]  }
 0x152   : > { %4748 = vmatpush3.bf16.msra.mxu0 %v5204_v13  ;;  %v5253_v13 = vld [vmem:[%s6311_s16 + $0x3c0] sm:$0xff]  }
 0x153   : > { %4749 = vmatprep.subr.bf16.mxu0 %v5207_v17  ;;  %v5256_v17 = vld [vmem:[%s6311_s16 + $0x308] sm:$0xff]  }
 0x154   : > { %4770 = vmatpush3.bf16.msra.mxu1 %v5206_v15  ;;  %v5255_v15 = vld [vmem:[%s6311_s16 + $0x348] sm:$0xff]  }
 0x155   : > { %4771 = vmatprep.subr.bf16.mxu1 %v5209_v20  ;;  %v5259_v20 = vld [vmem:[%s6311_s16 + $0x350] sm:$0xff]  }
 0x156   : > { %4750 = vmatpush3.bf16.msra.mxu0 %v5208_v18  ;;  %v5257_v18 = vld [vmem:[%s6311_s16 + $0x3c8] sm:$0xff]  }
 0x157   : > { %4751 = vmatprep.subr.bf16.mxu0 %v5211_v22  ;;  %v5261_v22 = vld [vmem:[%s6311_s16 + $0x3d0] sm:$0xff]  }
 0x158   : > { %4772 = vmatpush3.bf16.msra.mxu1 %v5210_v21  ;;  %v5260_v21 = vld [vmem:[%s6311_s16 + $0x310] sm:$0xff]  }
 0x159   : > { %4773 = vmatprep.subr.bf16.mxu1 %v5213_v25  ;;  %v5264_v25 = vld [vmem:[%s6311_s16 + $0x318] sm:$0xff]  }
 0x15a   : > { %4752 = vmatpush3.bf16.msra.mxu0 %v5212_v23  ;;  %v5262_v23 = vld [vmem:[%s6311_s16 + $0x390] sm:$0xff]  }
 0x15b   : > { %4753 = vmatprep.subr.bf16.mxu0 %v5215_v27  ;;  %v5266_v27 = vld [vmem:[%s6311_s16 + $0x398] sm:$0xff]  }
 0x15c   : > { %4774 = vmatpush3.bf16.msra.mxu1 %v5214_v26  ;;  %v5265_v26 = vld [vmem:[%s6311_s16 + $0x3d8] sm:$0xff]  }
 0x15d   : > { %4775 = vmatprep.subr.bf16.mxu1 %v5217_v31  ;;  %v5270_v31 = vld [vmem:[%s6311_s16 + $0x3a0] sm:$0xff]  }
 0x15e   : > { %4754 = vmatpush3.bf16.msra.mxu0 %v5216_v29  ;;  %v5268_v29 = vld [vmem:[%s6311_s16 + $0x320] sm:$0xff]  }
 0x15f   : > { %4783 = vmatprep.subr.bf16.mxu0 %v5219_v33  ;;  %v5272_v33 = vld [vmem:[%s6311_s16 + $0x328] sm:$0xff]  }
 0x160   : > { %4776 = vmatpush3.bf16.msra.mxu1 %v5218_v32  ;;  %v5271_v32 = vld [vmem:[%s6311_s16 + $0x368] sm:$0xff]  }
 0x161   : > { %3742 = vmatmul.mubr.bf16.vlgmr.msra.gmra.mrb[4].mxu0 %v2294_v28  ;;  %4805 = vmatprep.subr.bf16.mxu1 %v5221_v37  ;;  %v5267_v28 = vld [vmem:[%s6311_s16 + $0x360] sm:$0xff]   ;;  %v5276_v37 = vld [vmem:[%s6311_s16 + $0x330] sm:$0xff]  }
 0x162   : > { %4784 = vmatpush3.bf16.msra.mxu0 %v5220_v35  ;;  %3821 = vmatprep.mubr.bf16.mxu0 %v2350_v30  ;;  %v5269_v30 = vld [vmem:[%s6311_s16 + $0x3e0] sm:$0xff]   ;;  %v5274_v35 = vld [vmem:[%s6311_s16 + $0x3a8] sm:$0xff]  }
 0x163   : > { %3782 = vmatmul.mubr.bf16.vlgmr.msra.gmra.mrb[4].mxu1 %v2310_v34  ;;  %4785 = vmatprep.subr.bf16.mxu0 %v5223_v39  ;;  %v5273_v34 = vld [vmem:[%s6311_s16 + $0x3e8] sm:$0xff]   ;;  %v5278_v39 = vld [vmem:[%s6311_s16 + $0x3b0] sm:$0xff]  }
 0x164   : > { %4806 = vmatpush3.bf16.msra.mxu1 %v5222_v38  ;;  %3861 = vmatprep.mubr.bf16.mxu1 %v2360_v36  ;;  %v5275_v36 = vld [vmem:[%s6311_s16 + $0x370] sm:$0xff]  }
 0x165   : > { %4807 = vmatprep.subr.bf16.mxu1 %v5225_v41  ;;  %v5277_v38 = vld [vmem:[%s6311_s16 + $0x3f0] sm:$0xff]   ;;  %v2343_v41 = vrot.slane %v6428_v58, %v6316_v16  ;;  %v5296_v58 = vld [vmem:[%s6311_s16 + $0x458] sm:$0xff]  }
 0x166   : > { %4786 = vmatpush3.bf16.msra.mxu0 %v5224_v40  ;;  %v5279_v40 = vld [vmem:[%s6311_s16 + $0x378] sm:$0xff]  }
 0x167   : > { %4787 = vmatprep.subr.bf16.mxu0 %v5227_v43  ;;  %v5281_v43 = vld [vmem:[%s6311_s16 + $0x3f8] sm:$0xff]  }
 0x168   : > { %4808 = vmatpush3.bf16.msra.mxu1 %v5226_v42  ;;  %v5280_v42 = vld [vmem:[%s6311_s16 + $0x338] sm:$0xff]  }
 0x169   : > { %4809 = vmatprep.subr.bf16.mxu1 %v5229_v45  ;;  %v5284_v45 = vld [vmem:[%s6311_s16 + $0x440] sm:$0xff]  }
 0x16a   : > { %4788 = vmatpush3.bf16.msra.mxu0 %v5228_v44  ;;  %v5283_v44 = vld [vmem:[%s6311_s16 + $0x3b8] sm:$0xff]  }
 0x16b   : > { %4789 = vmatprep.subr.bf16.mxu0 %v5231_v47  ;;  %v5285_v47 = vld [vmem:[%s6311_s16 + $0x400] sm:$0xff]  }
 0x16c   : > { %4810 = vmatpush3.bf16.msra.mxu1 %v5230_v46  ;;  %v2359_v46 = vcombine.high %v2343_v41, %v2343_v41 }
 0x16d   : > { %4811 = vmatprep.subr.bf16.mxu1 %v5233_v49  ;;  %v5287_v49 = vld [vmem:[%s6311_s16 + $0x480] sm:$0xff]  }
 0x16e   : > { %4790 = vmatpush3.bf16.msra.mxu0 %v5232_v48  ;;  %v5286_v48 = vld [vmem:[%s6311_s16 + $0x4c0] sm:$0xff]  }
 0x16f   : > { %4791 = vmatprep.subr.bf16.mxu0 %v5235_v51  ;;  %v5289_v51 = vld [vmem:[%s6311_s16 + $0x408] sm:$0xff]  }
 0x170   : > { %4812 = vmatpush3.bf16.msra.mxu1 %v5234_v50  ;;  %v5288_v50 = vld [vmem:[%s6311_s16 + $0x448] sm:$0xff]  }
 0x171   : > { %4813 = vmatprep.subr.bf16.mxu1 %v5237_v54  ;;  %v5292_v54 = vld [vmem:[%s6311_s16 + $0x450] sm:$0xff]  }
 0x172   : > { %4792 = vmatpush3.bf16.msra.mxu0 %v5236_v52  ;;  %v5290_v52 = vld [vmem:[%s6311_s16 + $0x4c8] sm:$0xff]  }
 0x173   : > { %4793 = vmatprep.subr.bf16.mxu0 %v5239_v56  ;;  %v5294_v56 = vld [vmem:[%s6311_s16 + $0x4d0] sm:$0xff]  }
 0x174   : > { %4814 = vmatpush3.bf16.msra.mxu1 %v5238_v55  ;;  %v5293_v55 = vld [vmem:[%s6311_s16 + $0x410] sm:$0xff]  }
 0x175   : > { %4815 = vmatprep.subr.bf16.mxu1 %v5241_v59  ;;  %v5297_v59 = vld [vmem:[%s6311_s16 + $0x418] sm:$0xff]  }
 0x176   : > { %4794 = vmatpush3.bf16.msra.mxu0 %v5240_v57  ;;  %v5295_v57 = vld [vmem:[%s6311_s16 + $0x490] sm:$0xff]  }
 0x177   : > { %4795 = vmatprep.subr.bf16.mxu0 %v5243_v61  ;;  %v5299_v61 = vld [vmem:[%s6311_s16 + $0x498] sm:$0xff]  }
 0x178   : > { %4816 = vmatpush3.bf16.msra.mxu1 %v5242_v60  ;;  %v5298_v60 = vld [vmem:[%s6311_s16 + $0x4d8] sm:$0xff]  }
 0x179   : > { %4817 = vmatprep.subr.bf16.mxu1 %v5245_v0  ;;  %v5302_v0 = vld [vmem:[%s6311_s16 + $0x4e0] sm:$0xff]  }
 0x17a   : > { %4796 = vmatpush3.bf16.msra.mxu0 %v5244_v62  ;;  %v5300_v62 = vld [vmem:[%s6311_s16 + $0x460] sm:$0xff]  }
 0x17b   : > { %4797 = vmatprep.subr.bf16.mxu0 %v5247_v2  ;;  %v5304_v2 = vld [vmem:[%s6311_s16 + $0x468] sm:$0xff]  }
 0x17c   : > { %4818 = vmatpush3.bf16.msra.mxu1 %v5246_v1  ;;  %v5303_v1 = vld [vmem:[%s6311_s16 + $0x4a0] sm:$0xff]  }
 0x17d   : > { %4819 = vmatprep.subr.bf16.mxu1 %v5249_v6  ;;  %v5308_v6 = vld [vmem:[%s6311_s16 + $0x470] sm:$0xff]  }
 0x17e   : > { %4798 = vmatpush3.bf16.msra.mxu0 %v5248_v4  ;;  %v5306_v4 = vld [vmem:[%s6311_s16 + $0x4e8] sm:$0xff]  }
 0x17f   : > { %4827 = vmatprep.subr.bf16.mxu0 %v5251_v8  ;;  %v5310_v8 = vld [vmem:[%s6311_s16 + $0x4f0] sm:$0xff]  }
 0x180   : > { %4820 = vmatpush3.bf16.msra.mxu1 %v5250_v7  ;;  %v5309_v7 = vld [vmem:[%s6311_s16 + $0x430] sm:$0xff]  }
 0x181   : > { %3822 = vmatmul.mubr.bf16.vlgmr.msra.gmra.mrb[8].mxu0 %v2336_v3  ;;  %4849 = vmatprep.subr.bf16.mxu1 %v5253_v13  ;;  %v5305_v3 = vld [vmem:[%s6311_s16 + $0x428] sm:$0xff]   ;;  %v5314_v13 = vld [vmem:[%s6311_s16 + $0x4f8] sm:$0xff]  }
 0x182   : > { %4828 = vmatpush3.bf16.msra.mxu0 %v5252_v10  ;;  %3901 = vmatprep.mubr.bf16.mxu0 %v2357_v5  ;;  %v5307_v5 = vld [vmem:[%s6311_s16 + $0x4a8] sm:$0xff]   ;;  %v5312_v10 = vld [vmem:[%s6311_s16 + $0x478] sm:$0xff]  }
 0x183   : > { %3862 = vmatmul.mubr.bf16.vlgmr.msra.gmra.mrb[8].mxu1 %v2358_v9  ;;  %4829 = vmatprep.subr.bf16.mxu0 %v5255_v15  ;;  %v5311_v9 = vld [vmem:[%s6311_s16 + $0x4b0] sm:$0xff]  }
 0x184   : > { %4850 = vmatpush3.bf16.msra.mxu1 %v5254_v14  ;;  %3941 = vmatprep.mubr.bf16.mxu1 %v2361_v12  ;;  %v5313_v12 = vld [vmem:[%s6311_s16 + $0x438] sm:$0xff]   ;;  %v1859_v14 = vld [vmem:[%s6823_s0 + $0x10] sm:$0xff] }
 0x185   : > { %4851 = vmatprep.subr.bf16.mxu1 %v5257_v18  ;;  %v2369_v15 = vrot.slane %v1859_v14, %v6316_v16  ;;  %v2362_v18 = vcombine.high %v1859_v14, %v1859_v14 }
 0x186   : > { %4830 = vmatpush3.bf16.msra.mxu0 %v5256_v17  ;;  %v5315_v17 = vld [vmem:[%s6311_s16 + $0x4b8] sm:$0xff]  }
 0x187   : > { %4831 = vmatprep.subr.bf16.mxu0 %v5259_v20  ;;  %v2377_v20 = vcombine.high %v2369_v15, %v2369_v15 }
 0x188   : > { %4852 = vmatpush3.bf16.msra.mxu1 %v5258_v19  ;;  %v5316_v19 = vld [vmem:[%s6311_s16 + $0x540] sm:$0xff]  }
 0x189   : > { %4853 = vmatprep.subr.bf16.mxu1 %v5261_v22  ;;  %v6518_v22 = vrot.slane %v2362_v18, %v6316_v16 }
 0x18a   : > { %4832 = vmatpush3.bf16.msra.mxu0 %v5260_v21  ;;  %v2385_v21 = vrot.slane %v2369_v15, %v6316_v16 }
 0x18b   : > { %4833 = vmatprep.subr.bf16.mxu0 %v5263_v24  ;;  %v2399_v24 = vrot.slane %v2377_v20, %v6316_v16 }
 0x18c   : > { %4854 = vmatpush3.bf16.msra.mxu1 %v5262_v23  ;;  %v5318_v23 = vld [vmem:[%s6311_s16 + $0x5c0] sm:$0xff]  }
 0x18d   : > { %4855 = vmatprep.subr.bf16.mxu1 %v5265_v26  ;;  %v2378_v26 = vcombine.high %v6518_v22, %v6518_v22 }
 0x18e   : > { %4834 = vmatpush3.bf16.msra.mxu0 %v5264_v25  ;;  %v5317_v25 = vld [vmem:[%s6311_s16 + $0x500] sm:$0xff]  }
 0x18f   : > { %4835 = vmatprep.subr.bf16.mxu0 %v5267_v28  ;;  %v5320_v28 = vld [vmem:[%s6311_s16 + $0x548] sm:$0xff]  }
 0x190   : > { %4856 = vmatpush3.bf16.msra.mxu1 %v5266_v27  ;;  %v2407_v27 = vcombine.high %v2385_v21, %v2385_v21 }
 0x191   : > { %4857 = vmatprep.subr.bf16.mxu1 %v5269_v30  ;;  %v5319_v30 = vld [vmem:[%s6311_s16 + $0x580] sm:$0xff]  }
 0x192   : > { %4836 = vmatpush3.bf16.msra.mxu0 %v5268_v29  ;;  %v2409_v29 = vcombine.high %v2399_v24, %v2399_v24 }
 0x193   : > { %4837 = vmatprep.subr.bf16.mxu0 %v5271_v32  ;;  %v5322_v32 = vld [vmem:[%s6311_s16 + $0x5c8] sm:$0xff]  }
 0x194   : > { %4858 = vmatpush3.bf16.msra.mxu1 %v5270_v31  ;;  %v2406_v31 = vrot.slane %v2378_v26, %v6316_v16 }
 0x195   : > { %4859 = vmatprep.subr.bf16.mxu1 %v5273_v34 }
 0x196   : > { %4838 = vmatpush3.bf16.msra.mxu0 %v5272_v33  ;;  %v5321_v33 = vld [vmem:[%s6311_s16 + $0x508] sm:$0xff]   ;;  %v2410_v34 = vcombine.high %v2406_v31, %v2406_v31 }
 0x197   : > { %4839 = vmatprep.subr.bf16.mxu0 %v5275_v36  ;;  %v5323_v36 = vld [vmem:[%s6311_s16 + $0x588] sm:$0xff]  }
 0x198   : > { %4860 = vmatpush3.bf16.msra.mxu1 %v5274_v35  ;;  %v5324_v35 = vld [vmem:[%s6311_s16 + $0x550] sm:$0xff]  }
 0x199   : > { %4861 = vmatprep.subr.bf16.mxu1 %v5277_v38  ;;  %v5325_v38 = vld [vmem:[%s6311_s16 + $0x510] sm:$0xff]  }
 0x19a   : > { %4840 = vmatpush3.bf16.msra.mxu0 %v5276_v37  ;;  %v5326_v37 = vld [vmem:[%s6311_s16 + $0x5d0] sm:$0xff]  }
 0x19b   : > { %4841 = vmatprep.subr.bf16.mxu0 %v5279_v40  ;;  %v5327_v40 = vld [vmem:[%s6311_s16 + $0x590] sm:$0xff]  }
 0x19c   : > { %4862 = vmatpush3.bf16.msra.mxu1 %v5278_v39  ;;  %v5328_v39 = vld [vmem:[%s6311_s16 + $0x558] sm:$0xff]  }
 0x19d   : > { %4863 = vmatprep.subr.bf16.mxu1 %v5281_v43  ;;  %v5332_v43 = vld [vmem:[%s6311_s16 + $0x560] sm:$0xff]  }
 0x19e   : > { %4842 = vmatpush3.bf16.msra.mxu0 %v5280_v42  ;;  %v5329_v42 = vld [vmem:[%s6311_s16 + $0x518] sm:$0xff]  }
 0x19f   : > { %4871 = vmatprep.subr.bf16.mxu0 %v5284_v45  ;;  %v5334_v45 = vld [vmem:[%s6311_s16 + $0x5e0] sm:$0xff]  }
 0x1a0   : > { %4864 = vmatpush3.bf16.msra.mxu1 %v5283_v44  ;;  %v5331_v44 = vld [vmem:[%s6311_s16 + $0x598] sm:$0xff]  }
 0x1a1   : > { %3902 = vmatmul.mubr.bf16.vlgmr.msra.gmra.mrb[12].mxu0 %v2343_v41  ;;  %4893 = vmatprep.subr.bf16.mxu1 %v5286_v48  ;;  %v5330_v41 = vld [vmem:[%s6311_s16 + $0x5d8] sm:$0xff]   ;;  %v5335_v48 = vld [vmem:[%s6311_s16 + $0x5a0] sm:$0xff]  }
 0x1a2   : > { %4872 = vmatpush3.bf16.msra.mxu0 %v5285_v47  ;;  %3981 = vmatprep.mubr.bf16.mxu0 %v2399_v24  ;;  %v5336_v47 = vld [vmem:[%s6311_s16 + $0x568] sm:$0xff]  }
 0x1a3   : > { %3942 = vmatmul.mubr.bf16.vlgmr.msra.gmra.mrb[12].mxu1 %v2359_v46  ;;  %4873 = vmatprep.subr.bf16.mxu0 %v5288_v50  ;;  %v5333_v46 = vld [vmem:[%s6311_s16 + $0x520] sm:$0xff]   ;;  %v5337_v50 = vld [vmem:[%s6311_s16 + $0x528] sm:$0xff]  }
 0x1a4   : > { %4894 = vmatpush3.bf16.msra.mxu1 %v5287_v49  ;;  %4021 = vmatprep.mubr.bf16.mxu1 %v2409_v29  ;;  %v5338_v49 = vld [vmem:[%s6311_s16 + $0x5e8] sm:$0xff]  }
 0x1a5   : > { %4895 = vmatprep.subr.bf16.mxu1 %v5290_v52  ;;  %v5339_v52 = vld [vmem:[%s6311_s16 + $0x5a8] sm:$0xff]  }
 0x1a6   : > { %4874 = vmatpush3.bf16.msra.mxu0 %v5289_v51  ;;  %v5340_v51 = vld [vmem:[%s6311_s16 + $0x570] sm:$0xff]  }
 0x1a7   : > { %4875 = vmatprep.subr.bf16.mxu0 %v5292_v54  ;;  %v5341_v54 = vld [vmem:[%s6311_s16 + $0x530] sm:$0xff]  }
 0x1a8   : > { %4896 = vmatpush3.bf16.msra.mxu1 %v5291_v53  ;;  %v5342_v53 = vld [vmem:[%s6311_s16 + $0x5f0] sm:$0xff]  }
 0x1a9   : > { %4897 = vmatprep.subr.bf16.mxu1 %v5294_v56  ;;  %v5343_v56 = vld [vmem:[%s6311_s16 + $0x5b0] sm:$0xff]  }
 0x1aa   : > { %4876 = vmatpush3.bf16.msra.mxu0 %v5293_v55  ;;  %v5344_v55 = vld [vmem:[%s6311_s16 + $0x578] sm:$0xff]  }
 0x1ab   : > { %4877 = vmatprep.subr.bf16.mxu0 %v5296_v58  ;;  %v5345_v58 = vld [vmem:[%s6311_s16 + $0x538] sm:$0xff]  }
 0x1ac   : > { %4898 = vmatpush3.bf16.msra.mxu1 %v5295_v57  ;;  %v5346_v57 = vld [vmem:[%s6311_s16 + $0x5f8] sm:$0xff]  }
 0x1ad   : > { %4899 = vmatprep.subr.bf16.mxu1 %v5298_v60  ;;  %v5348_v60 = vld [vmem:[%s6311_s16 + $0x5b8] sm:$0xff]  }
 0x1ae   : > { %4878 = vmatpush3.bf16.msra.mxu0 %v5297_v59  ;;  %v2392_v59 = vrot.slane %v6518_v22, %v6316_v16 }
 0x1af   : > { %4879 = vmatprep.subr.bf16.mxu0 %v5300_v62  ;;  %v5439_v62 = vmov 0.0  }
 0x1b0   : > { %4900 = vmatpush3.bf16.msra.mxu1 %v5299_v61  ;;  %v5349_v61 = vld [vmem:[%s6311_s16 + $0x600] sm:$0xff]  }
 0x1b1   : > { %4901 = vmatprep.subr.bf16.mxu1 %v5302_v0  ;;  %v5350_v0 = vld [vmem:[%s6311_s16 + $0x608] sm:$0xff]  }
 0x1b2   : > { %4880 = vmatpush3.bf16.msra.mxu0 %v5301_v63  ;;  %v2408_v63 = vcombine.high %v2392_v59, %v2392_v59 }
 0x1b3   : > { %4881 = vmatprep.subr.bf16.mxu0 %v5304_v2  ;;  %v5352_v2 = vld [vmem:[%s6311_s16 + $0x618] sm:$0xff]  }
 0x1b4   : > { %4902 = vmatpush3.bf16.msra.mxu1 %v5303_v1  ;;  %v5351_v1 = vld [vmem:[%s6311_s16 + $0x610] sm:$0xff]  }
 0x1b5   : > { %4903 = vmatprep.subr.bf16.mxu1 %v5306_v4 }
 0x1b6   : > { %4882 = vmatpush3.bf16.msra.mxu0 %v5305_v3  ;;  %v4487_v3 = vld.sshfl [vmem:[%s6823_s0 + $0x18] sm:$0x1 pattern:$0x75316420] }
 0x1b7   : > { %4883 = vmatprep.subr.bf16.mxu0 %v5308_v6  ;;  %v2424_v4 = vrot.slane %v4487_v3, %v6316_v16  ;;  %v4486_v6 = vld [vmem:[%s1855_s30] ss:$0 sm:$0xff] }
 0x1b8   : > { %4904 = vmatpush3.bf16.msra.mxu1 %v5307_v5 }
 0x1b9   : > { %4905 = vmatprep.subr.bf16.mxu1 %v5310_v8 }
 0x1ba   : > { %4884 = vmatpush3.bf16.msra.mxu0 %v5309_v7 }
 0x1bb   : > { %4885 = vmatprep.subr.bf16.mxu0 %v5312_v10 }
 0x1bc   : > { %4906 = vmatpush3.bf16.msra.mxu1 %v5311_v9 }
 0x1bd   : > { %4907 = vmatprep.subr.bf16.mxu1 %v5314_v13 }
 0x1be   : > { %4886 = vmatpush3.bf16.msra.mxu0 %v5313_v12 }
 0x1bf   : > { %4915 = vmatprep.subr.bf16.mxu0 %v5316_v19 }
 0x1c0   : > { %4908 = vmatpush3.bf16.msra.mxu1 %v5315_v17 }
 0x1c1   : > { %4937 = vmatprep.subr.bf16.mxu1 %v5318_v23  ;;  %3982 = vmatmul.mubr.bf16.vlgmr.msra.gmra.mrb[16].mxu0 %v2385_v21 }
 0x1c2   : > { %4916 = vmatpush3.bf16.msra.mxu0 %v5317_v25  ;;  %4061 = vmatprep.mubr.bf16.mxu0 %v2406_v31 }
 0x1c3   : > { %4022 = vmatmul.mubr.bf16.vlgmr.msra.gmra.mrb[16].mxu1 %v2407_v27  ;;  %4917 = vmatprep.subr.bf16.mxu0 %v5320_v28 }
 0x1c4   : > { %4938 = vmatpush3.bf16.msra.mxu1 %v5319_v30  ;;  %4101 = vmatprep.mubr.bf16.mxu1 %v2410_v34 }
 0x1c5   : > { %4939 = vmatprep.subr.bf16.mxu1 %v5322_v32 }
 0x1c6   : > { %4918 = vmatpush3.bf16.msra.mxu0 %v5321_v33 }
 0x1c7   : > { %4919 = vmatprep.subr.bf16.mxu0 %v5324_v35 }
 0x1c8   : > { %4940 = vmatpush3.bf16.msra.mxu1 %v5323_v36 }
 0x1c9   : > { %4941 = vmatprep.subr.bf16.mxu1 %v5326_v37 }
 0x1ca   : > { %4920 = vmatpush3.bf16.msra.mxu0 %v5325_v38 }
 0x1cb   : > { %4921 = vmatprep.subr.bf16.mxu0 %v5328_v39 }
 0x1cc   : > { %4942 = vmatpush3.bf16.msra.mxu1 %v5327_v40 }
 0x1cd   : > { %4943 = vmatprep.subr.bf16.mxu1 %v5330_v41 }
 0x1ce   : > { %4922 = vmatpush3.bf16.msra.mxu0 %v5329_v42 }
 0x1cf   : > { %4923 = vmatprep.subr.bf16.mxu0 %v5332_v43 }
 0x1d0   : > { %4944 = vmatpush3.bf16.msra.mxu1 %v5331_v44 }
 0x1d1   : > { %4945 = vmatprep.subr.bf16.mxu1 %v5334_v45 }
 0x1d2   : > { %4924 = vmatpush3.bf16.msra.mxu0 %v5333_v46 }
 0x1d3   : > { %4925 = vmatprep.subr.bf16.mxu0 %v5336_v47 }
 0x1d4   : > { %4946 = vmatpush3.bf16.msra.mxu1 %v5335_v48 }
 0x1d5   : > { %4947 = vmatprep.subr.bf16.mxu1 %v5338_v49 }
 0x1d6   : > { %4926 = vmatpush3.bf16.msra.mxu0 %v5337_v50 }
 0x1d7   : > { %4927 = vmatprep.subr.bf16.mxu0 %v5340_v51 }
 0x1d8   : > { %4948 = vmatpush3.bf16.msra.mxu1 %v5339_v52 }
 0x1d9   : > { %4949 = vmatprep.subr.bf16.mxu1 %v5342_v53 }
 0x1da   : > { %4928 = vmatpush3.bf16.msra.mxu0 %v5341_v54 }
 0x1db   : > { %4929 = vmatprep.subr.bf16.mxu0 %v5344_v55 }
 0x1dc   : > { %4950 = vmatpush3.bf16.msra.mxu1 %v5343_v56 }
 0x1dd   : > { %4951 = vmatprep.subr.bf16.mxu1 %v5346_v57 }
 0x1de   : > { %4930 = vmatpush3.bf16.msra.mxu0 %v5345_v58 }
 0x1df   : > { %5034 = vmatprep.subr.bf16.mxu0 %v5439_v62 }
 0x1e0   : > { %4952 = vmatpush3.bf16.msra.mxu1 %v5348_v60 }
 0x1e1   : > { %4062 = vmatmul.mubr.bf16.vlgmr.msra.gmra.mrb[20].mxu0 %v2392_v59 }
 0x1e2   : > { %5035 = vmatpush3.bf16.msra.mxu0 %v5349_v61  ;;  %5042 = vmatprep.mubr.msk.bf16.mxu0 %vm5440_vm0, %v5439_v62 }
 0x1e3   : > { %4102 = vmatmul.mubr.bf16.vlgmr.msra.gmra.mrb[20].mxu1 %v2408_v63  ;;  %5036 = vmatprep.subr.bf16.mxu0 %v5439_v62 }
 0x1e6   : > { %5037 = vmatpush3.bf16.msra.mxu0 %v5350_v0 }
 0x1e7   : > { %5038 = vmatprep.subr.bf16.mxu0 %v5439_v62 }
 0x1ea   : > { %5039 = vmatpush3.bf16.msra.mxu0 %v5351_v1 }
 0x1eb   : > { %5040 = vmatprep.subr.bf16.mxu0 %v5439_v62 }
 0x1ee   : > { %5041 = vmatpush3.bf16.msra.mxu0 %v5352_v2 }
 0x1f1   : > { %5043 = vmatmul.mubr.msk.bf16.vlgmr.msra.gmra.mrb[24].mxu0 %vm3625_vm1, %v2424_v4 }
 0x214   : > { %v4711_v5 = vpop.f32.mrb[0].mxu0 }
 0x215   : > { %v4712_v7 = vpop.f32.mrb[1].mxu0 }
 0x216   : > { %v4713_v8 = vadd.f32 %v4712_v7, %v4711_v5  ;;  %v4714_v9 = vpop.f32.mrb[2].mxu0  ;;  %v4733_v10 = vpop.f32.mrb[0].mxu1 }
 0x217   : > { %v4715_v12 = vpop.f32.mrb[3].mxu0  ;;  %v4734_v13 = vpop.f32.mrb[1].mxu1 }
 0x218   : > { %v3664_v14 = vadd.f32 %v4713_v8, %v4486_v6  ;;  %v4735_v15 = vadd.f32 %v4734_v13, %v4733_v10  ;;  %v4736_v16 = vpop.f32.mrb[2].mxu1 }
 0x219   : > { %v4737_v17 = vpop.f32.mrb[3].mxu1 }
 0x21a   : > { %v3704_v18 = vadd.f32 %v4735_v15, %v3664_v14 }
 0x234   : > { %v4755_v19 = vpop.f32.mrb[4].mxu0 }
 0x235   : > { %v4756_v20 = vpop.f32.mrb[5].mxu0 }
 0x236   : > { %v4757_v21 = vadd.f32 %v4756_v20, %v4755_v19  ;;  %v4758_v22 = vpop.f32.mrb[6].mxu0  ;;  %v4777_v23 = vpop.f32.mrb[4].mxu1 }
 0x237   : > { %v4759_v24 = vpop.f32.mrb[7].mxu0  ;;  %v4778_v25 = vpop.f32.mrb[5].mxu1  ;;  %v4177_v22 = vld [vmem:[%s6826_s3 + $0x80] sm:$0xff] (!%p4687_p9) }
 0x238   : > { %v3744_v26 = vadd.f32 %v4757_v21, %v3704_v18  ;;  %v4779_v27 = vadd.f32 %v4778_v25, %v4777_v23  ;;  %v4780_v28 = vpop.f32.mrb[6].mxu1  ;;  %v4178_v23 = vld [vmem:[%s6826_s3 + $0x88] sm:$0xff] (!%p4687_p9)  ;;  %v4161_v24 = vld [vmem:[%s6826_s3] sm:$0xff] (!%p4687_p9) }
 0x239   : > { %v4781_v29 = vpop.f32.mrb[7].mxu1  ;;  %v5046_v25 = vpack.c.bf16 (!%p4687_p9), %v4178_v23, %v4177_v22  ;;  %v4210_v28 = vld [vmem:[%s6826_s3 + $0x188] sm:$0xff] (!%p4687_p9)  ;;  %v4219_v22 = vld [vmem:[%s6826_s3 + $0x1d0] sm:$0xff] (!%p4687_p9)  ;;  %v4220_v23 = vld [vmem:[%s6826_s3 + $0x1d8] sm:$0xff] (!%p4687_p9) }
 0x23a   : > { %v3784_v30 = vadd.f32 %v4779_v27, %v3744_v26  ;;  %v4162_v26 = vld [vmem:[%s6826_s3 + $0x8] sm:$0xff] (!%p4687_p9)  ;;  %v4209_v27 = vld [vmem:[%s6826_s3 + $0x180] sm:$0xff] (!%p4687_p9) }
 0x23b   : > { %v5048_v29 = vpack.c.bf16 (!%p4687_p9), %v4162_v26, %v4161_v24  ;;  %5047 = vmatprep.subr.bf16.mxu0 (!%p4687_p9), %v5046_v25 }
 0x23d   : > { %5049 = vmatpush3.bf16.msra.mxu0 (!%p4687_p9), %v5048_v29  ;;  %v4203_v29 = vld [vmem:[%s6826_s3 + $0x150] sm:$0xff] (!%p4687_p9) }
 0x254   : > { %v4799_v31 = vpop.f32.mrb[8].mxu0 }
 0x255   : > { %v4800_v32 = vpop.f32.mrb[9].mxu0 }
 0x256   : > { %v4801_v33 = vadd.f32 %v4800_v32, %v4799_v31  ;;  %v4802_v34 = vpop.f32.mrb[10].mxu0  ;;  %v4821_v35 = vpop.f32.mrb[8].mxu1  ;;  %v4193_v31 = vld [vmem:[%s6826_s3 + $0x100] sm:$0xff] (!%p4687_p9)  ;;  %v4194_v32 = vld [vmem:[%s6826_s3 + $0x108] sm:$0xff] (!%p4687_p9) }
 0x257   : > { %v4803_v36 = vpop.f32.mrb[11].mxu0  ;;  %v4822_v37 = vpop.f32.mrb[9].mxu1  ;;  %v5080_v34 = vpack.c.bf16 (!%p4687_p9), %v4194_v32, %v4193_v31  ;;  %v4204_v31 = vld [vmem:[%s6826_s3 + $0x158] sm:$0xff] (!%p4687_p9)  ;;  %v4189_v32 = vld [vmem:[%s6826_s3 + $0xe0] sm:$0xff] (!%p4687_p9) }
 0x258   : > { %v3824_v38 = vadd.f32 %v4801_v33, %v3784_v30  ;;  %v4823_v39 = vadd.f32 %v4822_v37, %v4821_v35  ;;  %v4824_v40 = vpop.f32.mrb[10].mxu1  ;;  %v5078_v30 = vpack.c.bf16 (!%p4687_p9), %v4210_v28, %v4209_v27  ;;  %v4179_v33 = vld [vmem:[%s6826_s3 + $0x90] sm:$0xff] (!%p4687_p9)  ;;  %v4180_v35 = vld [vmem:[%s6826_s3 + $0x98] sm:$0xff] (!%p4687_p9) }
 0x259   : > { %v4825_v41 = vpop.f32.mrb[11].mxu1  ;;  %v4163_v36 = vld [vmem:[%s6826_s3 + $0x10] sm:$0xff] (!%p4687_p9)  ;;  %v4164_v37 = vld [vmem:[%s6826_s3 + $0x18] sm:$0xff] (!%p4687_p9) }
 0x25a   : > { %v3864_v42 = vadd.f32 %v4823_v39, %v3824_v38  ;;  %5079 = vmatprep.subr.bf16.mxu1 (!%p4687_p9), %v5078_v30  ;;  %v5050_v38 = vpack.c.bf16 (!%p4687_p9), %v4180_v35, %v4179_v33  ;;  %v5052_v39 = vpack.c.bf16 (!%p4687_p9), %v4164_v37, %v4163_v36  ;;  %v4211_v40 = vld [vmem:[%s6826_s3 + $0x190] sm:$0xff] (!%p4687_p9)  ;;  %v4212_v41 = vld [vmem:[%s6826_s3 + $0x198] sm:$0xff] (!%p4687_p9)  ;;  %v5098_v30 = vpack.c.bf16 (!%p4687_p9), %v4220_v23, %v4219_v22  ;;  %v4190_v33 = vld [vmem:[%s6826_s3 + $0xe8] sm:$0xff] (!%p4687_p9) }
 0x25b   : > { %5081 = vmatpush3.bf16.msra.mxu1 (!%p4687_p9), %v5080_v34  ;;  %v4171_v27 = vld [vmem:[%s6826_s3 + $0x50] sm:$0xff] (!%p4687_p9)  ;;  %v4172_v28 = vld [vmem:[%s6826_s3 + $0x58] sm:$0xff] (!%p4687_p9)  ;;  %v4221_v35 = vld [vmem:[%s6826_s3 + $0x1e0] sm:$0xff] (!%p4687_p9) }
 0x25c   : > { %5051 = vmatprep.subr.bf16.mxu0 (!%p4687_p9), %v5050_v38  ;;  %v4222_v36 = vld [vmem:[%s6826_s3 + $0x1e8] sm:$0xff] (!%p4687_p9)  ;;  %v5068_v37 = vpack.c.bf16 (!%p4687_p9), %v4172_v28, %v4171_v27  ;;  %v4173_v38 = vld [vmem:[%s6826_s3 + $0x60] sm:$0xff] (!%p4687_p9) }
 0x25d   : > { %5053 = vmatpush3.bf16.msra.mxu0 (!%p4687_p9), %v5052_v39  ;;  %v5100_v39 = vpack.c.bf16 (!%p4687_p9), %v4204_v31, %v4203_v29 }
 0x274   : > { %v4843_v43 = vpop.f32.mrb[12].mxu0 }
 0x275   : > { %v4844_v44 = vpop.f32.mrb[13].mxu0 }
 0x276   : > { %v4845_v45 = vadd.f32 %v4844_v44, %v4843_v43  ;;  %v4846_v46 = vpop.f32.mrb[14].mxu0  ;;  %v4865_v47 = vpop.f32.mrb[12].mxu1  ;;  %v5082_v43 = vpack.c.bf16 (!%p4687_p9), %v4212_v41, %v4211_v40  ;;  %v4196_v44 = vld [vmem:[%s6826_s3 + $0x118] sm:$0xff] (!%p4687_p9)  ;;  %v5070_v40 = vpack.c.bf16 (!%p4687_p9), %v4190_v33, %v4189_v32  ;;  %v4205_v41 = vld [vmem:[%s6826_s3 + $0x160] sm:$0xff] (!%p4687_p9) }
 0x277   : > { %v4847_v48 = vpop.f32.mrb[15].mxu0  ;;  %v4866_v49 = vpop.f32.mrb[13].mxu1  ;;  %v4182_v46 = vld [vmem:[%s6826_s3 + $0xa8] sm:$0xff] (!%p4687_p9) }
 0x278   : > { %v3904_v50 = vadd.f32 %v4845_v45, %v3864_v42  ;;  %v4867_v51 = vadd.f32 %v4866_v49, %v4865_v47  ;;  %v4868_v52 = vpop.f32.mrb[14].mxu1  ;;  %v4195_v42 = vld [vmem:[%s6826_s3 + $0x110] sm:$0xff] (!%p4687_p9)  ;;  %v4181_v45 = vld [vmem:[%s6826_s3 + $0xa0] sm:$0xff] (!%p4687_p9)  ;;  %5083 = vmatprep.subr.bf16.mxu1 (!%p4687_p9), %v5082_v43  ;;  %v5102_v43 = vpack.c.bf16 (!%p4687_p9), %v4222_v36, %v4221_v35 }
 0x279   : > { %v4869_v53 = vpop.f32.mrb[15].mxu1  ;;  %v5084_v47 = vpack.c.bf16 (!%p4687_p9), %v4196_v44, %v4195_v42  ;;  %v5054_v48 = vpack.c.bf16 (!%p4687_p9), %v4182_v46, %v4181_v45  ;;  %v4165_v49 = vld [vmem:[%s6826_s3 + $0x20] sm:$0xff] (!%p4687_p9)  ;;  %v4214_v52 = vld [vmem:[%s6826_s3 + $0x1a8] sm:$0xff] (!%p4687_p9)  ;;  %v4191_v45 = vld [vmem:[%s6826_s3 + $0xf0] sm:$0xff] (!%p4687_p9) }
 0x27a   : > { %v3944_v54 = vadd.f32 %v4867_v51, %v3904_v50  ;;  %v4166_v50 = vld [vmem:[%s6826_s3 + $0x28] sm:$0xff] (!%p4687_p9)  ;;  %v4213_v51 = vld [vmem:[%s6826_s3 + $0x1a0] sm:$0xff] (!%p4687_p9)  ;;  %v4192_v46 = vld [vmem:[%s6826_s3 + $0xf8] sm:$0xff] (!%p4687_p9) }
 0x27b   : > { %v4197_v53 = vld [vmem:[%s6826_s3 + $0x120] sm:$0xff] (!%p4687_p9)  ;;  %5085 = vmatpush3.bf16.msra.mxu1 (!%p4687_p9), %v5084_v47  ;;  %5055 = vmatprep.subr.bf16.mxu0 (!%p4687_p9), %v5054_v48  ;;  %v4206_v44 = vld [vmem:[%s6826_s3 + $0x168] sm:$0xff] (!%p4687_p9) }
 0x294   : > { %v4887_v55 = vpop.f32.mrb[16].mxu0 }
 0x295   : > { %v4888_v56 = vpop.f32.mrb[17].mxu0 }
 0x296   : > { %v4889_v57 = vadd.f32 %v4888_v56, %v4887_v55  ;;  %v4890_v58 = vpop.f32.mrb[18].mxu0  ;;  %v4909_v59 = vpop.f32.mrb[16].mxu1  ;;  %v5056_v55 = vpack.c.bf16 (!%p4687_p9), %v4166_v50, %v4165_v49  ;;  %v5086_v56 = vpack.c.bf16 (!%p4687_p9), %v4214_v52, %v4213_v51  ;;  %v4223_v49 = vld [vmem:[%s6826_s3 + $0x1f0] sm:$0xff] (!%p4687_p9)  ;;  %v4224_v50 = vld [vmem:[%s6826_s3 + $0x1f8] sm:$0xff] (!%p4687_p9) }
 0x297   : > { %v4891_v60 = vpop.f32.mrb[19].mxu0  ;;  %v4910_v61 = vpop.f32.mrb[17].mxu1  ;;  %v4184_v58 = vld [vmem:[%s6826_s3 + $0xb8] sm:$0xff] (!%p4687_p9) }
 0x298   : > { %v3984_v62 = vadd.f32 %v4889_v57, %v3944_v54  ;;  %v4911_v63 = vadd.f32 %v4910_v61, %v4909_v59  ;;  %v4912_v0 = vpop.f32.mrb[18].mxu1  ;;  %v4198_v54 = vld [vmem:[%s6826_s3 + $0x128] sm:$0xff] (!%p4687_p9)  ;;  %v4183_v57 = vld [vmem:[%s6826_s3 + $0xb0] sm:$0xff] (!%p4687_p9)  ;;  %5087 = vmatprep.subr.bf16.mxu1 (!%p4687_p9), %v5086_v56  ;;  %5057 = vmatpush3.bf16.msra.mxu0 (!%p4687_p9), %v5056_v55  ;;  %v5074_v55 = vpack.c.bf16 (!%p4687_p9), %v4192_v46, %v4191_v45 }
 0x299   : > { %v4913_v1 = vpop.f32.mrb[19].mxu1  ;;  %v4167_v59 = vld [vmem:[%s6826_s3 + $0x30] sm:$0xff] (!%p4687_p9)  ;;  %v5088_v60 = vpack.c.bf16 (!%p4687_p9), %v4198_v54, %v4197_v53  ;;  %v5058_v61 = vpack.c.bf16 (!%p4687_p9), %v4184_v58, %v4183_v57  ;;  %v4216_v0 = vld [vmem:[%s6826_s3 + $0x1b8] sm:$0xff] (!%p4687_p9)  ;;  %v5104_v54 = vpack.c.bf16 (!%p4687_p9), %v4206_v44, %v4205_v41  ;;  %v5106_v58 = vpack.c.bf16 (!%p4687_p9), %v4224_v50, %v4223_v49 }
 0x29a   : > { %v4024_v2 = vadd.f32 %v4911_v63, %v3984_v62  ;;  %v4168_v62 = vld [vmem:[%s6826_s3 + $0x38] sm:$0xff] (!%p4687_p9)  ;;  %v4215_v63 = vld [vmem:[%s6826_s3 + $0x1b0] sm:$0xff] (!%p4687_p9) }
 0x29b   : > { %v5090_v1 = vpack.c.bf16 (!%p4687_p9), %v4216_v0, %v4215_v63  ;;  %5089 = vmatpush3.bf16.msra.mxu1 (!%p4687_p9), %v5088_v60  ;;  %5059 = vmatprep.subr.bf16.mxu0 (!%p4687_p9), %v5058_v61  ;;  %v4175_v56 = vld [vmem:[%s6826_s3 + $0x70] sm:$0xff] (!%p4687_p9)  ;;  %v4176_v57 = vld [vmem:[%s6826_s3 + $0x78] sm:$0xff] (!%p4687_p9) }
 0x29c   : > { %v4208_v60 = vld [vmem:[%s6826_s3 + $0x178] sm:$0xff] (!%p4687_p9) }
 0x29d   : > { %5091 = vmatprep.subr.bf16.mxu1 (!%p4687_p9), %v5090_v1  ;;  %v4688_v1 = vld [vmem:[%s6827_s4] ss:$0 sm:$0xff] (!%p4687_p9) }
 0x2b4   : > { %v4931_v3 = vpop.f32.mrb[20].mxu0 }
 0x2b5   : > { %v4932_v4 = vpop.f32.mrb[21].mxu0 }
 0x2b6   : > { %v4933_v5 = vadd.f32 %v4932_v4, %v4931_v3  ;;  %v4934_v6 = vpop.f32.mrb[22].mxu0  ;;  %v4953_v7 = vpop.f32.mrb[20].mxu1  ;;  %v4200_v3 = vld [vmem:[%s6826_s3 + $0x138] sm:$0xff] (!%p4687_p9)  ;;  %v4185_v4 = vld [vmem:[%s6826_s3 + $0xc0] sm:$0xff] (!%p4687_p9) }
 0x2b7   : > { %v4935_v8 = vpop.f32.mrb[23].mxu0  ;;  %v4954_v9 = vpop.f32.mrb[21].mxu1 }
 0x2b8   : > { %v4064_v10 = vadd.f32 %v4933_v5, %v4024_v2  ;;  %v4955_v12 = vadd.f32 %v4954_v9, %v4953_v7  ;;  %v4956_v13 = vpop.f32.mrb[22].mxu1  ;;  %v4199_v2 = vld [vmem:[%s6826_s3 + $0x130] sm:$0xff] (!%p4687_p9)  ;;  %v5441_v5 = vmov (!%p4687_p9), 1983009808   ;;  %v4186_v7 = vld [vmem:[%s6826_s3 + $0xc8] sm:$0xff] (!%p4687_p9)  ;;  %v5060_v8 = vpack.c.bf16 (!%p4687_p9), %v4168_v62, %v4167_v59  ;;  %v4217_v9 = vld [vmem:[%s6826_s3 + $0x1c0] sm:$0xff] (!%p4687_p9) }
 0x2b9   : > { %v4957_v14 = vpop.f32.mrb[23].mxu1  ;;  %v4235_v6 = vunpack.c.l.s4 (!%p4687_p9), %v5441_v5  ;;  %v5062_v13 = vpack.c.bf16 (!%p4687_p9), %v4186_v7, %v4185_v4  ;;  %v4207_v59 = vld [vmem:[%s6826_s3 + $0x170] sm:$0xff] (!%p4687_p9)  ;;  %v5076_v62 = vpack.c.bf16 (!%p4687_p9), %v4176_v57, %v4175_v56 }
 0x2ba   : > { %v4104_v15 = vadd.f32 %v4955_v12, %v4064_v10  ;;  %v4218_v10 = vld [vmem:[%s6826_s3 + $0x1c8] sm:$0xff] (!%p4687_p9)  ;;  %v5092_v12 = vpack.c.bf16 (!%p4687_p9), %v4200_v3, %v4199_v2  ;;  %v4169_v14 = vld [vmem:[%s6826_s3 + $0x40] sm:$0xff] (!%p4687_p9)  ;;  %5061 = vmatpush3.bf16.msra.mxu0 (!%p4687_p9), %v5060_v8  ;;  %v5108_v63 = vpack.c.bf16 (!%p4687_p9), %v4208_v60, %v4207_v59 }
 0x2bb   : > { %5063 = vmatprep.subr.bf16.mxu0 (!%p4687_p9), %v5062_v13 }
 0x2bc   : > { %5093 = vmatpush3.bf16.msra.mxu1 (!%p4687_p9), %v5092_v12 }
 0x2c3   : > { %4159 = sbr.rel (%p4687_p9) target bundleno = 948 (0x3b4), region = 85 }
 0x2c4   : > { %v4143_v16 = vpop.f32.mrb[24].mxu0 }
 0x2c5   : > { %v4144_v17 = vadd.f32 %v4143_v16, %v4104_v15  ;;  %v5044_v18 = vpop.f32.mrb[25].mxu0  ;;  %v4170_v15 = vld [vmem:[%s6826_s3 + $0x48] sm:$0xff] (!%p4687_p9)  ;;  %v4201_v16 = vld [vmem:[%s6826_s3 + $0x140] sm:$0xff] (!%p4687_p9) }
 0x2c6   : > { %v4146_v19 = vpop.f32.mrb[26].mxu0  ;;  %v4202_v18 = vld [vmem:[%s6826_s3 + $0x148] sm:$0xff] (!%p4687_p9)  ;;  %v5064_v24 = vpack.c.bf16 (!%p4687_p9), %v4170_v15, %v4169_v14 }
 0x2c7   : > { %v4149_v20 = vmax.f32 %v4144_v17, 0.0  ;;  %v5045_v21 = vpop.f32.mrb[27].mxu0  ;;  %v5094_v17 = vpack.c.bf16 (!%p4687_p9), %v4218_v10, %v4217_v9  ;;  %v4187_v19 = vld [vmem:[%s6826_s3 + $0xd0] sm:$0xff] (!%p4687_p9)  ;;  %v5096_v25 = vpack.c.bf16 (!%p4687_p9), %v4202_v18, %v4201_v16 }
 0x2c8   : > { %v4236_v21 = vunpack.c.0.s8 (!%p4687_p9), %v4235_v6  ;;  %5065 = vmatpush3.bf16.msra.mxu0 (!%p4687_p9), %v5064_v24 }
 0x2c9   : > { %4155 = vst [vmem:[%s4154_s10] sm:$0x3] %v4149_v20  ;;  %v4188_v20 = vld [vmem:[%s6826_s3 + $0xd8] sm:$0xff] (!%p4687_p9)  ;;  %5095 = vmatprep.subr.bf16.mxu1 (!%p4687_p9), %v5094_v17 }
 0x2ca   : > { %v5066_v26 = vpack.c.bf16 %v4188_v20, %v4187_v19  ;;  %v4239_v34 = vsub.s32 %v4236_v21, %v6306_v11  ;;  %5097 = vmatpush3.bf16.msra.mxu1 %v5096_v25  ;;  %v4174_v11 = vld [vmem:[%s6826_s3 + $0x68] sm:$0xff] }
 0x2cb   : > { %5099 = vmatprep.subr.bf16.mxu1 %v5098_v30  ;;  %v5072_v51 = vpack.c.bf16 %v4174_v11, %v4173_v38 }
 0x2cc   : > { %5067 = vmatprep.subr.bf16.mxu0 %v5066_v26 }
 0x2cd   : > { %5069 = vmatpush3.bf16.msra.mxu0 %v5068_v37 }
 0x2ce   : > { %5101 = vmatpush3.bf16.msra.mxu1 %v5100_v39  ;;  %5071 = vmatprep.subr.bf16.mxu0 %v5070_v40 }
 0x2cf   : > { %5103 = vmatprep.subr.bf16.mxu1 %v5102_v43 }
 0x2d0   : > { %v4160_v42 = vld [vmem:[#allocation5] sm:$0xff] }
 0x2d1   : > { %v4240_v47 = vrot.slane %v4160_v42, %v4239_v34  ;;  %v4233_v48 = vcombine.high %v4160_v42, %v4160_v42  ;;  %5073 = vmatpush3.bf16.msra.mxu0 %v5072_v51 }
 0x2d2   : > { %5105 = vmatpush3.bf16.msra.mxu1 %v5104_v54  ;;  %5075 = vmatprep.subr.bf16.mxu0 %v5074_v55 }
 0x2d3   : > { %v4248_v52 = vcombine.high %v4240_v47, %v4240_v47  ;;  %v4247_v53 = vrot.slane %v4233_v48, %v4239_v34  ;;  %5107 = vmatprep.subr.bf16.mxu1 %v5106_v58 }
 0x2d5   : > { %4318 = vmatprep.mubr.f32.mxu0 %v4248_v52  ;;  %v4249_v61 = vcombine.high %v4247_v53, %v4247_v53  ;;  %5077 = vmatpush3.bf16.msra.mxu0 %v5076_v62 }
 0x2d6   : > { %5109 = vmatpush3.bf16.msra.mxu1 %v5108_v63 }
 0x2d7   : > { %4388 = vmatprep.mubr.f32.mxu1 %v4249_v61 }
 0x2d8   : > { %4319 = vmatmul.mubr.f32.vlgmr.msra.gmra.mrb[0].mxu0 %v4240_v47 }
 0x2d9   : > { %4389 = vmatmul.mubr.f32.vlgmr.msra.gmra.mrb[0].mxu1 %v4247_v53 }
 0x3ab   : > { %v4996_v0 = vpop.f32.mrb[0].mxu0 }
 0x3ac   : > { %v4997_v2 = vpop.f32.mrb[1].mxu0  ;;  %v5031_v3 = vpop.f32.mrb[0].mxu1 }
 0x3ad   : > { %v4998_v4 = vadd.f32 %v4997_v2, %v4996_v0  ;;  %v5032_v5 = vpop.f32.mrb[1].mxu1 }
 0x3ae   : > { %v5033_v6 = vadd.f32 %v5032_v5, %v5031_v3 }
 0x3af   : > { %v4321_v7 = vadd.f32 %v4998_v4, %v4688_v1 }
 0x3b1   : > { %v4391_v8 = vadd.f32 %v5033_v6, %v4321_v7 }
 0x3b3   : > { %4395 = vst.msk [vmem:[#allocation3] sm:$0x3] %vm4394_vm2, %v4391_v8 }
 0x3b4 PF: > { %p5120_p10 = scmp.eq.s32.totalorder %s5495_s24, 3  ;;  %s5442_s21 = smov [#allocation3]  }
 0x3b5   : > { %s4403_s23 = sshll.u32 %s5442_s21, 4  ;;  %s5443_s26 = smov [#allocation5]   ;;  %s4404_s23 = int_to_ptr.vmem [resolvable:$true] %s4403_s23 }
 0x3b6   : > { %s4414_s27 = sshll.u32 %s5443_s26, 4  ;;  %s5354_s29 = scalar_lea.vmem %s4404_s23, 32  ;;  %s4415_s27 = int_to_ptr.vmem [resolvable:$true] %s4414_s27 }
 0x3b7   : > { %p5355_p11 = scmp.ne.s32.totalorder %s4404_s23, %s5354_s29  ;;  %p5361_p0 = scmp.lt.s32.totalorder %s4404_s23, %s4404_s23 }
 0x3b8   : > { %p5362_p1 = scmp.lt.s32.totalorder %s5354_s29, %s5354_s29 }
 0x3b9   : > { %p5356_p12 = pnand %p5355_p11, %p5120_p10 }
 0x3ba   : > { %p5363_p2 = por %p5362_p1, %p5361_p0 }
 0x3bb   : > { %p5357_p13 = pneg %p5356_p12 }
 0x3bd   : > { %p5364_p3 = pnand %p5363_p2, %p5357_p13 }
 0x3bf   : > { %5367 = shalt.err (!%p5364_p3)
}
 0x3c0   : > { %s5368_s8 = scalar_lea.hbm %s6828_s5, 32 }
 0x3c1   : > { %p5369_p4 = scmp.ne.s32.totalorder %s6828_s5, %s5368_s8  ;;  %p5374_p7 = scmp.lt.u32.totalorder %s5368_s8, %s6828_s5 }
 0x3c3   : > { %p5370_p5 = pnand %p5369_p4, %p5120_p10 }
 0x3c5   : > { %p5371_p6 = pneg %p5370_p5 }
 0x3c7   : > { %p5376_p8 = pnand %p5374_p7, %p5371_p6 }
 0x3c9   : > { %5379 = shalt.err (!%p5376_p8)
}
 0x3ca   : > { %5113 = dma.vmem_to_hbm [thread:$0]  (%p5120_p10), %s4404_s23, 32, %s6828_s5, [#allocation4]  }
 0x3cb   : > { %s5380_s15 = scalar_lea.vmem %s4415_s27, 128  ;;  %p5387_p13 = scmp.lt.s32.totalorder %s4415_s27, %s4415_s27 }
 0x3cc   : > { %p5381_p9 = scmp.ne.s32.totalorder %s4415_s27, %s5380_s15  ;;  %p5388_p0 = scmp.lt.s32.totalorder %s5380_s15, %s5380_s15 }
 0x3ce   : > { %p5382_p11 = pnand %p5381_p9, %p5120_p10  ;;  %p5389_p1 = por %p5388_p0, %p5387_p13 }
 0x3d0   : > { %p5383_p12 = pneg %p5382_p11 }
 0x3d2   : > { %p5390_p2 = pnand %p5389_p1, %p5383_p12 }
 0x3d4   : > { %5393 = shalt.err (!%p5390_p2)
}
 0x3d5   : > { %s5394_s18 = scalar_lea.hbm %s6829_s6, 128 }
 0x3d6   : > { %p5395_p3 = scmp.ne.s32.totalorder %s6829_s6, %s5394_s18  ;;  %p5400_p6 = scmp.lt.u32.totalorder %s5394_s18, %s6829_s6 }
 0x3d8   : > { %p5396_p4 = pnand %p5395_p3, %p5120_p10 }
 0x3da   : > { %p5397_p5 = pneg %p5396_p4 }
 0x3dc   : > { %p5402_p7 = pnand %p5400_p6, %p5397_p5 }
 0x3de   : > { %5405 = shalt.err (!%p5402_p7)
}
 0x3df   : > { %5115 = dma.vmem_to_hbm [thread:$0]  (%p5120_p10), %s4415_s27, 128, %s6829_s6, [#allocation6]  }
 0x3e0   : > { %5419 = dma.done.wait (%p5120_p10), [#allocation4], 32  }
 0x3e1   : > { %5421 = vsyncadd (%p5120_p10), [#allocation4], 4294967264 }
 0x3e2   : > { %5423 = dma.done.wait (%p5120_p10), [#allocation6], 128  }
 0x3e3   : > { %5425 = vsyncadd (%p5120_p10), [#allocation6], 4294967168 }
 0x3e4 PF: > { %p16_p8 = scmp.ge.s32.totalorder %s5498_s25, 6   ;;  %s6830_s21 = smov %s5432_s22 }
 0x3e5   : > { %s6831_s22 = smov %s5507_s28  ;;  %s6832_s23 = smov %s5498_s25 }
 0x3e6   :  { %18 = sbr.rel (!%p16_p8) target bundleno = 3 (0x3), region = 129 }
 0x3ed   :  { %4431 = vsyncpa [#allocation4], 1 }
 0x3ee   :  { %4433 = vsyncpa [#allocation4 + $0x1], 1 }
 0x3ef   :  { %4434 = vsyncpa [#allocation6], 1 }

</bundles_post_ra>
